<compile_context>
chip_gen: v7x
topology: tpu7x:2x2x1
jax: 0.10.0
libtpu: 0.0.40
codegen_flags: <defaults>
</compile_context>

<pallas_src>
import math
from functools import partial

import jax
import jax.numpy as jnp
from jax.experimental import pallas as pl
from jax.experimental.pallas import tpu as pltpu


# ----------------------------- Pallas kernel --------------------------------

def _dgn_fused_kernel(wagg_ref, h0_ref, aux_ref, pool_ref, wpost_ref, bs_ref,
                      w1_ref, w2_ref, w3t_ref, bro_ref, out_ref,
                      *, bn, dh, n_layers, d1, d2):
    """B graphs per grid step, nodes stacked along rows (bn = B*N).
    L x (aggregate -> scalers -> posttrans -> folded graph_norm/BN -> ReLU ->
    residual), then batched mean readout + MLPReadout, all in one body."""
    # Per-step constants: loaded once, hoisted out of the unrolled layer loop.
    wagg = wagg_ref[...]                  # (3bn, bn) block-diag [mean; av; dx]
    aux = aux_ref[...]                    # (bn, 2) = [amplification | snorm]
    amp = aux[:, 0:1]
    snorm = aux[:, 1:2]
    h = h0_ref[...]                       # (bn, dh)

    for l in range(n_layers):             # static unroll (L is small)
        # All 3 aggregators for all B graphs in one K=bn (=128) MXU push.
        m = jnp.dot(wagg, h, preferred_element_type=jnp.float32)     # (3bn, dh)
        # Single K=3*dh contraction instead of three small matmuls.
        m_cat = jnp.concatenate([m[0:bn], m[bn:2 * bn], m[2 * bn:3 * bn]],
                                axis=1)                               # (bn, 3dh)
        # TODO(synk): signed 'dir1-dx' kept (reference); wrap m[2*bn:3*bn] in
        # jnp.abs for the 'dir1-dx-abs' aggregator variant.
        y2 = jnp.dot(m_cat, wpost_ref[l], preferred_element_type=jnp.float32)
        # scalers [identity, amplification]; amp is per-row so it factors out.
        y = y2[:, 0:dh] + amp * y2[:, dh:2 * dh]
        # graph_norm + eval BatchNorm folded into one affine transform.
        bs = bs_ref[l]                                                # (1, 2dh)
        y = (y + bs[:, 0:dh]) * snorm + bs[:, dh:2 * dh]
        y = jnp.maximum(y, 0.0)                                       # ReLU
        h = y + h                                                     # residual

    # dgl.mean_nodes for all B graphs at once via a (B, bn) averaging matrix,
    # then a batched MLPReadout; final layer emitted lane-dense as (1, B).
    hg = jnp.dot(pool_ref[...], h, preferred_element_type=jnp.float32)  # (B, dh)
    bro = bro_ref[...]                                                # (1, d1+d2+1)
    r = jnp.dot(hg, w1_ref[...], preferred_element_type=jnp.float32) + bro[:, 0:d1]
    r = jnp.maximum(r, 0.0)
    r = jnp.dot(r, w2_ref[...], preferred_element_type=jnp.float32) + bro[:, d1:d1 + d2]
    r = jnp.maximum(r, 0.0)
    scores = jnp.dot(w3t_ref[...], r.T, preferred_element_type=jnp.float32)
    out_ref[...] = scores + bro[:, d1 + d2:d1 + d2 + 1]               # (1, B)


# ------------------------------ wrappers -------------------------------------

def _per_step_spec(shape):
    """Block = one grid step; leading step axis squeezed out of the kernel Ref."""
    nd = len(shape)
    return pl.BlockSpec((None,) + tuple(shape[1:]),
                        lambda s, _nd=nd: (s,) + (0,) * (_nd - 1))


def _shared_spec(shape):
    """Whole-array block, identical for every grid step (loaded once)."""
    nd = len(shape)
    return pl.BlockSpec(tuple(shape), lambda s, _nd=nd: (0,) * _nd)


def fold_params(params):
    """One-time (per checkpoint) repacking: fold eval-mode BatchNorm into the
    posttrans weights, merge bias/shift slabs, pre-transpose the last readout
    layer. Hoisted OUT of the per-batch jitted forward (perf-review item)."""
    hidden = params['emb_h'].shape[1]
    w_stack, bs_stack = [], []
    for lp in params['layers']:
        inv = jax.lax.rsqrt(lp['bn_var'] + 1e-5)                    # (1, Dout)
        s = lp['bn_gamma'] * inv
        W = lp['w_post']                                            # (6Dh, Dout)
        blk = [W[k * hidden:(k + 1) * hidden] for k in range(6)]
        wk = [jnp.concatenate([blk[k] * s, blk[k + 3] * s], axis=1)
              for k in range(3)]                                    # (Dh, 2Dout)
        w_stack.append(jnp.concatenate(wk, axis=0))                 # (3Dh, 2Dout)
        b_post = lp['b_post'] * s                                   # (1, Dout)
        shift = lp['bn_beta'] - lp['bn_mean'] * s                   # (1, Dout)
        bs_stack.append(jnp.concatenate([b_post, shift], axis=1))   # (1, 2Dout)
    rp = params['readout']
    return dict(
        emb_h=params['emb_h'],
        w_post=jnp.stack(w_stack),                                  # (L,3Dh,2Dout)
        bias_shift=jnp.stack(bs_stack),                             # (L,1,2Dout)
        w1=rp['w1'], w2=rp['w2'], w3t=rp['w3'].T,                   # (1, d2)
        b_ro=jnp.concatenate([rp['b1'], rp['b2'], rp['b3']], axis=1),
    )


@jax.jit
def dgn_net_forward(folded, atom_types, A, eig, snorm_n, avg_d_log):
    """DGNNet.forward (eval) for a padded batch of G graphs with N nodes each."""
    G, N = atom_types.shape
    dh = folded['emb_h'].shape[1]
    L, _, two_dout = folded['w_post'].shape
    d1 = folded['w1'].shape[1]
    d2 = folded['w2'].shape[1]
    assert two_dout // 2 == dh  # residual + amp-factoring assume Dout == Dh

    # Graphs per grid step: fill >= 128 matmul rows (MXU / vreg quantum).
    B = max(1, min(G, 128 // max(N, 1)))
    while G % B:
        B -= 1
    S = G // B                 # >= 2 here -> both v7x TensorCores get work
    BN = B * N

    # ---- glue: per-graph aggregation operators (cheap O(N^2) XLA precompute)
    deg = jnp.sum(A, axis=-1, keepdims=True)                        # (G,N,1)
    w_mean = A / jnp.maximum(deg, 1.0)
    diff = (eig[:, None, :] - eig[:, :, None]) * A                  # adj-masked
    norm = jnp.sum(jnp.abs(diff), axis=-1, keepdims=True) + 1e-8
    w_dx = diff / norm
    w_av = jnp.abs(diff) / norm
    rowsum = jnp.sum(w_dx, axis=-1)                                 # (G,N)
    w_dx = w_dx - rowsum[:, :, None] * jnp.eye(N, dtype=A.dtype)[None]

    # Block-diagonal stacking: B graphs per step share one (3*BN, BN) operator
    # so aggregation is a single 128-deep MXU contraction per layer.
    eye_b = jnp.eye(B, dtype=jnp.float32)

    def block_diag(W):                                              # (G,N,N)->(S,BN,BN)
        Wg = W.reshape(S, B, N, N)
        full = Wg[:, :, None, :, :] * eye_b[None, :, :, None, None]
        return full.transpose(0, 1, 3, 2, 4).reshape(S, BN, BN)

    wagg = jnp.concatenate(
        [block_diag(w_mean), block_diag(w_av), block_diag(w_dx)], axis=1)

    # amplification scaler uses the dataset-level avg_d['log'] statistic
    amp = jnp.log(deg + 1.0) / jnp.maximum(avg_d_log, 1e-6)         # (G,N,1)
    aux = jnp.concatenate([amp, snorm_n], axis=-1).reshape(S, BN, 2)

    # embedding gather (in_feat_dropout = identity in eval); pos_enc_dim == 0
    # -> no embedding_pos_enc; edge_feat=False -> edge embedding unused.
    h0 = folded['emb_h'][atom_types].reshape(S, BN, dh)

    # per-graph mean-pool matrix (shared across steps)
    pool = jnp.repeat(eye_b, N, axis=1) / float(N)                  # (B, BN)

    args = (wagg, h0, aux, pool, folded['w_post'], folded['bias_shift'],
            folded['w1'], folded['w2'], folded['w3t'], folded['b_ro'])
    in_specs = ([_per_step_spec(a.shape) for a in args[:3]]
                + [_shared_spec(a.shape) for a in args[3:]])

    out = pl.pallas_call(
        partial(_dgn_fused_kernel, bn=BN, dh=dh, n_layers=L, d1=d1, d2=d2),
        out_shape=jax.ShapeDtypeStruct((S, 1, B), jnp.float32),
        grid=(S,),
        in_specs=in_specs,
        out_specs=_per_step_spec((S, 1, B)),
        compiler_params=pltpu.CompilerParams(
            dimension_semantics=("parallel",)),
    )(*args)
    return out.reshape(G, 1)                                        # graph g = s*B + b


# --------------------------- parameter creation ------------------------------

def init_params(key, num_atom_type, hidden, out_dim, n_layers):
    keys = jax.random.split(key, 1 + n_layers + 3)
    p = {'emb_h': jax.random.normal(keys[0], (num_atom_type, hidden),
                                    jnp.float32) * 0.1}
    layers = []
    for i in range(n_layers):
        kw = keys[1 + i]
        layers.append(dict(
            w_post=jax.random.normal(kw, (6 * hidden, out_dim), jnp.float32)
                   * (1.0 / math.sqrt(6 * hidden)),
            b_post=jnp.zeros((1, out_dim), jnp.float32),
            bn_gamma=jnp.ones((1, out_dim), jnp.float32),
            bn_beta=jnp.zeros((1, out_dim), jnp.float32),
            bn_mean=jnp.zeros((1, out_dim), jnp.float32),
            bn_var=jnp.ones((1, out_dim), jnp.float32),
        ))
    p['layers'] = layers
    d1, d2 = out_dim // 2, out_dim // 4
    kr = keys[1 + n_layers:]
    p['readout'] = dict(
        w1=jax.random.normal(kr[0], (out_dim, d1), jnp.float32) / math.sqrt(out_dim),
        b1=jnp.zeros((1, d1), jnp.float32),
        w2=jax.random.normal(kr[1], (d1, d2), jnp.float32) / math.sqrt(d1),
        b2=jnp.zeros((1, d2), jnp.float32),
        w3=jax.random.normal(kr[2], (d2, 1), jnp.float32) / math.sqrt(d2),
        b3=jnp.zeros((1, 1), jnp.float32),
    )
    return p


# ---------------------------------- main -------------------------------------

if __name__ == "__main__":
    G = 16            # graphs per batch (padded to equal size) -> B=8, 2 steps
    N = 16            # nodes per molecule graph
    HIDDEN = 32       # hidden_dim
    OUT = 32          # out_dim (== hidden so residual is valid every layer)
    L = 3             # n_layers
    NUM_ATOM = 28     # num_atom_type (ZINC)

    key = jax.random.PRNGKey(0)
    kg, ka, kp = jax.random.split(key, 3)

    # deterministic synthetic graphs: random symmetric adjacency + ring
    def make_adj(k):
        upper = jnp.triu(jax.random.bernoulli(k, 0.3, (N, N)).astype(jnp.float32), 1)
        adj = upper + upper.T
        ring = jnp.roll(jnp.eye(N, dtype=jnp.float32), 1, axis=1)
        adj = jnp.clip(adj + ring + ring.T, 0.0, 1.0)
        return adj * (1.0 - jnp.eye(N, dtype=jnp.float32))

    A = jnp.stack([make_adj(k) for k in jax.random.split(kg, G)])   # (G,N,N)
    deg = jnp.sum(A, axis=-1)
    lap = jnp.eye(N, dtype=jnp.float32)[None] * deg[:, :, None] - A
    eig = jnp.linalg.eigh(lap)[1][:, :, 1]                          # Fiedler (G,N)

    atom_types = jax.random.randint(ka, (G, N), 0, NUM_ATOM)        # node feats h
    snorm_n = jnp.full((G, N, 1), 1.0 / math.sqrt(N), jnp.float32)  # graph-size norm

    # dataset-level avg_d['log'] statistic (as used by the reference net_params)
    avg_d_log = jnp.mean(jnp.log(deg + 1.0))

    params = init_params(kp, NUM_ATOM, HIDDEN, OUT, L)
    folded = fold_params(params)      # one-time BN folding, outside the forward

    # TODO(synk): ragged DGL multi-graph batching (variable node counts per
    # graph), 'towers'/'complex' DGN variants and edge features not covered;
    # mean readout assumes every padded graph has exactly N real nodes.
    out = dgn_net_forward(folded, atom_types, A, eig, snorm_n, avg_d_log)
    out = jax.block_until_ready(out)
    assert out.shape == (G, 1) and out.dtype == jnp.float32
    print("KERNEL_OK")
</pallas_src>

<mosaic_0001>
module attributes {stable_mosaic.version = 11 : i64} {
  func.func @_dgn_fused_kernel(%arg0: i32, %arg1: memref<1x384x128xf32, #tpu.memory_space<vmem>>, %arg2: memref<1x128x32xf32, #tpu.memory_space<vmem>>, %arg3: memref<1x128x2xf32, #tpu.memory_space<vmem>>, %arg4: memref<8x128xf32, #tpu.memory_space<vmem>>, %arg5: memref<3x96x64xf32, #tpu.memory_space<vmem>>, %arg6: memref<3x1x64xf32, #tpu.memory_space<vmem>>, %arg7: memref<32x16xf32, #tpu.memory_space<vmem>>, %arg8: memref<16x8xf32, #tpu.memory_space<vmem>>, %arg9: memref<1x8xf32, #tpu.memory_space<vmem>>, %arg10: memref<1x25xf32, #tpu.memory_space<vmem>>, %arg11: memref<1x1x8xf32, #tpu.memory_space<vmem>>) attributes {dimension_semantics = [#tpu.dimension_semantics<parallel>], iteration_bounds = array<i64: 2>, scalar_prefetch = 0 : i64, scratch_operands = 0 : i64, tpu.core_type = #tpu.core_type<tc>, window_params = [{transform_indices = @transform_0, window_bounds = array<i64: 1, 384, 128>}, {transform_indices = @transform_1, window_bounds = array<i64: 1, 128, 32>}, {transform_indices = @transform_2, window_bounds = array<i64: 1, 128, 2>}, {pipeline_mode = #tpu.pipeline_mode<synchronous>, transform_indices = @transform_3, window_bounds = array<i64: 8, 128>}, {pipeline_mode = #tpu.pipeline_mode<synchronous>, transform_indices = @transform_4, window_bounds = array<i64: 3, 96, 64>}, {pipeline_mode = #tpu.pipeline_mode<synchronous>, transform_indices = @transform_5, window_bounds = array<i64: 3, 1, 64>}, {pipeline_mode = #tpu.pipeline_mode<synchronous>, transform_indices = @transform_6, window_bounds = array<i64: 32, 16>}, {pipeline_mode = #tpu.pipeline_mode<synchronous>, transform_indices = @transform_7, window_bounds = array<i64: 16, 8>}, {pipeline_mode = #tpu.pipeline_mode<synchronous>, transform_indices = @transform_8, window_bounds = array<i64: 1, 8>}, {pipeline_mode = #tpu.pipeline_mode<synchronous>, transform_indices = @transform_9, window_bounds = array<i64: 1, 25>}, {transform_indices = @transform_10, window_bounds = array<i64: 1, 1, 8>}]} {
    %c0 = arith.constant 0 : index
    %c0_0 = arith.constant 0 : index
    %c0_1 = arith.constant 0 : index
    %0 = vector.load %arg1[%c0, %c0_0, %c0_1] : memref<1x384x128xf32, #tpu.memory_space<vmem>>, vector<1x384x128xf32>
    %1 = vector.shape_cast %0 : vector<1x384x128xf32> to vector<384x128xf32>
    %c0_2 = arith.constant 0 : index
    %c0_3 = arith.constant 0 : index
    %c0_4 = arith.constant 0 : index
    %2 = vector.load %arg3[%c0_2, %c0_3, %c0_4] : memref<1x128x2xf32, #tpu.memory_space<vmem>>, vector<1x128x2xf32>
    %3 = vector.shape_cast %2 : vector<1x128x2xf32> to vector<128x2xf32>
    %4 = vector.extract_strided_slice %3 {offsets = [0, 0], sizes = [128, 1], strides = [1, 1]} : vector<128x2xf32> to vector<128x1xf32>
    %5 = vector.extract_strided_slice %3 {offsets = [0, 1], sizes = [128, 1], strides = [1, 1]} : vector<128x2xf32> to vector<128x1xf32>
    %c0_5 = arith.constant 0 : index
    %c0_6 = arith.constant 0 : index
    %c0_7 = arith.constant 0 : index
    %6 = vector.load %arg2[%c0_5, %c0_6, %c0_7] : memref<1x128x32xf32, #tpu.memory_space<vmem>>, vector<1x128x32xf32>
    %7 = vector.shape_cast %6 : vector<1x128x32xf32> to vector<128x32xf32>
    %cst = arith.constant dense<0.000000e+00> : vector<384x32xf32>
    %8 = tpu.matmul %1, %7, %cst {dimension_numbers = #tpu.dot_dimension_numbers<[1], [0], [0], [1], [0, 0, 1, 1], [], []>} : vector<384x128xf32>, vector<128x32xf32>, vector<384x32xf32> -> vector<384x32xf32>
    %9 = vector.extract_strided_slice %8 {offsets = [0, 0], sizes = [128, 32], strides = [1, 1]} : vector<384x32xf32> to vector<128x32xf32>
    %10 = vector.extract_strided_slice %8 {offsets = [128, 0], sizes = [128, 32], strides = [1, 1]} : vector<384x32xf32> to vector<128x32xf32>
    %11 = vector.extract_strided_slice %8 {offsets = [256, 0], sizes = [128, 32], strides = [1, 1]} : vector<384x32xf32> to vector<128x32xf32>
    %12 = tpu.concatenate %9, %10, %11 in 1 : vector<128x32xf32>, vector<128x32xf32>, vector<128x32xf32> -> vector<128x96xf32>
    %c0_8 = arith.constant 0 : index
    %c0_9 = arith.constant 0 : index
    %c0_10 = arith.constant 0 : index
    %13 = vector.load %arg5[%c0_8, %c0_9, %c0_10] : memref<3x96x64xf32, #tpu.memory_space<vmem>>, vector<1x96x64xf32>
    %14 = vector.shape_cast %13 : vector<1x96x64xf32> to vector<96x64xf32>
    %cst_11 = arith.constant dense<0.000000e+00> : vector<128x64xf32>
    %15 = tpu.matmul %12, %14, %cst_11 {dimension_numbers = #tpu.dot_dimension_numbers<[1], [0], [0], [1], [0, 0, 1, 1], [], []>} : vector<128x96xf32>, vector<96x64xf32>, vector<128x64xf32> -> vector<128x64xf32>
    %16 = vector.extract_strided_slice %15 {offsets = [0, 0], sizes = [128, 32], strides = [1, 1]} : vector<128x64xf32> to vector<128x32xf32>
    %17 = vector.extract_strided_slice %15 {offsets = [0, 32], sizes = [128, 32], strides = [1, 1]} : vector<128x64xf32> to vector<128x32xf32>
    %18 = vector.broadcast %4 : vector<128x1xf32> to vector<128x32xf32>
    %19 = arith.mulf %18, %17 : vector<128x32xf32>
    %20 = arith.addf %16, %19 : vector<128x32xf32>
    %c0_12 = arith.constant 0 : index
    %c0_13 = arith.constant 0 : index
    %c0_14 = arith.constant 0 : index
    %21 = vector.load %arg6[%c0_12, %c0_13, %c0_14] : memref<3x1x64xf32, #tpu.memory_space<vmem>>, vector<1x1x64xf32>
    %22 = vector.shape_cast %21 : vector<1x1x64xf32> to vector<1x64xf32>
    %23 = vector.extract_strided_slice %22 {offsets = [0, 0], sizes = [1, 32], strides = [1, 1]} : vector<1x64xf32> to vector<1x32xf32>
    %24 = vector.broadcast %23 : vector<1x32xf32> to vector<128x32xf32>
    %25 = arith.addf %20, %24 : vector<128x32xf32>
    %26 = vector.broadcast %5 : vector<128x1xf32> to vector<128x32xf32>
    %27 = arith.mulf %25, %26 : vector<128x32xf32>
    %28 = vector.extract_strided_slice %22 {offsets = [0, 32], sizes = [1, 32], strides = [1, 1]} : vector<1x64xf32> to vector<1x32xf32>
    %29 = vector.broadcast %28 : vector<1x32xf32> to vector<128x32xf32>
    %30 = arith.addf %27, %29 : vector<128x32xf32>
    %cst_15 = arith.constant 0.000000e+00 : f32
    %31 = vector.broadcast %cst_15 : f32 to vector<128x32xf32>
    %32 = arith.maximumf %30, %31 : vector<128x32xf32>
    %33 = arith.addf %32, %7 : vector<128x32xf32>
    %cst_16 = arith.constant dense<0.000000e+00> : vector<384x32xf32>
    %34 = tpu.matmul %1, %33, %cst_16 {dimension_numbers = #tpu.dot_dimension_numbers<[1], [0], [0], [1], [0, 0, 1, 1], [], []>} : vector<384x128xf32>, vector<128x32xf32>, vector<384x32xf32> -> vector<384x32xf32>
    %35 = vector.extract_strided_slice %34 {offsets = [0, 0], sizes = [128, 32], strides = [1, 1]} : vector<384x32xf32> to vector<128x32xf32>
    %36 = vector.extract_strided_slice %34 {offsets = [128, 0], sizes = [128, 32], strides = [1, 1]} : vector<384x32xf32> to vector<128x32xf32>
    %37 = vector.extract_strided_slice %34 {offsets = [256, 0], sizes = [128, 32], strides = [1, 1]} : vector<384x32xf32> to vector<128x32xf32>
    %38 = tpu.concatenate %35, %36, %37 in 1 : vector<128x32xf32>, vector<128x32xf32>, vector<128x32xf32> -> vector<128x96xf32>
    %c1 = arith.constant 1 : index
    %c0_17 = arith.constant 0 : index
    %c0_18 = arith.constant 0 : index
    %39 = vector.load %arg5[%c1, %c0_17, %c0_18] : memref<3x96x64xf32, #tpu.memory_space<vmem>>, vector<1x96x64xf32>
    %40 = vector.shape_cast %39 : vector<1x96x64xf32> to vector<96x64xf32>
    %cst_19 = arith.constant dense<0.000000e+00> : vector<128x64xf32>
    %41 = tpu.matmul %38, %40, %cst_19 {dimension_numbers = #tpu.dot_dimension_numbers<[1], [0], [0], [1], [0, 0, 1, 1], [], []>} : vector<128x96xf32>, vector<96x64xf32>, vector<128x64xf32> -> vector<128x64xf32>
    %42 = vector.extract_strided_slice %41 {offsets = [0, 0], sizes = [128, 32], strides = [1, 1]} : vector<128x64xf32> to vector<128x32xf32>
    %43 = vector.extract_strided_slice %41 {offsets = [0, 32], sizes = [128, 32], strides = [1, 1]} : vector<128x64xf32> to vector<128x32xf32>
    %44 = vector.broadcast %4 : vector<128x1xf32> to vector<128x32xf32>
    %45 = arith.mulf %44, %43 : vector<128x32xf32>
    %46 = arith.addf %42, %45 : vector<128x32xf32>
    %c1_20 = arith.constant 1 : index
    %c0_21 = arith.constant 0 : index
    %c0_22 = arith.constant 0 : index
    %47 = vector.load %arg6[%c1_20, %c0_21, %c0_22] : memref<3x1x64xf32, #tpu.memory_space<vmem>>, vector<1x1x64xf32>
    %48 = vector.shape_cast %47 : vector<1x1x64xf32> to vector<1x64xf32>
    %49 = vector.extract_strided_slice %48 {offsets = [0, 0], sizes = [1, 32], strides = [1, 1]} : vector<1x64xf32> to vector<1x32xf32>
    %50 = vector.broadcast %49 : vector<1x32xf32> to vector<128x32xf32>
    %51 = arith.addf %46, %50 : vector<128x32xf32>
    %52 = vector.broadcast %5 : vector<128x1xf32> to vector<128x32xf32>
    %53 = arith.mulf %51, %52 : vector<128x32xf32>
    %54 = vector.extract_strided_slice %48 {offsets = [0, 32], sizes = [1, 32], strides = [1, 1]} : vector<1x64xf32> to vector<1x32xf32>
    %55 = vector.broadcast %54 : vector<1x32xf32> to vector<128x32xf32>
    %56 = arith.addf %53, %55 : vector<128x32xf32>
    %cst_23 = arith.constant 0.000000e+00 : f32
    %57 = vector.broadcast %cst_23 : f32 to vector<128x32xf32>
    %58 = arith.maximumf %56, %57 : vector<128x32xf32>
    %59 = arith.addf %58, %33 : vector<128x32xf32>
    %cst_24 = arith.constant dense<0.000000e+00> : vector<384x32xf32>
    %60 = tpu.matmul %1, %59, %cst_24 {dimension_numbers = #tpu.dot_dimension_numbers<[1], [0], [0], [1], [0, 0, 1, 1], [], []>} : vector<384x128xf32>, vector<128x32xf32>, vector<384x32xf32> -> vector<384x32xf32>
    %61 = vector.extract_strided_slice %60 {offsets = [0, 0], sizes = [128, 32], strides = [1, 1]} : vector<384x32xf32> to vector<128x32xf32>
    %62 = vector.extract_strided_slice %60 {offsets = [128, 0], sizes = [128, 32], strides = [1, 1]} : vector<384x32xf32> to vector<128x32xf32>
    %63 = vector.extract_strided_slice %60 {offsets = [256, 0], sizes = [128, 32], strides = [1, 1]} : vector<384x32xf32> to vector<128x32xf32>
    %64 = tpu.concatenate %61, %62, %63 in 1 : vector<128x32xf32>, vector<128x32xf32>, vector<128x32xf32> -> vector<128x96xf32>
    %c2 = arith.constant 2 : index
    %c0_25 = arith.constant 0 : index
    %c0_26 = arith.constant 0 : index
    %65 = vector.load %arg5[%c2, %c0_25, %c0_26] : memref<3x96x64xf32, #tpu.memory_space<vmem>>, vector<1x96x64xf32>
    %66 = vector.shape_cast %65 : vector<1x96x64xf32> to vector<96x64xf32>
    %cst_27 = arith.constant dense<0.000000e+00> : vector<128x64xf32>
    %67 = tpu.matmul %64, %66, %cst_27 {dimension_numbers = #tpu.dot_dimension_numbers<[1], [0], [0], [1], [0, 0, 1, 1], [], []>} : vector<128x96xf32>, vector<96x64xf32>, vector<128x64xf32> -> vector<128x64xf32>
    %68 = vector.extract_strided_slice %67 {offsets = [0, 0], sizes = [128, 32], strides = [1, 1]} : vector<128x64xf32> to vector<128x32xf32>
    %69 = vector.extract_strided_slice %67 {offsets = [0, 32], sizes = [128, 32], strides = [1, 1]} : vector<128x64xf32> to vector<128x32xf32>
    %70 = vector.broadcast %4 : vector<128x1xf32> to vector<128x32xf32>
    %71 = arith.mulf %70, %69 : vector<128x32xf32>
    %72 = arith.addf %68, %71 : vector<128x32xf32>
    %c2_28 = arith.constant 2 : index
    %c0_29 = arith.constant 0 : index
    %c0_30 = arith.constant 0 : index
    %73 = vector.load %arg6[%c2_28, %c0_29, %c0_30] : memref<3x1x64xf32, #tpu.memory_space<vmem>>, vector<1x1x64xf32>
    %74 = vector.shape_cast %73 : vector<1x1x64xf32> to vector<1x64xf32>
    %75 = vector.extract_strided_slice %74 {offsets = [0, 0], sizes = [1, 32], strides = [1, 1]} : vector<1x64xf32> to vector<1x32xf32>
    %76 = vector.broadcast %75 : vector<1x32xf32> to vector<128x32xf32>
    %77 = arith.addf %72, %76 : vector<128x32xf32>
    %78 = vector.broadcast %5 : vector<128x1xf32> to vector<128x32xf32>
    %79 = arith.mulf %77, %78 : vector<128x32xf32>
    %80 = vector.extract_strided_slice %74 {offsets = [0, 32], sizes = [1, 32], strides = [1, 1]} : vector<1x64xf32> to vector<1x32xf32>
    %81 = vector.broadcast %80 : vector<1x32xf32> to vector<128x32xf32>
    %82 = arith.addf %79, %81 : vector<128x32xf32>
    %cst_31 = arith.constant 0.000000e+00 : f32
    %83 = vector.broadcast %cst_31 : f32 to vector<128x32xf32>
    %84 = arith.maximumf %82, %83 : vector<128x32xf32>
    %85 = arith.addf %84, %59 : vector<128x32xf32>
    %c0_32 = arith.constant 0 : index
    %c0_33 = arith.constant 0 : index
    %86 = vector.load %arg4[%c0_32, %c0_33] : memref<8x128xf32, #tpu.memory_space<vmem>>, vector<8x128xf32>
    %cst_34 = arith.constant dense<0.000000e+00> : vector<8x32xf32>
    %87 = tpu.matmul %86, %85, %cst_34 {dimension_numbers = #tpu.dot_dimension_numbers<[1], [0], [0], [1], [0, 0, 1, 1], [], []>} : vector<8x128xf32>, vector<128x32xf32>, vector<8x32xf32> -> vector<8x32xf32>
    %c0_35 = arith.constant 0 : index
    %c0_36 = arith.constant 0 : index
    %88 = vector.load %arg10[%c0_35, %c0_36] : memref<1x25xf32, #tpu.memory_space<vmem>>, vector<1x25xf32>
    %c0_37 = arith.constant 0 : index
    %c0_38 = arith.constant 0 : index
    %89 = vector.load %arg7[%c0_37, %c0_38] : memref<32x16xf32, #tpu.memory_space<vmem>>, vector<32x16xf32>
    %cst_39 = arith.constant dense<0.000000e+00> : vector<8x16xf32>
    %90 = tpu.matmul %87, %89, %cst_39 {dimension_numbers = #tpu.dot_dimension_numbers<[1], [0], [0], [1], [0, 0, 1, 1], [], []>} : vector<8x32xf32>, vector<32x16xf32>, vector<8x16xf32> -> vector<8x16xf32>
    %91 = vector.extract_strided_slice %88 {offsets = [0, 0], sizes = [1, 16], strides = [1, 1]} : vector<1x25xf32> to vector<1x16xf32>
    %92 = vector.broadcast %91 : vector<1x16xf32> to vector<8x16xf32>
    %93 = arith.addf %90, %92 : vector<8x16xf32>
    %cst_40 = arith.constant 0.000000e+00 : f32
    %94 = vector.broadcast %cst_40 : f32 to vector<8x16xf32>
    %95 = arith.maximumf %93, %94 : vector<8x16xf32>
    %c0_41 = arith.constant 0 : index
    %c0_42 = arith.constant 0 : index
    %96 = vector.load %arg8[%c0_41, %c0_42] : memref<16x8xf32, #tpu.memory_space<vmem>>, vector<16x8xf32>
    %cst_43 = arith.constant dense<0.000000e+00> : vector<8x8xf32>
    %97 = tpu.matmul %95, %96, %cst_43 {dimension_numbers = #tpu.dot_dimension_numbers<[1], [0], [0], [1], [0, 0, 1, 1], [], []>} : vector<8x16xf32>, vector<16x8xf32>, vector<8x8xf32> -> vector<8x8xf32>
    %98 = vector.extract_strided_slice %88 {offsets = [0, 16], sizes = [1, 8], strides = [1, 1]} : vector<1x25xf32> to vector<1x8xf32>
    %99 = vector.broadcast %98 : vector<1x8xf32> to vector<8x8xf32>
    %100 = arith.addf %97, %99 : vector<8x8xf32>
    %cst_44 = arith.constant 0.000000e+00 : f32
    %101 = vector.broadcast %cst_44 : f32 to vector<8x8xf32>
    %102 = arith.maximumf %100, %101 : vector<8x8xf32>
    %c0_45 = arith.constant 0 : index
    %c0_46 = arith.constant 0 : index
    %103 = vector.load %arg9[%c0_45, %c0_46] : memref<1x8xf32, #tpu.memory_space<vmem>>, vector<1x8xf32>
    %104 = tpu.transpose %102, [1, 0] : vector<8x8xf32> -> vector<8x8xf32>
    %cst_47 = arith.constant dense<0.000000e+00> : vector<1x8xf32>
    %105 = tpu.matmul %103, %104, %cst_47 {dimension_numbers = #tpu.dot_dimension_numbers<[1], [0], [0], [1], [0, 0, 1, 1], [], []>} : vector<1x8xf32>, vector<8x8xf32>, vector<1x8xf32> -> vector<1x8xf32>
    %106 = vector.extract_strided_slice %88 {offsets = [0, 24], sizes = [1, 1], strides = [1, 1]} : vector<1x25xf32> to vector<1x1xf32>
    %107 = vector.broadcast %106 : vector<1x1xf32> to vector<1x8xf32>
    %108 = arith.addf %105, %107 : vector<1x8xf32>
    %c0_48 = arith.constant 0 : index
    %c0_49 = arith.constant 0 : index
    %c0_50 = arith.constant 0 : index
    %109 = vector.load %arg11[%c0_48, %c0_49, %c0_50] : memref<1x1x8xf32, #tpu.memory_space<vmem>>, vector<1x1x8xf32>
    %110 = vector.shape_cast %109 : vector<1x1x8xf32> to vector<1x8xf32>
    %111 = vector.shape_cast %108 : vector<1x8xf32> to vector<1x1x8xf32>
    tpu.vector_store %arg11[%c0_48, %c0_49, %c0_50], %111 {strides = array<i32>} : memref<1x1x8xf32, #tpu.memory_space<vmem>>, vector<1x1x8xf32>,
    return
  }
  func.func @transform_0(%arg0: i32) -> (i32, i32, i32) {
    %c0_i32 = arith.constant 0 : i32
    %c0_i32_0 = arith.constant 0 : i32
    %c0_i32_1 = arith.constant 0 : i32
    return %arg0, %c0_i32, %c0_i32_0 : i32, i32, i32
  }
  func.func @transform_1(%arg0: i32) -> (i32, i32, i32) {
    %c0_i32 = arith.constant 0 : i32
    %c0_i32_0 = arith.constant 0 : i32
    %c0_i32_1 = arith.constant 0 : i32
    return %arg0, %c0_i32, %c0_i32_0 : i32, i32, i32
  }
  func.func @transform_2(%arg0: i32) -> (i32, i32, i32) {
    %c0_i32 = arith.constant 0 : i32
    %c0_i32_0 = arith.constant 0 : i32
    %c0_i32_1 = arith.constant 0 : i32
    return %arg0, %c0_i32, %c0_i32_0 : i32, i32, i32
  }
  func.func @transform_3(%arg0: i32) -> (i32, i32) {
    %c0_i32 = arith.constant 0 : i32
    %c0_i32_0 = arith.constant 0 : i32
    %c0_i32_1 = arith.constant 0 : i32
    return %c0_i32, %c0_i32_0 : i32, i32
  }
  func.func @transform_4(%arg0: i32) -> (i32, i32, i32) {
    %c0_i32 = arith.constant 0 : i32
    %c0_i32_0 = arith.constant 0 : i32
    %c0_i32_1 = arith.constant 0 : i32
    %c0_i32_2 = arith.constant 0 : i32
    return %c0_i32, %c0_i32_0, %c0_i32_1 : i32, i32, i32
  }
  func.func @transform_5(%arg0: i32) -> (i32, i32, i32) {
    %c0_i32 = arith.constant 0 : i32
    %c0_i32_0 = arith.constant 0 : i32
    %c0_i32_1 = arith.constant 0 : i32
    %c0_i32_2 = arith.constant 0 : i32
    return %c0_i32, %c0_i32_0, %c0_i32_1 : i32, i32, i32
  }
  func.func @transform_6(%arg0: i32) -> (i32, i32) {
    %c0_i32 = arith.constant 0 : i32
    %c0_i32_0 = arith.constant 0 : i32
    %c0_i32_1 = arith.constant 0 : i32
    return %c0_i32, %c0_i32_0 : i32, i32
  }
  func.func @transform_7(%arg0: i32) -> (i32, i32) {
    %c0_i32 = arith.constant 0 : i32
    %c0_i32_0 = arith.constant 0 : i32
    %c0_i32_1 = arith.constant 0 : i32
    return %c0_i32, %c0_i32_0 : i32, i32
  }
  func.func @transform_8(%arg0: i32) -> (i32, i32) {
    %c0_i32 = arith.constant 0 : i32
    %c0_i32_0 = arith.constant 0 : i32
    %c0_i32_1 = arith.constant 0 : i32
    return %c0_i32, %c0_i32_0 : i32, i32
  }
  func.func @transform_9(%arg0: i32) -> (i32, i32) {
    %c0_i32 = arith.constant 0 : i32
    %c0_i32_0 = arith.constant 0 : i32
    %c0_i32_1 = arith.constant 0 : i32
    return %c0_i32, %c0_i32_0 : i32, i32
  }
  func.func @transform_10(%arg0: i32) -> (i32, i32, i32) {
    %c0_i32 = arith.constant 0 : i32
    %c0_i32_0 = arith.constant 0 : i32
    %c0_i32_1 = arith.constant 0 : i32
    return %arg0, %c0_i32, %c0_i32_0 : i32, i32, i32
  }
}

</mosaic_0001>

<bundles_post_ra>
// kernel: dgn_net_forward.1
= control target key start
LH: loop header
LB: loop body
LE: loop exit
PB: predicated region body
PF: predicated region fallthrough
CT: control target
= control target key end

     0   :  { %s4862_s13 = smov 0   ;;  %s6405_s0 = inlined_call_operand.vmem [shape: f32[2,384,128], index: 0, kind: input, shape index: {}]   ;;  %s6406_s1 = inlined_call_operand.vmem [shape: f32[2,128,32], index: 1, kind: input, shape index: {}]   ;;  %s6407_s2 = inlined_call_operand.vmem [shape: f32[2,128,2], index: 2, kind: input, shape index: {}]   ;;  %s6408_s3 = inlined_call_operand.vmem [shape: f32[8,128], index: 3, kind: input, shape index: {}]   ;;  %s6409_s4 = inlined_call_operand.vmem [shape: f32[3,96,64], index: 4, kind: input, shape index: {}]   ;;  %s6410_s5 = inlined_call_operand.vmem [shape: f32[3,1,64], index: 5, kind: input, shape index: {}]   ;;  %s6411_s6 = inlined_call_operand.vmem [shape: f32[32,16], index: 6, kind: input, shape index: {}]   ;;  %s6412_s7 = inlined_call_operand.vmem [shape: f32[16,8], index: 7, kind: input, shape index: {}]   ;;  %s6413_s8 = inlined_call_operand.vmem [shape: f32[1,8], index: 8, kind: input, shape index: {}]   ;;  %s6414_s9 = inlined_call_operand.vmem [shape: f32[1,25], index: 9, kind: input, shape index: {}]   ;;  %s6415_s10 = inlined_call_operand.vmem [shape: f32[2,1,8], index: 10, kind: output, shape index: {}]  }
   0x1 LB: > { %s3590_s14 = sadd.s32 4294967295, %s4795_s13   ;;  %p3594_p0 = scmp.ge.s32.totalorder %s4795_s13, 1  ;;  %s4795_s13 = sphi %s4862_s13, %s20_s13  }
   0x2   : > { %p332_p1 = scmp.lt.s32.totalorder %s4795_s13, 3 }
   0x4   : > { %p333_p2 = pnand %p3594_p0, %p332_p1 }
   0x6   : > { %336 = sbr.rel (%p333_p2) target bundleno = 3233 (0xca1), region = 60 }
   0xd   : > { %p378_p3 = scmp.lt.s32.totalorder %s3590_s14, 1  ;;  %s4797_s27 = smov 32   ;;  %vm909_vm0 = vcmask 261120   ;;  %vm926_vm1 = vcmask 523264   ;;  %vm955_vm2 = vcmask 785408   ;;  %vm4803_vm3 = vmmov 0  }
   0xe   : > { %s4798_s17 = smov 64   ;;  %s4801_s24 = smov 96   ;;  %vm3356_vm4 = vcmask 130048   ;;  %vm3440_vm5 = vcmask 64512   ;;  %vm3517_vm6 = vcmask 57344  }
   0xf   : > { %s6700_s14 = smov (!%p378_p3, %s3590_s14), 1 }
  0x10   : > { %s4703_s15 = smul.u32 384, %s6700_s14  ;;  %s3683_s16 = sshll.u32 %s6700_s14, 7 }
  0x11   : > { %s4879_s19 = scalar_lea.vmem %s6406_s1, %s3683_s16  ;;  %s5059_s21 = scalar_lea.vmem %s6407_s2, %s3683_s16 }
  0x12   : > { %v4882_v0 = vld [vmem:[%s4879_s19] sm:$0xff]  ;;  %v4885_v1 = vld [vmem:[%s4879_s19 + $0x8] sm:$0xff]  ;;  %v462_v2 = vld [vmem:[%s4879_s19 + $0x10] sm:$0xff]  ;;  %s4894_s22 = scalar_lea.vmem %s6405_s0, %s4703_s15  ;;  %s395_s12 = scalar_lea.vmem %s6415_s10, %s6700_s14 }
  0x13   : > { %v4502_v3 = vpack.c.bf16 %v4885_v1, %v4882_v0  ;;  %v463_v4 = vld [vmem:[%s4879_s19 + $0x18] sm:$0xff]  ;;  %v464_v6 = vld [vmem:[%s4879_s19 + $0x20] sm:$0xff]  ;;  %v465_v7 = vld [vmem:[%s4879_s19 + $0x28] sm:$0xff] }
  0x14   : > { %v4506_v5 = vpack.c.bf16 %v463_v4, %v462_v2  ;;  %v4510_v8 = vpack.c.bf16 %v465_v7, %v464_v6  ;;  %v396_v9 = vld [vmem:[%s4894_s22] sm:$0xff]  ;;  %v466_v10 = vld [vmem:[%s4879_s19 + $0x30] sm:$0xff]  ;;  %v467_v11 = vld [vmem:[%s4879_s19 + $0x38] sm:$0xff] }
  0x15   : > { %4503 = vmatprep.subr.bf16.mxu0 %v4502_v3  ;;  %4020 = vmatprep.mubr.f32.mxu0 %v396_v9  ;;  %v4514_v12 = vpack.c.bf16 %v467_v11, %v466_v10  ;;  %v468_v13 = vld [vmem:[%s4879_s19 + $0x40] sm:$0xff]  ;;  %v469_v14 = vld [vmem:[%s4879_s19 + $0x48] sm:$0xff]  ;;  %v470_v16 = vld [vmem:[%s4879_s19 + $0x50] sm:$0xff] }
  0x16   : > { %4505 = vmatpush3.bf16.msra.mxu0 %v4502_v3  ;;  %4172 = vmatprep.mubr.f32.mxu1 %v396_v9  ;;  %v4518_v15 = vpack.c.bf16 %v469_v14, %v468_v13  ;;  %v471_v17 = vld [vmem:[%s4879_s19 + $0x58] sm:$0xff]  ;;  %v472_v19 = vld [vmem:[%s4879_s19 + $0x60] sm:$0xff]  ;;  %v473_v20 = vld [vmem:[%s4879_s19 + $0x68] sm:$0xff] }
  0x17   : > { %4507 = vmatprep.subr.bf16.mxu0 %v4506_v5  ;;  %v4522_v18 = vpack.c.bf16 %v471_v17, %v470_v16  ;;  %v4526_v21 = vpack.c.bf16 %v473_v20, %v472_v19  ;;  %v474_v22 = vld [vmem:[%s4879_s19 + $0x70] sm:$0xff]  ;;  %v475_v23 = vld [vmem:[%s4879_s19 + $0x78] sm:$0xff]  ;;  %v397_v25 = vld [vmem:[%s4894_s22 + $0x8] sm:$0xff] }
  0x18   : > { %v4530_v24 = vpack.c.bf16 %v475_v23, %v474_v22  ;;  %v398_v26 = vld [vmem:[%s4894_s22 + $0x10] sm:$0xff]  ;;  %v399_v27 = vld [vmem:[%s4894_s22 + $0x18] sm:$0xff]  ;;  %v400_v28 = vld [vmem:[%s4894_s22 + $0x20] sm:$0xff] }
  0x19   : > { %v401_v29 = vld [vmem:[%s4894_s22 + $0x28] sm:$0xff]  ;;  %v402_v30 = vld [vmem:[%s4894_s22 + $0x30] sm:$0xff]  ;;  %v403_v31 = vld [vmem:[%s4894_s22 + $0x38] sm:$0xff] }
  0x1a   : > { %4509 = vmatpush3.bf16.msra.mxu0 %v4506_v5  ;;  %v404_v32 = vld [vmem:[%s4894_s22 + $0x40] sm:$0xff]  ;;  %v405_v33 = vld [vmem:[%s4894_s22 + $0x48] sm:$0xff]  ;;  %v406_v34 = vld [vmem:[%s4894_s22 + $0x50] sm:$0xff] }
  0x1b   : > { %4511 = vmatprep.subr.bf16.mxu0 %v4510_v8  ;;  %v407_v35 = vld [vmem:[%s4894_s22 + $0x58] sm:$0xff]  ;;  %v408_v36 = vld [vmem:[%s4894_s22 + $0x60] sm:$0xff]  ;;  %v409_v37 = vld [vmem:[%s4894_s22 + $0x68] sm:$0xff] }
  0x1c   : > { %v410_v38 = vld [vmem:[%s4894_s22 + $0x70] sm:$0xff]  ;;  %v411_v39 = vld [vmem:[%s4894_s22 + $0x78] sm:$0xff]  ;;  %v412_v40 = vld [vmem:[%s4894_s22 + $0x80] sm:$0xff] }
  0x1d   : > { %v413_v41 = vld [vmem:[%s4894_s22 + $0x88] sm:$0xff]  ;;  %v414_v42 = vld [vmem:[%s4894_s22 + $0x90] sm:$0xff]  ;;  %v415_v43 = vld [vmem:[%s4894_s22 + $0x98] sm:$0xff] }
  0x1e   : > { %4513 = vmatpush3.bf16.msra.mxu0 %v4510_v8  ;;  %v416_v44 = vld [vmem:[%s4894_s22 + $0xa0] sm:$0xff]  ;;  %v417_v45 = vld [vmem:[%s4894_s22 + $0xa8] sm:$0xff]  ;;  %v418_v46 = vld [vmem:[%s4894_s22 + $0xb0] sm:$0xff] }
  0x1f   : > { %4515 = vmatprep.subr.bf16.mxu0 %v4514_v12  ;;  %v419_v47 = vld [vmem:[%s4894_s22 + $0xb8] sm:$0xff]  ;;  %v420_v48 = vld [vmem:[%s4894_s22 + $0xc0] sm:$0xff]  ;;  %v421_v49 = vld [vmem:[%s4894_s22 + $0xc8] sm:$0xff] }
  0x20   : > { %v422_v50 = vld [vmem:[%s4894_s22 + $0xd0] sm:$0xff]  ;;  %v423_v51 = vld [vmem:[%s4894_s22 + $0xd8] sm:$0xff]  ;;  %v424_v52 = vld [vmem:[%s4894_s22 + $0xe0] sm:$0xff] }
  0x21   : > { %v425_v53 = vld [vmem:[%s4894_s22 + $0xe8] sm:$0xff]  ;;  %v426_v54 = vld [vmem:[%s4894_s22 + $0xf0] sm:$0xff]  ;;  %v427_v55 = vld [vmem:[%s4894_s22 + $0xf8] sm:$0xff] }
  0x22   : > { %4517 = vmatpush3.bf16.msra.mxu0 %v4514_v12  ;;  %v428_v56 = vld [vmem:[%s4894_s22 + $0x100] sm:$0xff]  ;;  %v429_v57 = vld [vmem:[%s4894_s22 + $0x108] sm:$0xff]  ;;  %v430_v58 = vld [vmem:[%s4894_s22 + $0x110] sm:$0xff] }
  0x23   : > { %4519 = vmatprep.subr.bf16.mxu0 %v4518_v15  ;;  %v431_v59 = vld [vmem:[%s4894_s22 + $0x118] sm:$0xff]  ;;  %v432_v60 = vld [vmem:[%s4894_s22 + $0x120] sm:$0xff]  ;;  %v433_v61 = vld [vmem:[%s4894_s22 + $0x128] sm:$0xff] }
  0x24   : > { %v434_v62 = vld [vmem:[%s4894_s22 + $0x130] sm:$0xff]  ;;  %v435_v63 = vld [vmem:[%s4894_s22 + $0x138] sm:$0xff]  ;;  %v436_v2 = vld [vmem:[%s4894_s22 + $0x140] sm:$0xff] }
  0x25   : > { %v437_v3 = vld [vmem:[%s4894_s22 + $0x148] sm:$0xff]  ;;  %v438_v4 = vld [vmem:[%s4894_s22 + $0x150] sm:$0xff]  ;;  %v439_v5 = vld [vmem:[%s4894_s22 + $0x158] sm:$0xff] }
  0x26   : > { %4521 = vmatpush3.bf16.msra.mxu0 %v4518_v15  ;;  %v440_v6 = vld [vmem:[%s4894_s22 + $0x160] sm:$0xff]  ;;  %v441_v7 = vld [vmem:[%s4894_s22 + $0x168] sm:$0xff]  ;;  %v442_v8 = vld [vmem:[%s4894_s22 + $0x170] sm:$0xff] }
  0x27   : > { %4523 = vmatprep.subr.bf16.mxu0 %v4522_v18  ;;  %v443_v9 = vld [vmem:[%s4894_s22 + $0x178] sm:$0xff]  ;;  %v943_v23 = vld [vmem:[%s6409_s4] sm:$0xff] }
  0x2a   : > { %4525 = vmatpush3.bf16.msra.mxu0 %v4522_v18 }
  0x2b   : > { %4527 = vmatprep.subr.bf16.mxu0 %v4526_v21 }
  0x2e   : > { %4529 = vmatpush3.bf16.msra.mxu0 %v4526_v21 }
  0x2f   : > { %4531 = vmatprep.subr.bf16.mxu0 %v4530_v24 }
  0x32   : > { %4533 = vmatpush3.bf16.msra.mxu0 %v4530_v24  ;;  %v944_v24 = vld [vmem:[%s6409_s4 + $0x8] sm:$0xff] }
  0x35   : > { %4021 = vmatmul.mubr.f32.vlgmr.msra.gmra.mrb[0].mxu0 %v397_v25 }
  0x36   : > { %4023 = vmatprep.mubr.f32.mxu0 %v398_v26  ;;  %v4534_v26 = vpack.c.bf16 %v944_v24, %v943_v23 }
  0x38   : > { %4535 = vmatprep.subr.bf16.mxu0 %v4534_v26 }
  0x39   : > { %4024 = vmatmul.mubr.f32.gmra.mrb[2].mxu0 %v399_v27 }
  0x3a   : > { %4026 = vmatprep.mubr.f32.mxu0 %v400_v28  ;;  %4537 = vmatpush3.bf16.msra.mxu0 %v4534_v26  ;;  %v4799_v26 = vmov 0  }
  0x3b   : > { %4723 = vset.pattern.permute.xlu1 %v4799_v26  ;;  %4722 = vset.pattern.permute.xlu0 %v4799_v26 }
  0x3d   : > { %4027 = vmatmul.mubr.f32.gmra.mrb[4].mxu0 %v401_v29 }
  0x3e   : > { %4029 = vmatprep.mubr.f32.mxu0 %v402_v30 }
  0x41   : > { %4030 = vmatmul.mubr.f32.gmra.mrb[6].mxu0 %v403_v31  ;;  %v945_v31 = vld [vmem:[%s6409_s4 + $0x10] sm:$0xff] }
  0x42   : > { %4032 = vmatprep.mubr.f32.mxu0 %v404_v32  ;;  %v946_v32 = vld [vmem:[%s6409_s4 + $0x18] sm:$0xff] }
  0x45   : > { %4033 = vmatmul.mubr.f32.gmra.mrb[8].mxu0 %v405_v33 }
  0x46   : > { %4035 = vmatprep.mubr.f32.mxu0 %v406_v34  ;;  %v4538_v34 = vpack.c.bf16 %v946_v32, %v945_v31  ;;  %v444_v31 = vld [vmem:[%s5059_s21] sm:$0xff]  ;;  %v447_v32 = vld [vmem:[%s5059_s21 + $0x18] sm:$0xff] }
  0x48   : > { %4539 = vmatprep.subr.bf16.mxu0 %v4538_v34 }
  0x49   : > { %4036 = vmatmul.mubr.f32.gmra.mrb[10].mxu0 %v407_v35 }
  0x4a   : > { %4038 = vmatprep.mubr.f32.mxu0 %v408_v36  ;;  %4541 = vmatpush3.bf16.msra.mxu0 %v4538_v34  ;;  %v947_v36 = vld [vmem:[%s6409_s4 + $0x20] sm:$0xff]  ;;  %v449_v34 = vld [vmem:[%s5059_s21 + $0x28] sm:$0xff] }
  0x4d   : > { %4039 = vmatmul.mubr.f32.gmra.mrb[12].mxu0 %v409_v37  ;;  %v948_v37 = vld [vmem:[%s6409_s4 + $0x28] sm:$0xff] }
  0x4e   : > { %4041 = vmatprep.mubr.f32.mxu0 %v410_v38 }
  0x51   : > { %4042 = vmatmul.mubr.f32.gmra.mrb[14].mxu0 %v411_v39  ;;  %v4542_v39 = vpack.c.bf16 %v948_v37, %v947_v36  ;;  %v451_v36 = vld [vmem:[%s5059_s21 + $0x38] sm:$0xff]  ;;  %v448_v37 = vld [vmem:[%s5059_s21 + $0x20] sm:$0xff] }
  0x52   : > { %4044 = vmatprep.mubr.f32.mxu0 %v412_v40 }
  0x53   : > { %4543 = vmatprep.subr.bf16.mxu0 %v4542_v39 }
  0x54   : > { %4545 = vmatpush3.bf16.msra.mxu0 %v4542_v39  ;;  %v450_v39 = vld [vmem:[%s5059_s21 + $0x30] sm:$0xff] }
  0x55   : > { %4045 = vmatmul.mubr.f32.gmra.mrb[16].mxu0 %v413_v41  ;;  %v949_v41 = vld [vmem:[%s6409_s4 + $0x30] sm:$0xff] }
  0x56   : > { %4047 = vmatprep.mubr.f32.mxu0 %v414_v42  ;;  %v950_v42 = vld [vmem:[%s6409_s4 + $0x38] sm:$0xff] }
  0x59   : > { %4048 = vmatmul.mubr.f32.gmra.mrb[18].mxu0 %v415_v43 }
  0x5a   : > { %4050 = vmatprep.mubr.f32.mxu0 %v416_v44  ;;  %v4546_v44 = vpack.c.bf16 %v950_v42, %v949_v41  ;;  %v452_v41 = vld [vmem:[%s5059_s21 + $0x40] sm:$0xff]  ;;  %v457_v42 = vld [vmem:[%s5059_s21 + $0x68] sm:$0xff] }
  0x5c   : > { %4547 = vmatprep.subr.bf16.mxu0 %v4546_v44 }
  0x5d   : > { %4051 = vmatmul.mubr.f32.gmra.mrb[20].mxu0 %v417_v45 }
  0x5e   : > { %4053 = vmatprep.mubr.f32.mxu0 %v418_v46  ;;  %4549 = vmatpush3.bf16.msra.mxu0 %v4546_v44  ;;  %v951_v46 = vld [vmem:[%s6409_s4 + $0x40] sm:$0xff]  ;;  %v459_v44 = vld [vmem:[%s5059_s21 + $0x78] sm:$0xff] }
  0x61   : > { %4054 = vmatmul.mubr.f32.gmra.mrb[22].mxu0 %v419_v47  ;;  %v952_v47 = vld [vmem:[%s6409_s4 + $0x48] sm:$0xff] }
  0x62   : > { %4056 = vmatprep.mubr.f32.mxu0 %v420_v48 }
  0x65   : > { %4057 = vmatmul.mubr.f32.gmra.mrb[24].mxu0 %v421_v49  ;;  %v4550_v49 = vpack.c.bf16 %v952_v47, %v951_v46  ;;  %v458_v46 = vld [vmem:[%s5059_s21 + $0x70] sm:$0xff]  ;;  %v4800_v47 = vmov 1  }
  0x66   : > { %4059 = vmatprep.mubr.f32.mxu0 %v422_v50 }
  0x67   : > { %4551 = vmatprep.subr.bf16.mxu0 %v4550_v49 }
  0x68   : > { %4553 = vmatpush3.bf16.msra.mxu0 %v4550_v49 }
  0x69   : > { %4060 = vmatmul.mubr.f32.gmra.mrb[26].mxu0 %v423_v51  ;;  %v953_v51 = vld [vmem:[%s6409_s4 + $0x50] sm:$0xff] }
  0x6a   : > { %4062 = vmatprep.mubr.f32.mxu0 %v424_v52  ;;  %v954_v52 = vld [vmem:[%s6409_s4 + $0x58] sm:$0xff] }
  0x6d   : > { %4063 = vmatmul.mubr.f32.gmra.mrb[28].mxu0 %v425_v53 }
  0x6e   : > { %4065 = vmatprep.mubr.f32.mxu0 %v426_v54  ;;  %v4554_v54 = vpack.c.bf16 %v954_v52, %v953_v51 }
  0x70   : > { %4555 = vmatprep.subr.bf16.mxu0 %v4554_v54 }
  0x71   : > { %4066 = vmatmul.mubr.f32.gmra.mrb[30].mxu0 %v427_v55 }
  0x72   : > { %4068 = vmatprep.mubr.f32.mxu0 %v428_v56  ;;  %4557 = vmatpush3.bf16.msra.mxu0 %v4554_v54 }
  0x75   : > { %4069 = vmatmul.mubr.f32.gmra.mrb[32].mxu0 %v429_v57 }
  0x76   : > { %4071 = vmatprep.mubr.f32.mxu0 %v430_v58 }
  0x79   : > { %4072 = vmatmul.mubr.f32.gmra.mrb[34].mxu0 %v431_v59 }
  0x7a   : > { %4074 = vmatprep.mubr.f32.mxu0 %v432_v60 }
  0x7d   : > { %4075 = vmatmul.mubr.f32.gmra.mrb[36].mxu0 %v433_v61 }
  0x7e   : > { %4077 = vmatprep.mubr.f32.mxu0 %v434_v62 }
  0x81   : > { %4078 = vmatmul.mubr.f32.gmra.mrb[38].mxu0 %v435_v63 }
  0x82   : > { %4080 = vmatprep.mubr.f32.mxu0 %v436_v2 }
  0x85   : > { %4081 = vmatmul.mubr.f32.gmra.mrb[40].mxu0 %v437_v3 }
  0x86   : > { %4083 = vmatprep.mubr.f32.mxu0 %v438_v4 }
  0x89   : > { %4084 = vmatmul.mubr.f32.gmra.mrb[42].mxu0 %v439_v5 }
  0x8a   : > { %4086 = vmatprep.mubr.f32.mxu0 %v440_v6 }
  0x8d   : > { %4087 = vmatmul.mubr.f32.gmra.mrb[44].mxu0 %v441_v7 }
  0x8e   : > { %4089 = vmatprep.mubr.f32.mxu0 %v442_v8 }
  0x91   : > { %4090 = vmatmul.mubr.f32.gmra.mrb[46].mxu0 %v443_v9 }
 0x108   : > { %v4956_v10 = vpop.f32.mrb[0].mxu0 }
 0x109   : > { %v4958_v11 = vpop.f32.mrb[1].mxu0 }
 0x10c   : > { %v4960_v12 = vpop.f32.mrb[2].mxu0 }
 0x10d   : > { %v4962_v13 = vpop.f32.mrb[3].mxu0 }
 0x110   : > { %v4964_v14 = vpop.f32.mrb[4].mxu0 }
 0x111   : > { %v4966_v15 = vpop.f32.mrb[5].mxu0 }
 0x114   : > { %v4968_v16 = vpop.f32.mrb[6].mxu0 }
 0x115   : > { %v4970_v17 = vpop.f32.mrb[7].mxu0 }
 0x118   : > { %v4972_v18 = vpop.f32.mrb[8].mxu0 }
 0x119   : > { %v4974_v19 = vpop.f32.mrb[9].mxu0 }
 0x11c   : > { %v4976_v20 = vpop.f32.mrb[10].mxu0 }
 0x11d   : > { %v4978_v21 = vpop.f32.mrb[11].mxu0 }
 0x120   : > { %v4980_v22 = vpop.f32.mrb[12].mxu0 }
 0x121   : > { %v4988_v25 = vpop.f32.mrb[13].mxu0 }
 0x124   : > { %v4990_v27 = vpop.f32.mrb[14].mxu0 }
 0x125   : > { %v4992_v28 = vpop.f32.mrb[15].mxu0 }
 0x128   : > { %v4046_v29 = vpop.f32.mrb[16].mxu0 }
 0x129   : > { %799 = vrot.lane.b32.xlu0 %v4046_v29, %s4797_s27  ;;  %v622_v30 = vpop.f32.mrb[17].mxu0 }
 0x12c   : > { %v4049_v33 = vpop.f32.mrb[18].mxu0 }
 0x12d   : > { %797 = vrot.lane.b32.xlu0 %v622_v30, %s4797_s27  ;;  %803 = vrot.lane.b32.xlu1 %v4049_v33, %s4797_s27  ;;  %v632_v35 = vpop.f32.mrb[19].mxu0  ;;  %v445_v33 = vld [vmem:[%s5059_s21 + $0x8] sm:$0xff] }
 0x130   : > { %v4052_v38 = vpop.f32.mrb[20].mxu0 }
 0x131   : > { %801 = vrot.lane.b32.xlu0 %v632_v35, %s4797_s27  ;;  %807 = vrot.lane.b32.xlu1 %v4052_v38, %s4797_s27  ;;  %v642_v40 = vpop.f32.mrb[21].mxu0  ;;  %v446_v35 = vld [vmem:[%s5059_s21 + $0x10] sm:$0xff]  ;;  %v453_v38 = vld [vmem:[%s5059_s21 + $0x48] sm:$0xff] }
 0x134   : > { %v4055_v43 = vpop.f32.mrb[22].mxu0 }
 0x135   : > { %805 = vrot.lane.b32.xlu0 %v642_v40, %s4797_s27  ;;  %811 = vrot.lane.b32.xlu1 %v4055_v43, %s4797_s27  ;;  %v652_v45 = vpop.f32.mrb[23].mxu0  ;;  %v455_v40 = vld [vmem:[%s5059_s21 + $0x58] sm:$0xff]  ;;  %v454_v43 = vld [vmem:[%s5059_s21 + $0x50] sm:$0xff] }
 0x138   : > { %v4058_v48 = vpop.f32.mrb[24].mxu0 }
 0x139   : > { %809 = vrot.lane.b32.xlu0 %v652_v45, %s4797_s27  ;;  %815 = vrot.lane.b32.xlu1 %v4058_v48, %s4797_s27  ;;  %v662_v50 = vpop.f32.mrb[25].mxu0  ;;  %v456_v45 = vld [vmem:[%s5059_s21 + $0x60] sm:$0xff] }
 0x13a   : > { %v5082_v48 = vld [vmem:[%s6410_s5] ss:$0 sm:$0xff] }
 0x13c   : > { %v4061_v53 = vpop.f32.mrb[26].mxu0 }
 0x13d   : > { %813 = vrot.lane.b32.xlu0 %v662_v50, %s4797_s27  ;;  %819 = vrot.lane.b32.xlu1 %v4061_v53, %s4797_s27  ;;  %v672_v55 = vpop.f32.mrb[27].mxu0 }
 0x140   : > { %v4064_v56 = vpop.f32.mrb[28].mxu0 }
 0x141   : > { %817 = vrot.lane.b32.xlu0 %v672_v55, %s4797_s27  ;;  %823 = vrot.lane.b32.xlu1 %v4064_v56, %s4797_s27  ;;  %v682_v57 = vpop.f32.mrb[29].mxu0 }
 0x144   : > { %v4067_v58 = vpop.f32.mrb[30].mxu0 }
 0x145   : > { %821 = vrot.lane.b32.xlu0 %v682_v57, %s4797_s27  ;;  %v692_v59 = vpop.f32.mrb[31].mxu0 }
 0x148   : > { %v4070_v60 = vpop.f32.mrb[32].mxu0 }
 0x149   : > { %825 = vrot.lane.b32.xlu0 %v692_v59, %s4797_s27  ;;  %863 = vrot.lane.b32.xlu1 %v4070_v60, %s4798_s17  ;;  %v702_v61 = vpop.f32.mrb[33].mxu0 }
 0x14c   : > { %v4073_v62 = vpop.f32.mrb[34].mxu0 }
 0x14d   : > { %861 = vrot.lane.b32.xlu1 %v702_v61, %s4798_s17  ;;  %v712_v63 = vpop.f32.mrb[35].mxu0 }
 0x14e   : > { %865 = vrot.lane.b32.xlu0 %v712_v63, %s4798_s17 }
 0x150   : > { %v4076_v2 = vpop.f32.mrb[36].mxu0 }
 0x151   : > { %827 = vrot.lane.b32.xlu1 %v4067_v58, %s4797_s27  ;;  %v722_v3 = vpop.f32.mrb[37].mxu0 }
 0x152   : > { %869 = vrot.lane.b32.xlu0 %v722_v3, %s4798_s17 }
 0x154   : > { %v4079_v4 = vpop.f32.mrb[38].mxu0 }
 0x155   : > { %867 = vrot.lane.b32.xlu1 %v4073_v62, %s4798_s17  ;;  %v732_v5 = vpop.f32.mrb[39].mxu0 }
 0x156   : > { %873 = vrot.lane.b32.xlu0 %v732_v5, %s4798_s17 }
 0x158   : > { %v4082_v6 = vpop.f32.mrb[40].mxu0 }
 0x159   : > { %871 = vrot.lane.b32.xlu1 %v4076_v2, %s4798_s17  ;;  %v742_v7 = vpop.f32.mrb[41].mxu0 }
 0x15a   : > { %877 = vrot.lane.b32.xlu0 %v742_v7, %s4798_s17 }
 0x15c   : > { %v4085_v8 = vpop.f32.mrb[42].mxu0 }
 0x15d   : > { %875 = vrot.lane.b32.xlu1 %v4079_v4, %s4798_s17  ;;  %v752_v9 = vpop.f32.mrb[43].mxu0 }
 0x15e   : > { %881 = vrot.lane.b32.xlu0 %v752_v9, %s4798_s17 }
 0x160   : > { %v4088_v23 = vpop.f32.mrb[44].mxu0 }
 0x161   : > { %879 = vrot.lane.b32.xlu1 %v4082_v6, %s4798_s17  ;;  %v762_v24 = vpop.f32.mrb[45].mxu0 }
 0x162   : > { %885 = vrot.lane.b32.xlu0 %v762_v24, %s4798_s17 }
 0x164   : > { %v4091_v29 = vpop.f32.mrb[46].mxu0 }
 0x165   : > { %883 = vrot.lane.b32.xlu1 %v4085_v8, %s4798_s17  ;;  %v772_v30 = vpop.f32.mrb[47].mxu0 }
 0x166   : > { %889 = vrot.lane.b32.xlu0 %v772_v30, %s4798_s17 }
 0x169   : > { %887 = vrot.lane.b32.xlu1 %v4088_v23, %s4798_s17 }
 0x16a   : > { %1151 = vperm.xlu0 %4722, %v444_v31  }
 0x16d   : > { %891 = vrot.lane.b32.xlu1 %v4091_v29, %s4798_s17 }
 0x16e   : > { %1166 = vperm.xlu0 %4722, %v447_v32  }
 0x171   : > { %1156 = vperm.xlu1 %4723, %v445_v33  }
 0x172   : > { %1176 = vperm.xlu0 %4722, %v449_v34  }
 0x175   : > { %1161 = vperm.xlu1 %4723, %v446_v35  }
 0x176   : > { %1186 = vperm.xlu0 %4722, %v451_v36  }
 0x179   : > { %1171 = vperm.xlu1 %4723, %v448_v37  }
 0x17a   : > { %1196 = vperm.xlu0 %4722, %v453_v38  }
 0x17d   : > { %1181 = vperm.xlu1 %4723, %v450_v39  }
 0x17e   : > { %1206 = vperm.xlu0 %4722, %v455_v40  }
 0x181   : > { %1191 = vperm.xlu1 %4723, %v452_v41  }
 0x182   : > { %1216 = vperm.xlu0 %4722, %v457_v42  }
 0x185   : > { %1201 = vperm.xlu1 %4723, %v454_v43  }
 0x186   : > { %1226 = vperm.xlu0 %4722, %v459_v44  }
 0x189   : > { %1211 = vperm.xlu1 %4723, %v456_v45  }
 0x18a   : > { %4725 = vset.pattern.permute.xlu0 %v4800_v47 }
 0x18b   : > { %1353 = vperm.xlu0 %4725, %v445_v33  }
 0x18d   : > { %1221 = vperm.xlu1 %4723, %v458_v46  }
 0x18f   : > { %1357 = vperm.xlu0 %4725, %v446_v35  }
 0x191   : > { %4724 = vset.pattern.permute.xlu1 %v4800_v47 }
 0x192   : > { %1349 = vperm.xlu1 %4724, %v444_v31  }
 0x193   : > { %1365 = vperm.xlu0 %4725, %v448_v37  }
 0x196   : > { %1361 = vperm.xlu1 %4724, %v447_v32  }
 0x197   : > { %1428 = vrot.lane.b32.xlu0 %v5082_v48, %s4801_s24 }
 0x19a   : > { %1369 = vperm.xlu1 %4724, %v449_v34  }
 0x19b   : > { %v800_v49 = vpop.permute.xlu0 %799  ;;  %1377 = vperm.xlu0 %4725, %v451_v36  }
 0x19c   : > { %v911_v5 = vsel %vm909_vm0, %v4956_v10, %v800_v49 }
 0x19e   : > { %1373 = vperm.xlu1 %4724, %v450_v39  }
 0x19f   : > { %v798_v50 = vpop.permute.xlu0 %797  ;;  %v804_v51 = vpop.permute.xlu1 %803  ;;  %1385 = vperm.xlu0 %4725, %v453_v38  }
 0x1a0   : > { %v910_v3 = vsel %vm909_vm0, %v4958_v11, %v798_v50  ;;  %v913_v10 = vsel %vm909_vm0, %v4960_v12, %v804_v51 }
 0x1a2   : > { %1381 = vperm.xlu1 %4724, %v452_v41  }
 0x1a3   : > { %v802_v52 = vpop.permute.xlu0 %801  ;;  %v808_v53 = vpop.permute.xlu1 %807  ;;  %1393 = vperm.xlu0 %4725, %v455_v40  }
 0x1a4   : > { %v912_v6 = vsel %vm909_vm0, %v4962_v13, %v802_v52  ;;  %v915_v32 = vsel %vm909_vm0, %v4964_v14, %v808_v53 }
 0x1a6   : > { %1389 = vperm.xlu1 %4724, %v454_v43  }
 0x1a7   : > { %v806_v54 = vpop.permute.xlu0 %805  ;;  %v812_v55 = vpop.permute.xlu1 %811  ;;  %1401 = vperm.xlu0 %4725, %v457_v42  }
 0x1a8   : > { %v914_v13 = vsel %vm909_vm0, %v4966_v15, %v806_v54  ;;  %v917_v36 = vsel %vm909_vm0, %v4968_v16, %v812_v55 }
 0x1aa   : > { %1397 = vperm.xlu1 %4724, %v456_v45  }
 0x1ab   : > { %v810_v56 = vpop.permute.xlu0 %809  ;;  %v816_v57 = vpop.permute.xlu1 %815  ;;  %1409 = vperm.xlu0 %4725, %v459_v44  }
 0x1ac   : > { %v916_v12 = vsel %vm909_vm0, %v4970_v17, %v810_v56  ;;  %v919_v40 = vsel %vm909_vm0, %v4972_v18, %v816_v57 }
 0x1ae   : > { %1405 = vperm.xlu1 %4724, %v458_v46  }
 0x1af   : > { %v814_v58 = vpop.permute.xlu0 %813  ;;  %v820_v59 = vpop.permute.xlu1 %819 }
 0x1b0   : > { %v918_v14 = vsel %vm909_vm0, %v4974_v19, %v814_v58  ;;  %v921_v44 = vsel %vm909_vm0, %v4976_v20, %v820_v59 }
 0x1b3   : > { %v818_v60 = vpop.permute.xlu0 %817  ;;  %v824_v61 = vpop.permute.xlu1 %823 }
 0x1b4   : > { %v920_v16 = vsel %vm909_vm0, %v4978_v21, %v818_v60  ;;  %v923_v49 = vsel %vm909_vm0, %v4980_v22, %v824_v61 }
 0x1b7   : > { %v822_v62 = vpop.permute.xlu0 %821 }
 0x1b8   : > { %v922_v18 = vsel %vm909_vm0, %v4988_v25, %v822_v62 }
 0x1bb   : > { %v826_v63 = vpop.permute.xlu0 %825  ;;  %v864_v2 = vpop.permute.xlu1 %863 }
 0x1bc   : > { %v928_v9 = vsel %vm926_vm1, %v911_v5, %v864_v2  ;;  %v924_v20 = vsel %vm909_vm0, %v4992_v28, %v826_v63 }
 0x1bf   : > { %v862_v4 = vpop.permute.xlu1 %861 }
 0x1c0   : > { %v927_v7 = vsel %vm926_vm1, %v910_v3, %v862_v4  ;;  %v866_v8 = vpop.permute.xlu0 %865 }
 0x1c1   : > { %v929_v23 = vsel %vm926_vm1, %v912_v6, %v866_v8  ;;  %4116 = vmatprep.mubr.msk.f32.mxu0 %vm955_vm2, %v927_v7 }
 0x1c2   : > { %4117 = vmatmul.mubr.msk.f32.vlgmr.msra.gmra.mrb[48].mxu0 %vm955_vm2, %v928_v9 }
 0x1c3   : > { %v828_v24 = vpop.permute.xlu1 %827  ;;  %4119 = vmatprep.mubr.msk.f32.mxu0 %vm955_vm2, %v929_v23 }
 0x1c4   : > { %v870_v11 = vpop.permute.xlu0 %869  ;;  %v925_v52 = vsel %vm909_vm0, %v4990_v27, %v828_v24 }
 0x1c5   : > { %v931_v31 = vsel %vm926_vm1, %v914_v13, %v870_v11 }
 0x1c7   : > { %v868_v26 = vpop.permute.xlu1 %867 }
 0x1c8   : > { %v930_v29 = vsel %vm926_vm1, %v913_v10, %v868_v26  ;;  %v874_v30 = vpop.permute.xlu0 %873 }
 0x1c9   : > { %4120 = vmatmul.mubr.msk.f32.gmra.mrb[50].mxu0 %vm955_vm2, %v930_v29  ;;  %v933_v15 = vsel %vm926_vm1, %v916_v12, %v874_v30 }
 0x1ca   : > { %4122 = vmatprep.mubr.msk.f32.mxu0 %vm955_vm2, %v931_v31 }
 0x1cb   : > { %v872_v33 = vpop.permute.xlu1 %871 }
 0x1cc   : > { %v932_v34 = vsel %vm926_vm1, %v915_v32, %v872_v33  ;;  %v878_v35 = vpop.permute.xlu0 %877 }
 0x1cd   : > { %4123 = vmatmul.mubr.msk.f32.gmra.mrb[52].mxu0 %vm955_vm2, %v932_v34  ;;  %v935_v17 = vsel %vm926_vm1, %v918_v14, %v878_v35 }
 0x1ce   : > { %4125 = vmatprep.mubr.msk.f32.mxu0 %vm955_vm2, %v933_v15 }
 0x1cf   : > { %v876_v37 = vpop.permute.xlu1 %875 }
 0x1d0   : > { %v934_v38 = vsel %vm926_vm1, %v917_v36, %v876_v37  ;;  %v882_v39 = vpop.permute.xlu0 %881 }
 0x1d1   : > { %4126 = vmatmul.mubr.msk.f32.gmra.mrb[54].mxu0 %vm955_vm2, %v934_v38  ;;  %v937_v19 = vsel %vm926_vm1, %v920_v16, %v882_v39 }
 0x1d2   : > { %4128 = vmatprep.mubr.msk.f32.mxu0 %vm955_vm2, %v935_v17 }
 0x1d3   : > { %v880_v41 = vpop.permute.xlu1 %879 }
 0x1d4   : > { %v936_v42 = vsel %vm926_vm1, %v919_v40, %v880_v41  ;;  %v886_v43 = vpop.permute.xlu0 %885 }
 0x1d5   : > { %4129 = vmatmul.mubr.msk.f32.gmra.mrb[56].mxu0 %vm955_vm2, %v936_v42  ;;  %v939_v21 = vsel %vm926_vm1, %v922_v18, %v886_v43 }
 0x1d6   : > { %4131 = vmatprep.mubr.msk.f32.mxu0 %vm955_vm2, %v937_v19 }
 0x1d7   : > { %v884_v45 = vpop.permute.xlu1 %883 }
 0x1d8   : > { %v938_v46 = vsel %vm926_vm1, %v921_v44, %v884_v45  ;;  %v890_v47 = vpop.permute.xlu0 %889 }
 0x1d9   : > { %4132 = vmatmul.mubr.msk.f32.gmra.mrb[58].mxu0 %vm955_vm2, %v938_v46  ;;  %v941_v25 = vsel %vm926_vm1, %v924_v20, %v890_v47 }
 0x1da   : > { %4134 = vmatprep.mubr.msk.f32.mxu0 %vm955_vm2, %v939_v21 }
 0x1db   : > { %v888_v50 = vpop.permute.xlu1 %887 }
 0x1dc   : > { %v940_v51 = vsel %vm926_vm1, %v923_v49, %v888_v50 }
 0x1dd   : > { %4135 = vmatmul.mubr.msk.f32.gmra.mrb[60].mxu0 %vm955_vm2, %v940_v51 }
 0x1de   : > { %4137 = vmatprep.mubr.msk.f32.mxu0 %vm955_vm2, %v941_v25 }
 0x1df   : > { %v892_v53 = vpop.permute.xlu1 %891 }
 0x1e0   : > { %v942_v54 = vsel %vm926_vm1, %v925_v52, %v892_v53 }
 0x1e1   : > { %4138 = vmatmul.mubr.msk.f32.gmra.mrb[62].mxu0 %vm955_vm2, %v942_v54 }
 0x1e9   : > { %v5150_v22 = vpop.permute.xlu0 %1151 }
 0x1ed   : > { %v5154_v28 = vpop.permute.xlu0 %1166 }
 0x1f0   : > { %v5152_v55 = vpop.permute.xlu1 %1156 }
 0x1f1   : > { %v5160_v58 = vpop.permute.xlu0 %1176 }
 0x1f4   : > { %v5156_v56 = vpop.permute.xlu1 %1161 }
 0x1f5   : > { %v5171_v62 = vpop.permute.xlu0 %1186 }
 0x1f8   : > { %v5166_v60 = vpop.permute.xlu1 %1171 }
 0x1f9   : > { %v5192_v9 = vpop.permute.xlu0 %1196 }
 0x1fc   : > { %v5176_v2 = vpop.permute.xlu1 %1181 }
 0x1fd   : > { %v5208_v29 = vpop.permute.xlu0 %1206 }
 0x200   : > { %v5196_v24 = vpop.permute.xlu1 %1191 }
 0x201   : > { %v5230_v36 = vpop.permute.xlu0 %1216 }
 0x204   : > { %v5214_v31 = vpop.permute.xlu1 %1201 }
 0x205   : > { %v5246_v41 = vpop.permute.xlu0 %1226 }
 0x208   : > { %v5234_v14 = vpop.permute.xlu1 %1211 }
 0x20a   : > { %v5264_v18 = vpop.permute.xlu0 %1353 }
 0x20b   : > { %6516 = vst [vmem:[#allocation3_spill] sm:$0xff] %v5264_v18 }
 0x20c   : > { %v5252_v42 = vpop.permute.xlu1 %1221 }
 0x20d   : > { %6515 = vst [vmem:[#allocation2_spill] sm:$0xff] %v5252_v42 }
 0x20e   : > { %v5268_v21 = vpop.permute.xlu0 %1357 }
 0x211   : > { %v5262_v45 = vpop.permute.xlu1 %1349 }
 0x212   : > { %v5272_v49 = vpop.permute.xlu0 %1365 }
 0x215   : > { %v5266_v46 = vpop.permute.xlu1 %1361 }
 0x216   : > { %v5276_v20 = vpop.permute.xlu0 %1428 }
 0x219   : > { %v5270_v47 = vpop.permute.xlu1 %1369 }
 0x21a   : > { %6517 = vst [vmem:[#allocation4_spill] sm:$0xff] %v5270_v47  ;;  %v5280_v25 = vpop.permute.xlu0 %1377 }
 0x21b   : > { %6520 = vst [vmem:[#allocation7_spill] sm:$0xff] %v5280_v25 }
 0x21d   : > { %v5274_v50 = vpop.permute.xlu1 %1373 }
 0x21e   : > { %6518 = vst [vmem:[#allocation5_spill] sm:$0xff] %v5274_v50  ;;  %v5284_v53 = vpop.permute.xlu0 %1385 }
 0x21f   : > { %6522 = vst [vmem:[#allocation9_spill] sm:$0xff] %v5284_v53 }
 0x221   : > { %v5278_v51 = vpop.permute.xlu1 %1381 }
 0x222   : > { %6519 = vst [vmem:[#allocation6_spill] sm:$0xff] %v5278_v51 }
 0x225   : > { %v5282_v52 = vpop.permute.xlu1 %1389 }
 0x226   : > { %6521 = vst [vmem:[#allocation8_spill] sm:$0xff] %v5282_v52 }
 0x229   : > { %v5286_v54 = vpop.permute.xlu1 %1397 }
 0x22a   : > { %6523 = vst [vmem:[#allocation10_spill] sm:$0xff] %v5286_v54 }
 0x295   : > { %v5158_v57 = vpop.f32.mrb[48].mxu0 }
 0x296   : > { %v1230_v27 = vmul.f32 %v5158_v57, %v5152_v55  ;;  %v5164_v59 = vpop.f32.mrb[49].mxu0 }
 0x297   : > { %v1229_v61 = vmul.f32 %v5150_v22, %v5164_v59 }
 0x298   : > { %1263 = vrot.lane.b32.xlu1 %v1230_v27, %s4801_s24  ;;  %v5288_v27 = vpop.permute.xlu0 %1393 }
 0x299   : > { %6524 = vst [vmem:[#allocation11_spill] sm:$0xff] %v5288_v27 }
 0x29c   : > { %1261 = vrot.lane.b32.xlu1 %v1229_v61, %s4801_s24  ;;  %v5174_v63 = vpop.f32.mrb[50].mxu0  ;;  %v5290_v61 = vpop.permute.xlu1 %1405 }
 0x29d   : > { %v1232_v3 = vmul.f32 %v5174_v63, %v5154_v28  ;;  %v5180_v4 = vpop.f32.mrb[51].mxu0  ;;  %6525 = vst [vmem:[#allocation12_spill] sm:$0xff] %v5290_v61 }
 0x29e   : > { %v1231_v5 = vmul.f32 %v5156_v56, %v5180_v4 }
 0x2a0   : > { %1267 = vrot.lane.b32.xlu1 %v1232_v3, %s4801_s24  ;;  %1265 = vrot.lane.b32.xlu0 %v1231_v5, %s4801_s24  ;;  %v5186_v6 = vpop.f32.mrb[52].mxu0  ;;  %v5292_v3 = vpop.permute.xlu0 %1401 }
 0x2a1   : > { %v1234_v7 = vmul.f32 %v5186_v6, %v5160_v58  ;;  %v5190_v8 = vpop.f32.mrb[53].mxu0  ;;  %6526 = vst [vmem:[#allocation13_spill] sm:$0xff] %v5292_v3 }
 0x2a2   : > { %v1233_v23 = vmul.f32 %v5166_v60, %v5190_v8 }
 0x2a4   : > { %1271 = vrot.lane.b32.xlu0 %v1234_v7, %s4801_s24  ;;  %1269 = vrot.lane.b32.xlu1 %v1233_v23, %s4801_s24  ;;  %v5200_v11 = vpop.f32.mrb[54].mxu0 }
 0x2a5   : > { %v1236_v10 = vmul.f32 %v5200_v11, %v5171_v62  ;;  %v5204_v26 = vpop.f32.mrb[55].mxu0 }
 0x2a6   : > { %v1235_v13 = vmul.f32 %v5176_v2, %v5204_v26 }
 0x2a8   : > { %1275 = vrot.lane.b32.xlu0 %v1236_v10, %s4801_s24  ;;  %1273 = vrot.lane.b32.xlu1 %v1235_v13, %s4801_s24  ;;  %v5212_v30 = vpop.f32.mrb[56].mxu0  ;;  %v5296_v10 = vpop.permute.xlu0 %1409 }
 0x2a9   : > { %v1238_v32 = vmul.f32 %v5212_v30, %v5192_v9  ;;  %v5218_v33 = vpop.f32.mrb[57].mxu0  ;;  %6527 = vst [vmem:[#allocation14_spill] sm:$0xff] %v5296_v10 }
 0x2aa   : > { %v1237_v12 = vmul.f32 %v5196_v24, %v5218_v33 }
 0x2ac   : > { %1279 = vrot.lane.b32.xlu0 %v1238_v32, %s4801_s24  ;;  %1277 = vrot.lane.b32.xlu1 %v1237_v12, %s4801_s24  ;;  %v5224_v34 = vpop.f32.mrb[58].mxu0 }
 0x2ad   : > { %v1240_v35 = vmul.f32 %v5224_v34, %v5208_v29  ;;  %v5228_v15 = vpop.f32.mrb[59].mxu0 }
 0x2ae   : > { %v1239_v37 = vmul.f32 %v5214_v31, %v5228_v15 }
 0x2b0   : > { %1283 = vrot.lane.b32.xlu0 %v1240_v35, %s4801_s24  ;;  %1281 = vrot.lane.b32.xlu1 %v1239_v37, %s4801_s24  ;;  %v5238_v38 = vpop.f32.mrb[60].mxu0 }
 0x2b1   : > { %v1242_v39 = vmul.f32 %v5238_v38, %v5230_v36  ;;  %v5242_v17 = vpop.f32.mrb[61].mxu0 }
 0x2b2   : > { %v1241_v40 = vmul.f32 %v5234_v14, %v5242_v17 }
 0x2b4   : > { %1287 = vrot.lane.b32.xlu0 %v1242_v39, %s4801_s24  ;;  %1285 = vrot.lane.b32.xlu1 %v1241_v40, %s4801_s24  ;;  %v5250_v16 = vpop.f32.mrb[62].mxu0 }
 0x2b5   : > { %v1244_v43 = vmul.f32 %v5250_v16, %v5246_v41  ;;  %v5256_v19 = vpop.f32.mrb[63].mxu0 }
 0x2b6   : > { %v1243_v44 = vmul.f32 %v5252_v42, %v5256_v19 }
 0x2b8   : > { %1291 = vrot.lane.b32.xlu0 %v1244_v43, %s4801_s24  ;;  %1289 = vrot.lane.b32.xlu1 %v1243_v44, %s4801_s24 }
 0x30a   : > { %v1264_v5 = vpop.permute.xlu1 %1263 }
 0x30b   : > { %v1310_v7 = vadd.f32 %v5158_v57, %v1264_v5 }
 0x30d   : > { %v1333_v23 = vadd.f32 %v5082_v48, %v1310_v7 }
 0x30e   : > { %v1262_v13 = vpop.permute.xlu1 %1261 }
 0x30f   : > { %v1413_v32 = vmul.f32 %v5264_v18, %v1333_v23  ;;  %v1309_v12 = vadd.f32 %v1262_v13, %v5164_v59 }
 0x311   : > { %v1332_v35 = vadd.f32 %v5082_v48, %v1309_v12  ;;  %v1432_v40 = vadd.f32 %v5276_v20, %v1413_v32 }
 0x312   : > { %v1268_v37 = vpop.permute.xlu1 %1267  ;;  %v1266_v39 = vpop.permute.xlu0 %1265 }
 0x313   : > { %v1412_v43 = vmul.f32 %v5262_v45, %v1332_v35  ;;  %v1312_v44 = vadd.f32 %v5174_v63, %v1268_v37  ;;  %v1311_v57 = vadd.f32 %v1266_v39, %v5180_v4  ;;  %v1448_v13 = vmax.f32 %v1432_v40, 0.0 }
 0x315   : > { %v1335_v5 = vadd.f32 %v5082_v48, %v1312_v44  ;;  %v1334_v7 = vadd.f32 %v5082_v48, %v1311_v57  ;;  %v1431_v23 = vadd.f32 %v5276_v20, %v1412_v43 }
 0x316   : > { %v1272_v18 = vpop.permute.xlu0 %1271  ;;  %v1270_v59 = vpop.permute.xlu1 %1269 }
 0x317   : > { %v1415_v12 = vmul.f32 %v5266_v46, %v1335_v5  ;;  %v1414_v42 = vmul.f32 %v5268_v21, %v1334_v7  ;;  %v1314_v32 = vadd.f32 %v5186_v6, %v1272_v18  ;;  %v1313_v35 = vadd.f32 %v1270_v59, %v5190_v8 }
 0x318   : > { %v1447_v63 = vmax.f32 %v1431_v23, 0.0  ;;  %v5320_v5 = vadd.f32 %v1448_v13, %v4885_v1 }
 0x319   : > { %v1434_v4 = vadd.f32 %v5276_v20, %v1415_v12  ;;  %v1433_v37 = vadd.f32 %v5276_v20, %v1414_v42  ;;  %v1337_v39 = vadd.f32 %v5082_v48, %v1314_v32  ;;  %v1336_v43 = vadd.f32 %v5082_v48, %v1313_v35 }
 0x31a   : > { %v1276_v44 = vpop.permute.xlu0 %1275  ;;  %v1274_v57 = vpop.permute.xlu1 %1273  ;;  %v5317_v40 = vadd.f32 %v1447_v63, %v4882_v0  ;;  %v4727_v63 = vld [vmem:[%s4879_s19 + $0x10] sm:$0xff] }
 0x31b   : > { %v1417_v6 = vmul.f32 %v5270_v47, %v1337_v39  ;;  %v1416_v8 = vmul.f32 %v5272_v49, %v1336_v43  ;;  %v1316_v42 = vadd.f32 %v5200_v11, %v1276_v44  ;;  %v1315_v18 = vadd.f32 %v1274_v57, %v5204_v26  ;;  %v4728_v26 = vld [vmem:[%s4879_s19 + $0x18] sm:$0xff] }
 0x31c   : > { %v4558_v7 = vpack.c.bf16 %v5320_v5, %v5317_v40  ;;  %v1449_v23 = vmax.f32 %v1433_v37, 0.0  ;;  %v1450_v59 = vmax.f32 %v1434_v4, 0.0 }
 0x31d   : > { %v1436_v0 = vadd.f32 %v5276_v20, %v1417_v6  ;;  %v1435_v12 = vadd.f32 %v5276_v20, %v1416_v8  ;;  %v1339_v1 = vadd.f32 %v5082_v48, %v1316_v42  ;;  %v1338_v13 = vadd.f32 %v5082_v48, %v1315_v18 }
 0x31e   : > { %4559 = vmatprep.subr.bf16.mxu1 %v4558_v7  ;;  %v1280_v32 = vpop.permute.xlu0 %1279  ;;  %v1278_v35 = vpop.permute.xlu1 %1277  ;;  %v5333_v11 = vadd.f32 %v4727_v63, %v1449_v23  ;;  %v5336_v39 = vadd.f32 %v4728_v26, %v1450_v59 }
 0x31f   : > { %v1419_v4 = vmul.f32 %v5280_v25, %v1339_v1  ;;  %v1418_v37 = vmul.f32 %v5274_v50, %v1338_v13  ;;  %4561 = vmatpush3.bf16.msra.mxu1 %v4558_v7  ;;  %v1318_v43 = vadd.f32 %v5212_v30, %v1280_v32  ;;  %v1317_v44 = vadd.f32 %v1278_v35, %v5218_v33  ;;  %v4729_v13 = vld [vmem:[%s4879_s19 + $0x20] sm:$0xff]  ;;  %v4730_v33 = vld [vmem:[%s4879_s19 + $0x28] sm:$0xff] }
 0x320   : > { %6528 = vst [vmem:[#allocation15_spill] sm:$0xff] %v5333_v11  ;;  %v4562_v57 = vpack.c.bf16 %v5336_v39, %v5333_v11  ;;  %v1451_v6 = vmax.f32 %v1435_v12, 0.0  ;;  %v1452_v8 = vmax.f32 %v1436_v0, 0.0 }
 0x321   : > { %v1438_v42 = vadd.f32 %v5276_v20, %v1419_v4  ;;  %v1437_v18 = vadd.f32 %v5276_v20, %v1418_v37  ;;  %v1341_v23 = vadd.f32 %v5082_v48, %v1318_v43  ;;  %v1340_v59 = vadd.f32 %v5082_v48, %v1317_v44 }
 0x322   : > { %4563 = vmatprep.subr.bf16.mxu1 %v4562_v57  ;;  %v1284_v1 = vpop.permute.xlu0 %1283  ;;  %v1282_v7 = vpop.permute.xlu1 %1281  ;;  %v5349_v30 = vadd.f32 %v4729_v13, %v1451_v6  ;;  %v5352_v32 = vadd.f32 %v4730_v33, %v1452_v8 }
 0x323   : > { %v1421_v0 = vmul.f32 %v5284_v53, %v1341_v23  ;;  %v1420_v12 = vmul.f32 %v5278_v51, %v1340_v59  ;;  %4565 = vmatpush3.bf16.msra.mxu1 %v4562_v57  ;;  %v1320_v35 = vadd.f32 %v5224_v34, %v1284_v1  ;;  %v1319_v63 = vadd.f32 %v1282_v7, %v5228_v15  ;;  %v4731_v59 = vld [vmem:[%s4879_s19 + $0x30] sm:$0xff]  ;;  %v4732_v15 = vld [vmem:[%s4879_s19 + $0x38] sm:$0xff] }
 0x324   : > { %6529 = vst [vmem:[#allocation16_spill] sm:$0xff] %v5349_v30  ;;  %6530 = vst [vmem:[#allocation17_spill] sm:$0xff] %v5352_v32  ;;  %v4566_v26 = vpack.c.bf16 %v5352_v32, %v5349_v30  ;;  %v1453_v4 = vmax.f32 %v1437_v18, 0.0  ;;  %v1454_v37 = vmax.f32 %v1438_v42, 0.0 }
 0x325   : > { %v1440_v43 = vadd.f32 %v5276_v20, %v1421_v0  ;;  %v1439_v44 = vadd.f32 %v5276_v20, %v1420_v12  ;;  %v1343_v6 = vadd.f32 %v5082_v48, %v1320_v35  ;;  %v1342_v8 = vadd.f32 %v5082_v48, %v1319_v63 }
 0x326   : > { %4567 = vmatprep.subr.bf16.mxu1 %v4566_v26  ;;  %v1288_v23 = vpop.permute.xlu0 %1287  ;;  %v1286_v57 = vpop.permute.xlu1 %1285  ;;  %v5365_v34 = vadd.f32 %v4731_v59, %v1453_v4  ;;  %v5368_v1 = vadd.f32 %v4732_v15, %v1454_v37 }
 0x327   : > { %v1423_v42 = vmul.f32 %v5288_v27, %v1343_v6  ;;  %v1422_v18 = vmul.f32 %v5282_v52, %v1342_v8  ;;  %4569 = vmatpush3.bf16.msra.mxu1 %v4566_v26  ;;  %v1322_v7 = vadd.f32 %v5238_v38, %v1288_v23  ;;  %v1321_v13 = vadd.f32 %v1286_v57, %v5242_v17  ;;  %v4733_v8 = vld [vmem:[%s4879_s19 + $0x40] sm:$0xff]  ;;  %v4734_v17 = vld [vmem:[%s4879_s19 + $0x48] sm:$0xff] }
 0x328   : > { %6531 = vst [vmem:[#allocation18_spill] sm:$0xff] %v5365_v34  ;;  %6532 = vst [vmem:[#allocation19_spill] sm:$0xff] %v5368_v1  ;;  %v4570_v33 = vpack.c.bf16 %v5368_v1, %v5365_v34  ;;  %v1455_v0 = vmax.f32 %v1439_v44, 0.0  ;;  %v1456_v12 = vmax.f32 %v1440_v43, 0.0 }
 0x329   : > { %v1442_v35 = vadd.f32 %v5276_v20, %v1423_v42  ;;  %v1441_v63 = vadd.f32 %v5276_v20, %v1422_v18  ;;  %v1345_v4 = vadd.f32 %v5082_v48, %v1322_v7  ;;  %v1344_v37 = vadd.f32 %v5082_v48, %v1321_v13 }
 0x32a   : > { %4571 = vmatprep.subr.bf16.mxu1 %v4570_v33  ;;  %v1292_v6 = vpop.permute.xlu0 %1291  ;;  %v1290_v26 = vpop.permute.xlu1 %1289  ;;  %v5381_v38 = vadd.f32 %v4733_v8, %v1455_v0  ;;  %v5384_v23 = vadd.f32 %v4734_v17, %v1456_v12  ;;  %v4737_v17 = vld [vmem:[%s4879_s19 + $0x60] sm:$0xff] }
 0x32b   : > { %v1425_v43 = vmul.f32 %v5292_v3, %v1345_v4  ;;  %v1424_v44 = vmul.f32 %v5286_v54, %v1344_v37  ;;  %4573 = vmatpush3.bf16.msra.mxu1 %v4570_v33  ;;  %v1324_v57 = vadd.f32 %v5250_v16, %v1292_v6  ;;  %v1323_v59 = vadd.f32 %v1290_v26, %v5256_v19  ;;  %v4735_v33 = vld [vmem:[%s4879_s19 + $0x50] sm:$0xff]  ;;  %v4736_v19 = vld [vmem:[%s4879_s19 + $0x58] sm:$0xff] }
 0x32c   : > { %6533 = vst [vmem:[#allocation20_spill] sm:$0xff] %v5381_v38  ;;  %6534 = vst [vmem:[#allocation21_spill] sm:$0xff] %v5384_v23  ;;  %v4574_v15 = vpack.c.bf16 %v5384_v23, %v5381_v38  ;;  %v1457_v42 = vmax.f32 %v1441_v63, 0.0  ;;  %v1458_v18 = vmax.f32 %v1442_v35, 0.0 }
 0x32d   : > { %v1444_v7 = vadd.f32 %v5276_v20, %v1425_v43  ;;  %v1443_v13 = vadd.f32 %v5276_v20, %v1424_v44  ;;  %v1347_v0 = vadd.f32 %v5082_v48, %v1324_v57  ;;  %v1346_v12 = vadd.f32 %v5082_v48, %v1323_v59  ;;  %v4738_v44 = vld [vmem:[%s4879_s19 + $0x68] sm:$0xff] }
 0x32e   : > { %4575 = vmatprep.subr.bf16.mxu1 %v4574_v15  ;;  %v5397_v16 = vadd.f32 %v4735_v33, %v1457_v42  ;;  %v5400_v4 = vadd.f32 %v4736_v19, %v1458_v18  ;;  %v4739_v18 = vld [vmem:[%s4879_s19 + $0x70] sm:$0xff]  ;;  %v5433_v19 = vld [vmem:[%s4894_s22 + $0x18] sm:$0xff] }
 0x32f   : > { %v1427_v63 = vmul.f32 %v5296_v10, %v1347_v0  ;;  %v1426_v35 = vmul.f32 %v5290_v61, %v1346_v12  ;;  %4577 = vmatpush3.bf16.msra.mxu1 %v4574_v15  ;;  %v1459_v37 = vmax.f32 %v1443_v13, 0.0  ;;  %v1460_v6 = vmax.f32 %v1444_v7, 0.0  ;;  %v4740_v7 = vld [vmem:[%s4879_s19 + $0x78] sm:$0xff]  ;;  %v5425_v12 = vld [vmem:[%s4894_s22 + $0x8] sm:$0xff]  ;;  %v5429_v33 = vld [vmem:[%s4894_s22 + $0x10] sm:$0xff]  ;;  %6543 = vst [vmem:[#allocation30_spill] sm:$0xff] %v5433_v19 }
 0x330   : > { %6535 = vst [vmem:[#allocation22_spill] sm:$0xff] %v5397_v16  ;;  %6536 = vst [vmem:[#allocation23_spill] sm:$0xff] %v5400_v4  ;;  %v4578_v48 = vpack.c.bf16 %v5400_v4, %v5397_v16 }
 0x331   : > { %v1446_v26 = vadd.f32 %v5276_v20, %v1427_v63  ;;  %v1445_v8 = vadd.f32 %v5276_v20, %v1426_v35  ;;  %v5409_v43 = vadd.f32 %v4737_v17, %v1459_v37  ;;  %v5412_v57 = vadd.f32 %v4738_v44, %v1460_v6  ;;  %6541 = vst [vmem:[#allocation28_spill] sm:$0xff] %v5425_v12  ;;  %v5437_v63 = vld [vmem:[%s4894_s22 + $0x20] sm:$0xff]  ;;  %v5441_v35 = vld [vmem:[%s4894_s22 + $0x28] sm:$0xff]  ;;  %v5445_v37 = vld [vmem:[%s4894_s22 + $0x30] sm:$0xff] }
 0x332   : > { %4579 = vmatprep.subr.bf16.mxu1 %v4578_v48  ;;  %6542 = vst [vmem:[#allocation29_spill] sm:$0xff] %v5429_v33  ;;  %6544 = vst [vmem:[#allocation31_spill] sm:$0xff] %v5437_v63  ;;  %v5449_v6 = vld [vmem:[%s4894_s22 + $0x38] sm:$0xff]  ;;  %v5469_v44 = vld [vmem:[%s4894_s22 + $0x60] sm:$0xff] }
 0x333   : > { %6537 = vst [vmem:[#allocation24_spill] sm:$0xff] %v5409_v43  ;;  %6538 = vst [vmem:[#allocation25_spill] sm:$0xff] %v5412_v57  ;;  %4581 = vmatpush3.bf16.msra.mxu1 %v4578_v48  ;;  %v4582_v59 = vpack.c.bf16 %v5412_v57, %v5409_v43  ;;  %v1461_v15 = vmax.f32 %v1445_v8, 0.0  ;;  %v1462_v42 = vmax.f32 %v1446_v26, 0.0  ;;  %v5453_v48 = vld [vmem:[%s4894_s22 + $0x40] sm:$0xff]  ;;  %v5457_v26 = vld [vmem:[%s4894_s22 + $0x48] sm:$0xff] }
 0x334   : > { %6545 = vst [vmem:[#allocation32_spill] sm:$0xff] %v5441_v35  ;;  %6546 = vst [vmem:[#allocation33_spill] sm:$0xff] %v5445_v37  ;;  %v5461_v8 = vld [vmem:[%s4894_s22 + $0x50] sm:$0xff]  ;;  %v5465_v17 = vld [vmem:[%s4894_s22 + $0x58] sm:$0xff] }
 0x335   : > { %4583 = vmatprep.subr.bf16.mxu1 %v4582_v59  ;;  %v5417_v20 = vadd.f32 %v4739_v18, %v1461_v15  ;;  %v5420_v13 = vadd.f32 %v4740_v7, %v1462_v42  ;;  %6547 = vst [vmem:[#allocation34_spill] sm:$0xff] %v5449_v6  ;;  %6548 = vst [vmem:[#allocation35_spill] sm:$0xff] %v5453_v48  ;;  %v5477_v15 = vld [vmem:[%s4894_s22 + $0x70] sm:$0xff]  ;;  %v5481_v42 = vld [vmem:[%s4894_s22 + $0x78] sm:$0xff] }
 0x336   : > { %6549 = vst [vmem:[#allocation36_spill] sm:$0xff] %v5457_v26  ;;  %6550 = vst [vmem:[#allocation37_spill] sm:$0xff] %v5461_v8  ;;  %v5485_v18 = vld [vmem:[%s4894_s22 + $0x80] sm:$0xff]  ;;  %v5489_v7 = vld [vmem:[%s4894_s22 + $0x88] sm:$0xff] }
 0x337   : > { %6539 = vst [vmem:[#allocation26_spill] sm:$0xff] %v5417_v20  ;;  %6540 = vst [vmem:[#allocation27_spill] sm:$0xff] %v5420_v13  ;;  %4585 = vmatpush3.bf16.msra.mxu1 %v4582_v59  ;;  %v4586_v0 = vpack.c.bf16 %v5420_v13, %v5417_v20  ;;  %v5473_v59 = vld [vmem:[%s4894_s22 + $0x68] sm:$0xff]  ;;  %v3619_v57 = vld [vmem:[%s6409_s4 + $0x70] sm:$0xff] }
 0x338   : > { %6551 = vst [vmem:[#allocation38_spill] sm:$0xff] %v5465_v17  ;;  %6552 = vst [vmem:[#allocation39_spill] sm:$0xff] %v5469_v44  ;;  %v3620_v43 = vld [vmem:[%s6409_s4 + $0x78] sm:$0xff] }
 0x339   : > { %4587 = vmatprep.subr.bf16.mxu1 %v4586_v0  ;;  %6553 = vst [vmem:[#allocation40_spill] sm:$0xff] %v5473_v59  ;;  %6554 = vst [vmem:[#allocation41_spill] sm:$0xff] %v5477_v15  ;;  %v4594_v61 = vpack.c.bf16 %v3620_v43, %v3619_v57 }
 0x33a   : > { %6555 = vst [vmem:[#allocation42_spill] sm:$0xff] %v5481_v42  ;;  %6556 = vst [vmem:[#allocation43_spill] sm:$0xff] %v5485_v18 }
 0x33b   : > { %4589 = vmatpush3.bf16.msra.mxu1 %v4586_v0  ;;  %6557 = vst [vmem:[#allocation44_spill] sm:$0xff] %v5489_v7  ;;  %v5493_v0 = vld [vmem:[%s4894_s22 + $0x90] sm:$0xff] }
 0x33c   : > { %6558 = vst [vmem:[#allocation45_spill] sm:$0xff] %v5493_v0 }
 0x33e   : > { %4173 = vmatmul.mubr.f32.vlgmr.msra.gmra.mrb[0].mxu1 %v5425_v12 }
 0x33f   : > { %4175 = vmatprep.mubr.f32.mxu1 %v5429_v33  ;;  %v3618_v33 = vld [vmem:[%s6409_s4 + $0x68] sm:$0xff] }
 0x342   : > { %4176 = vmatmul.mubr.f32.gmra.mrb[2].mxu1 %v5433_v19  ;;  %v3617_v19 = vld [vmem:[%s6409_s4 + $0x60] sm:$0xff] }
 0x343   : > { %4178 = vmatprep.mubr.f32.mxu1 %v5437_v63  ;;  %v4590_v13 = vpack.c.bf16 %v3618_v33, %v3617_v19  ;;  %v3622_v33 = vld [vmem:[%s6409_s4 + $0x88] sm:$0xff] }
 0x345   : > { %4591 = vmatprep.subr.bf16.mxu0 %v4590_v13 }
 0x346   : > { %4179 = vmatmul.mubr.f32.gmra.mrb[4].mxu1 %v5441_v35  ;;  %4593 = vmatpush3.bf16.msra.mxu0 %v4590_v13  ;;  %v3621_v13 = vld [vmem:[%s6409_s4 + $0x80] sm:$0xff] }
 0x347   : > { %4181 = vmatprep.mubr.f32.mxu1 %v5445_v37  ;;  %4595 = vmatprep.subr.bf16.mxu0 %v4594_v61  ;;  %v4598_v16 = vpack.c.bf16 %v3622_v33, %v3621_v13  ;;  %v3626_v13 = vld [vmem:[%s6409_s4 + $0xa8] sm:$0xff] }
 0x34a   : > { %4182 = vmatmul.mubr.f32.gmra.mrb[6].mxu1 %v5449_v6  ;;  %4597 = vmatpush3.bf16.msra.mxu0 %v4594_v61  ;;  %v3623_v61 = vld [vmem:[%s6409_s4 + $0x90] sm:$0xff] }
 0x34b   : > { %4184 = vmatprep.mubr.f32.mxu1 %v5453_v48  ;;  %4599 = vmatprep.subr.bf16.mxu0 %v4598_v16 }
 0x34e   : > { %4185 = vmatmul.mubr.f32.gmra.mrb[8].mxu1 %v5457_v26  ;;  %4601 = vmatpush3.bf16.msra.mxu0 %v4598_v16  ;;  %v3625_v16 = vld [vmem:[%s6409_s4 + $0xa0] sm:$0xff] }
 0x34f   : > { %4187 = vmatprep.mubr.f32.mxu1 %v5461_v8 }
 0x352   : > { %4188 = vmatmul.mubr.f32.gmra.mrb[10].mxu1 %v5465_v17 }
 0x353   : > { %4190 = vmatprep.mubr.f32.mxu1 %v5469_v44 }
 0x356   : > { %4191 = vmatmul.mubr.f32.gmra.mrb[12].mxu1 %v5473_v59  ;;  %v5593_v59 = vld [vmem:[%s4894_s22 + $0x158] sm:$0xff] }
 0x357   : > { %4193 = vmatprep.mubr.f32.mxu1 %v5477_v15  ;;  %v5497_v15 = vld [vmem:[%s4894_s22 + $0x98] sm:$0xff]  ;;  %6583 = vst [vmem:[#allocation70_spill] sm:$0xff] %v5593_v59 }
 0x358   : > { %6559 = vst [vmem:[#allocation46_spill] sm:$0xff] %v5497_v15 }
 0x35a   : > { %4194 = vmatmul.mubr.f32.gmra.mrb[14].mxu1 %v5481_v42  ;;  %v5501_v42 = vld [vmem:[%s4894_s22 + $0xa0] sm:$0xff] }
 0x35b   : > { %4196 = vmatprep.mubr.f32.mxu1 %v5485_v18  ;;  %6560 = vst [vmem:[#allocation47_spill] sm:$0xff] %v5501_v42  ;;  %v5505_v18 = vld [vmem:[%s4894_s22 + $0xa8] sm:$0xff] }
 0x35c   : > { %6561 = vst [vmem:[#allocation48_spill] sm:$0xff] %v5505_v18 }
 0x35e   : > { %4197 = vmatmul.mubr.f32.gmra.mrb[16].mxu1 %v5489_v7  ;;  %v5509_v7 = vld [vmem:[%s4894_s22 + $0xb0] sm:$0xff] }
 0x35f   : > { %4199 = vmatprep.mubr.f32.mxu1 %v5493_v0  ;;  %6562 = vst [vmem:[#allocation49_spill] sm:$0xff] %v5509_v7  ;;  %v5513_v0 = vld [vmem:[%s4894_s22 + $0xb8] sm:$0xff] }
 0x360   : > { %6563 = vst [vmem:[#allocation50_spill] sm:$0xff] %v5513_v0 }
 0x362   : > { %4200 = vmatmul.mubr.f32.gmra.mrb[18].mxu1 %v5497_v15  ;;  %v5517_v15 = vld [vmem:[%s4894_s22 + $0xc0] sm:$0xff] }
 0x363   : > { %4202 = vmatprep.mubr.f32.mxu1 %v5501_v42  ;;  %6564 = vst [vmem:[#allocation51_spill] sm:$0xff] %v5517_v15  ;;  %v5521_v42 = vld [vmem:[%s4894_s22 + $0xc8] sm:$0xff] }
 0x364   : > { %6565 = vst [vmem:[#allocation52_spill] sm:$0xff] %v5521_v42 }
 0x366   : > { %4203 = vmatmul.mubr.f32.gmra.mrb[20].mxu1 %v5505_v18  ;;  %v5525_v18 = vld [vmem:[%s4894_s22 + $0xd0] sm:$0xff] }
 0x367   : > { %4205 = vmatprep.mubr.f32.mxu1 %v5509_v7  ;;  %6566 = vst [vmem:[#allocation53_spill] sm:$0xff] %v5525_v18  ;;  %v5529_v7 = vld [vmem:[%s4894_s22 + $0xd8] sm:$0xff] }
 0x368   : > { %6567 = vst [vmem:[#allocation54_spill] sm:$0xff] %v5529_v7 }
 0x36a   : > { %4206 = vmatmul.mubr.f32.gmra.mrb[22].mxu1 %v5513_v0  ;;  %v5533_v0 = vld [vmem:[%s4894_s22 + $0xe0] sm:$0xff] }
 0x36b   : > { %4208 = vmatprep.mubr.f32.mxu1 %v5517_v15  ;;  %6568 = vst [vmem:[#allocation55_spill] sm:$0xff] %v5533_v0  ;;  %v5537_v15 = vld [vmem:[%s4894_s22 + $0xe8] sm:$0xff] }
 0x36c   : > { %6569 = vst [vmem:[#allocation56_spill] sm:$0xff] %v5537_v15 }
 0x36e   : > { %4209 = vmatmul.mubr.f32.gmra.mrb[24].mxu1 %v5521_v42  ;;  %v5541_v42 = vld [vmem:[%s4894_s22 + $0xf0] sm:$0xff] }
 0x36f   : > { %4211 = vmatprep.mubr.f32.mxu1 %v5525_v18  ;;  %6570 = vst [vmem:[#allocation57_spill] sm:$0xff] %v5541_v42  ;;  %v5545_v18 = vld [vmem:[%s4894_s22 + $0xf8] sm:$0xff] }
 0x370   : > { %6571 = vst [vmem:[#allocation58_spill] sm:$0xff] %v5545_v18 }
 0x372   : > { %4212 = vmatmul.mubr.f32.gmra.mrb[26].mxu1 %v5529_v7  ;;  %v5549_v7 = vld [vmem:[%s4894_s22 + $0x100] sm:$0xff] }
 0x373   : > { %4214 = vmatprep.mubr.f32.mxu1 %v5533_v0  ;;  %6572 = vst [vmem:[#allocation59_spill] sm:$0xff] %v5549_v7  ;;  %v5553_v0 = vld [vmem:[%s4894_s22 + $0x108] sm:$0xff] }
 0x374   : > { %6573 = vst [vmem:[#allocation60_spill] sm:$0xff] %v5553_v0 }
 0x376   : > { %4215 = vmatmul.mubr.f32.gmra.mrb[28].mxu1 %v5537_v15  ;;  %v5557_v15 = vld [vmem:[%s4894_s22 + $0x110] sm:$0xff] }
 0x377   : > { %4217 = vmatprep.mubr.f32.mxu1 %v5541_v42  ;;  %6574 = vst [vmem:[#allocation61_spill] sm:$0xff] %v5557_v15  ;;  %v5561_v42 = vld [vmem:[%s4894_s22 + $0x118] sm:$0xff] }
 0x378   : > { %6575 = vst [vmem:[#allocation62_spill] sm:$0xff] %v5561_v42 }
 0x37a   : > { %4218 = vmatmul.mubr.f32.gmra.mrb[30].mxu1 %v5545_v18  ;;  %v5565_v18 = vld [vmem:[%s4894_s22 + $0x120] sm:$0xff] }
 0x37b   : > { %4220 = vmatprep.mubr.f32.mxu1 %v5549_v7  ;;  %6576 = vst [vmem:[#allocation63_spill] sm:$0xff] %v5565_v18  ;;  %v5569_v7 = vld [vmem:[%s4894_s22 + $0x128] sm:$0xff] }
 0x37c   : > { %6577 = vst [vmem:[#allocation64_spill] sm:$0xff] %v5569_v7 }
 0x37e   : > { %4221 = vmatmul.mubr.f32.gmra.mrb[32].mxu1 %v5553_v0  ;;  %v5573_v0 = vld [vmem:[%s4894_s22 + $0x130] sm:$0xff] }
 0x37f   : > { %4223 = vmatprep.mubr.f32.mxu1 %v5557_v15  ;;  %6578 = vst [vmem:[#allocation65_spill] sm:$0xff] %v5573_v0  ;;  %v5577_v15 = vld [vmem:[%s4894_s22 + $0x138] sm:$0xff] }
 0x380   : > { %6579 = vst [vmem:[#allocation66_spill] sm:$0xff] %v5577_v15 }
 0x382   : > { %4224 = vmatmul.mubr.f32.gmra.mrb[34].mxu1 %v5561_v42  ;;  %v5581_v42 = vld [vmem:[%s4894_s22 + $0x140] sm:$0xff] }
 0x383   : > { %4226 = vmatprep.mubr.f32.mxu1 %v5565_v18  ;;  %6580 = vst [vmem:[#allocation67_spill] sm:$0xff] %v5581_v42  ;;  %v5585_v18 = vld [vmem:[%s4894_s22 + $0x148] sm:$0xff] }
 0x384   : > { %6581 = vst [vmem:[#allocation68_spill] sm:$0xff] %v5585_v18 }
 0x386   : > { %4227 = vmatmul.mubr.f32.gmra.mrb[36].mxu1 %v5569_v7  ;;  %v5589_v7 = vld [vmem:[%s4894_s22 + $0x150] sm:$0xff] }
 0x387   : > { %4229 = vmatprep.mubr.f32.mxu1 %v5573_v0  ;;  %6582 = vst [vmem:[#allocation69_spill] sm:$0xff] %v5589_v7  ;;  %v5597_v0 = vld [vmem:[%s4894_s22 + $0x160] sm:$0xff] }
 0x388   : > { %6584 = vst [vmem:[#allocation71_spill] sm:$0xff] %v5597_v0 }
 0x38a   : > { %4230 = vmatmul.mubr.f32.gmra.mrb[38].mxu1 %v5577_v15  ;;  %v5601_v15 = vld [vmem:[%s4894_s22 + $0x168] sm:$0xff] }
 0x38b   : > { %4232 = vmatprep.mubr.f32.mxu1 %v5581_v42  ;;  %6585 = vst [vmem:[#allocation72_spill] sm:$0xff] %v5601_v15  ;;  %v5605_v42 = vld [vmem:[%s4894_s22 + $0x170] sm:$0xff] }
 0x38c   : > { %6586 = vst [vmem:[#allocation73_spill] sm:$0xff] %v5605_v42 }
 0x38e   : > { %4233 = vmatmul.mubr.f32.gmra.mrb[40].mxu1 %v5585_v18  ;;  %v5609_v18 = vld [vmem:[%s4894_s22 + $0x178] sm:$0xff] }
 0x38f   : > { %4235 = vmatprep.mubr.f32.mxu1 %v5589_v7  ;;  %6587 = vst [vmem:[#allocation74_spill] sm:$0xff] %v5609_v18  ;;  %v4788_v7 = vld [vmem:[%s4894_s22] sm:$0xff] }
 0x392   : > { %4236 = vmatmul.mubr.f32.gmra.mrb[42].mxu1 %v5593_v59 }
 0x393   : > { %4238 = vmatprep.mubr.f32.mxu1 %v5597_v0 }
 0x396   : > { %4239 = vmatmul.mubr.f32.gmra.mrb[44].mxu1 %v5601_v15 }
 0x397   : > { %4241 = vmatprep.mubr.f32.mxu1 %v5605_v42 }
 0x39a   : > { %4242 = vmatmul.mubr.f32.gmra.mrb[46].mxu1 %v5609_v18 }
 0x39b   : > { %4324 = vmatprep.mubr.f32.mxu1 %v4788_v7 }
 0x411   : > { %v5613_v44 = vpop.f32.mrb[0].mxu1 }
 0x412   : > { %v5615_v59 = vpop.f32.mrb[1].mxu1 }
 0x415   : > { %v5617_v17 = vpop.f32.mrb[2].mxu1 }
 0x416   : > { %v5619_v0 = vpop.f32.mrb[3].mxu1 }
 0x419   : > { %v5621_v8 = vpop.f32.mrb[4].mxu1 }
 0x41a   : > { %v5623_v15 = vpop.f32.mrb[5].mxu1 }
 0x41d   : > { %v5625_v26 = vpop.f32.mrb[6].mxu1 }
 0x41e   : > { %v5627_v42 = vpop.f32.mrb[7].mxu1 }
 0x421   : > { %v5629_v48 = vpop.f32.mrb[8].mxu1 }
 0x422   : > { %v5631_v18 = vpop.f32.mrb[9].mxu1 }
 0x425   : > { %v5633_v7 = vpop.f32.mrb[10].mxu1 }
 0x426   : > { %v5635_v6 = vpop.f32.mrb[11].mxu1 }
 0x429   : > { %v5637_v37 = vpop.f32.mrb[12].mxu1 }
 0x42a   : > { %v5639_v35 = vpop.f32.mrb[13].mxu1 }
 0x42d   : > { %v5641_v63 = vpop.f32.mrb[14].mxu1 }
 0x42e   : > { %v5649_v12 = vpop.f32.mrb[15].mxu1 }
 0x431   : > { %v4198_v20 = vpop.f32.mrb[16].mxu1 }
 0x432   : > { %1802 = vrot.lane.b32.xlu0 %v4198_v20, %s4797_s27  ;;  %v1625_v10 = vpop.f32.mrb[17].mxu1 }
 0x433   : > { %1800 = vrot.lane.b32.xlu1 %v1625_v10, %s4797_s27  ;;  %v3624_v10 = vld [vmem:[%s6409_s4 + $0x98] sm:$0xff] }
 0x434   : > { %v4602_v20 = vpack.c.bf16 %v3624_v10, %v3623_v61  ;;  %v3627_v61 = vld [vmem:[%s6409_s4 + $0xb0] sm:$0xff]  ;;  %v3628_v10 = vld [vmem:[%s6409_s4 + $0xb8] sm:$0xff] }
 0x435   : > { %v4201_v4 = vpop.f32.mrb[18].mxu1 }
 0x436   : > { %1806 = vrot.lane.b32.xlu0 %v4201_v4, %s4797_s27  ;;  %v1635_v19 = vpop.f32.mrb[19].mxu1  ;;  %4603 = vmatprep.subr.bf16.mxu0 %v4602_v20 }
 0x437   : > { %1804 = vrot.lane.b32.xlu1 %v1635_v19, %s4797_s27  ;;  %4605 = vmatpush3.bf16.msra.mxu0 %v4602_v20  ;;  %v4606_v19 = vpack.c.bf16 %v3626_v13, %v3625_v16  ;;  %v4610_v20 = vpack.c.bf16 %v3628_v10, %v3627_v61 }
 0x439   : > { %v4204_v43 = vpop.f32.mrb[20].mxu1  ;;  %4607 = vmatprep.subr.bf16.mxu0 %v4606_v19 }
 0x43a   : > { %1810 = vrot.lane.b32.xlu0 %v4204_v43, %s4797_s27  ;;  %v1645_v57 = vpop.f32.mrb[21].mxu1 }
 0x43b   : > { %1808 = vrot.lane.b32.xlu1 %v1645_v57, %s4797_s27  ;;  %4609 = vmatpush3.bf16.msra.mxu0 %v4606_v19 }
 0x43c   : > { %4611 = vmatprep.subr.bf16.mxu0 %v4610_v20 }
 0x43d   : > { %v4207_v4 = vpop.f32.mrb[22].mxu1 }
 0x43e   : > { %1814 = vrot.lane.b32.xlu0 %v4207_v4, %s4797_s27  ;;  %v1655_v33 = vpop.f32.mrb[23].mxu1 }
 0x43f   : > { %1812 = vrot.lane.b32.xlu1 %v1655_v33, %s4797_s27  ;;  %4613 = vmatpush3.bf16.msra.mxu0 %v4610_v20 }
 0x441   : > { %v4210_v43 = vpop.f32.mrb[24].mxu1 }
 0x442   : > { %1818 = vrot.lane.b32.xlu0 %v4210_v43, %s4797_s27  ;;  %v1665_v57 = vpop.f32.mrb[25].mxu1 }
 0x443   : > { %1816 = vrot.lane.b32.xlu1 %v1665_v57, %s4797_s27 }
 0x445   : > { %v4213_v4 = vpop.f32.mrb[26].mxu1 }
 0x446   : > { %1822 = vrot.lane.b32.xlu0 %v4213_v4, %s4797_s27  ;;  %v1675_v16 = vpop.f32.mrb[27].mxu1 }
 0x447   : > { %1820 = vrot.lane.b32.xlu1 %v1675_v16, %s4797_s27 }
 0x449   : > { %v4216_v13 = vpop.f32.mrb[28].mxu1 }
 0x44a   : > { %1826 = vrot.lane.b32.xlu0 %v4216_v13, %s4797_s27  ;;  %v1685_v33 = vpop.f32.mrb[29].mxu1 }
 0x44b   : > { %1824 = vrot.lane.b32.xlu1 %v1685_v33, %s4797_s27 }
 0x44d   : > { %v4219_v19 = vpop.f32.mrb[30].mxu1 }
 0x44e   : > { %1830 = vrot.lane.b32.xlu0 %v4219_v19, %s4797_s27  ;;  %v1695_v43 = vpop.f32.mrb[31].mxu1 }
 0x44f   : > { %1828 = vrot.lane.b32.xlu1 %v1695_v43, %s4797_s27 }
 0x451   : > { %v4222_v61 = vpop.f32.mrb[32].mxu1 }
 0x452   : > { %1866 = vrot.lane.b32.xlu0 %v4222_v61, %s4798_s17  ;;  %v1705_v10 = vpop.f32.mrb[33].mxu1 }
 0x453   : > { %1864 = vrot.lane.b32.xlu1 %v1705_v10, %s4798_s17 }
 0x455   : > { %v4225_v57 = vpop.f32.mrb[34].mxu1 }
 0x456   : > { %1870 = vrot.lane.b32.xlu0 %v4225_v57, %s4798_s17  ;;  %v1715_v20 = vpop.f32.mrb[35].mxu1 }
 0x457   : > { %1868 = vrot.lane.b32.xlu1 %v1715_v20, %s4798_s17 }
 0x459   : > { %v4228_v4 = vpop.f32.mrb[36].mxu1 }
 0x45a   : > { %1874 = vrot.lane.b32.xlu0 %v4228_v4, %s4798_s17  ;;  %v1725_v16 = vpop.f32.mrb[37].mxu1 }
 0x45b   : > { %1872 = vrot.lane.b32.xlu1 %v1725_v16, %s4798_s17 }
 0x45d   : > { %v4231_v13 = vpop.f32.mrb[38].mxu1 }
 0x45e   : > { %1878 = vrot.lane.b32.xlu0 %v4231_v13, %s4798_s17  ;;  %v1735_v33 = vpop.f32.mrb[39].mxu1 }
 0x45f   : > { %1876 = vrot.lane.b32.xlu1 %v1735_v33, %s4798_s17 }
 0x461   : > { %v4234_v19 = vpop.f32.mrb[40].mxu1 }
 0x462   : > { %1882 = vrot.lane.b32.xlu0 %v4234_v19, %s4798_s17  ;;  %v1745_v43 = vpop.f32.mrb[41].mxu1 }
 0x463   : > { %1880 = vrot.lane.b32.xlu1 %v1745_v43, %s4798_s17 }
 0x465   : > { %v4237_v61 = vpop.f32.mrb[42].mxu1 }
 0x466   : > { %1886 = vrot.lane.b32.xlu0 %v4237_v61, %s4798_s17  ;;  %v1755_v10 = vpop.f32.mrb[43].mxu1 }
 0x467   : > { %1884 = vrot.lane.b32.xlu1 %v1755_v10, %s4798_s17 }
 0x469   : > { %v4240_v57 = vpop.f32.mrb[44].mxu1 }
 0x46a   : > { %1890 = vrot.lane.b32.xlu0 %v4240_v57, %s4798_s17  ;;  %v1765_v20 = vpop.f32.mrb[45].mxu1 }
 0x46b   : > { %1888 = vrot.lane.b32.xlu1 %v1765_v20, %s4798_s17 }
 0x46d   : > { %v4243_v4 = vpop.f32.mrb[46].mxu1 }
 0x46e   : > { %1894 = vrot.lane.b32.xlu0 %v4243_v4, %s4798_s17  ;;  %v1775_v16 = vpop.f32.mrb[47].mxu1 }
 0x46f   : > { %1892 = vrot.lane.b32.xlu1 %v1775_v16, %s4798_s17 }
 0x4a4   : > { %v1803_v13 = vpop.permute.xlu0 %1802 }
 0x4a5   : > { %v1801_v33 = vpop.permute.xlu1 %1800  ;;  %v1913_v51 = vsel %vm909_vm0, %v5613_v44, %v1803_v13 }
 0x4a6   : > { %v1912_v16 = vsel %vm909_vm0, %v5615_v59, %v1801_v33 }
 0x4a8   : > { %v1807_v19 = vpop.permute.xlu0 %1806 }
 0x4a9   : > { %v1805_v43 = vpop.permute.xlu1 %1804  ;;  %v1915_v59 = vsel %vm909_vm0, %v5617_v17, %v1807_v19 }
 0x4aa   : > { %v1914_v50 = vsel %vm909_vm0, %v5619_v0, %v1805_v43 }
 0x4ac   : > { %v1811_v61 = vpop.permute.xlu0 %1810 }
 0x4ad   : > { %v1809_v3 = vpop.permute.xlu1 %1808 }
 0x4b0   : > { %v1815_v54 = vpop.permute.xlu0 %1814 }
 0x4b1   : > { %v1813_v10 = vpop.permute.xlu1 %1812 }
 0x4b4   : > { %v1819_v23 = vpop.permute.xlu0 %1818 }
 0x4b5   : > { %v1817_v38 = vpop.permute.xlu1 %1816 }
 0x4b6   : > { %v1920_v19 = vsel %vm909_vm0, %v5631_v18, %v1817_v38 }
 0x4b8   : > { %v1823_v57 = vpop.permute.xlu0 %1822 }
 0x4b9   : > { %v1821_v27 = vpop.permute.xlu1 %1820  ;;  %v1923_v38 = vsel %vm909_vm0, %v5633_v7, %v1823_v57 }
 0x4bc   : > { %v1827_v52 = vpop.permute.xlu0 %1826 }
 0x4bd   : > { %v1825_v20 = vpop.permute.xlu1 %1824 }
 0x4c0   : > { %v1831_v1 = vpop.permute.xlu0 %1830 }
 0x4c1   : > { %v1829_v34 = vpop.permute.xlu1 %1828 }
 0x4c4   : > { %v1867_v4 = vpop.permute.xlu0 %1866 }
 0x4c5   : > { %v1865_v53 = vpop.permute.xlu1 %1864  ;;  %v1929_v30 = vsel %vm926_vm1, %v1913_v51, %v1867_v4 }
 0x4c6   : > { %v1928_v32 = vsel %vm926_vm1, %v1912_v16, %v1865_v53  ;;  %v1916_v53 = vsel %vm909_vm0, %v5623_v15, %v1809_v3  ;;  %v1919_v3 = vsel %vm909_vm0, %v5625_v26, %v1815_v54  ;;  %v1924_v16 = vsel %vm909_vm0, %v5639_v35, %v1825_v20 }
 0x4c7   : > { %4268 = vmatprep.mubr.msk.f32.mxu0 %vm955_vm2, %v1928_v32  ;;  %v1917_v32 = vsel %vm909_vm0, %v5621_v8, %v1811_v61  ;;  %v1927_v35 = vsel %vm909_vm0, %v5641_v63, %v1831_v1 }
 0x4c8   : > { %4269 = vmatmul.mubr.msk.f32.vlgmr.msra.gmra.mrb[64].mxu0 %vm955_vm2, %v1929_v30  ;;  %v1871_v25 = vpop.permute.xlu0 %1870 }
 0x4c9   : > { %v1869_v11 = vpop.permute.xlu1 %1868  ;;  %v1931_v44 = vsel %vm926_vm1, %v1915_v59, %v1871_v25  ;;  %v1918_v25 = vsel %vm909_vm0, %v5627_v42, %v1813_v10  ;;  %v1921_v42 = vsel %vm909_vm0, %v5629_v48, %v1819_v23  ;;  %v1922_v10 = vsel %vm909_vm0, %v5635_v6, %v1821_v27 }
 0x4ca   : > { %v1930_v33 = vsel %vm926_vm1, %v1914_v50, %v1869_v11  ;;  %v1925_v27 = vsel %vm909_vm0, %v5637_v37, %v1827_v52  ;;  %v5780_v37 = vld [vmem:[%s6410_s5 + $0x1] ss:$0 sm:$0xff] }
 0x4cb   : > { %4271 = vmatprep.mubr.msk.f32.mxu0 %vm955_vm2, %v1930_v33  ;;  %v1926_v33 = vsel %vm909_vm0, %v5649_v12, %v1829_v34  ;;  %2286 = vrot.lane.b32.xlu1 %v5780_v37, %s4801_s24 }
 0x4cc   : > { %4272 = vmatmul.mubr.msk.f32.gmra.mrb[66].mxu0 %vm955_vm2, %v1931_v44  ;;  %v1875_v51 = vpop.permute.xlu0 %1874 }
 0x4cd   : > { %v1873_v30 = vpop.permute.xlu1 %1872  ;;  %v1933_v17 = vsel %vm926_vm1, %v1917_v32, %v1875_v51 }
 0x4ce   : > { %v1932_v0 = vsel %vm926_vm1, %v1916_v53, %v1873_v30 }
 0x4cf   : > { %4274 = vmatprep.mubr.msk.f32.mxu0 %vm955_vm2, %v1932_v0 }
 0x4d0   : > { %4275 = vmatmul.mubr.msk.f32.gmra.mrb[68].mxu0 %vm955_vm2, %v1933_v17  ;;  %v1879_v50 = vpop.permute.xlu0 %1878 }
 0x4d1   : > { %v1877_v11 = vpop.permute.xlu1 %1876  ;;  %v1935_v8 = vsel %vm926_vm1, %v1919_v3, %v1879_v50 }
 0x4d2   : > { %v1934_v15 = vsel %vm926_vm1, %v1918_v25, %v1877_v11 }
 0x4d3   : > { %4277 = vmatprep.mubr.msk.f32.mxu0 %vm955_vm2, %v1934_v15 }
 0x4d4   : > { %4278 = vmatmul.mubr.msk.f32.gmra.mrb[70].mxu0 %vm955_vm2, %v1935_v8  ;;  %v1883_v13 = vpop.permute.xlu0 %1882 }
 0x4d5   : > { %v1881_v43 = vpop.permute.xlu1 %1880  ;;  %v1937_v54 = vsel %vm926_vm1, %v1921_v42, %v1883_v13 }
 0x4d6   : > { %v1936_v61 = vsel %vm926_vm1, %v1920_v19, %v1881_v43 }
 0x4d7   : > { %4280 = vmatprep.mubr.msk.f32.mxu0 %vm955_vm2, %v1936_v61 }
 0x4d8   : > { %4281 = vmatmul.mubr.msk.f32.gmra.mrb[72].mxu0 %vm955_vm2, %v1937_v54  ;;  %v1887_v26 = vpop.permute.xlu0 %1886 }
 0x4d9   : > { %v1885_v4 = vpop.permute.xlu1 %1884  ;;  %v1939_v23 = vsel %vm926_vm1, %v1923_v38, %v1887_v26 }
 0x4da   : > { %v1938_v18 = vsel %vm926_vm1, %v1922_v10, %v1885_v4 }
 0x4db   : > { %4283 = vmatprep.mubr.msk.f32.mxu0 %vm955_vm2, %v1938_v18 }
 0x4dc   : > { %4284 = vmatmul.mubr.msk.f32.gmra.mrb[74].mxu0 %vm955_vm2, %v1939_v23  ;;  %v1891_v48 = vpop.permute.xlu0 %1890 }
 0x4dd   : > { %v1889_v59 = vpop.permute.xlu1 %1888  ;;  %v1941_v7 = vsel %vm926_vm1, %v1925_v27, %v1891_v48  ;;  %v6588_v27 = vld [vmem:[#allocation2_spill] sm:$0xff] }
 0x4de   : > { %v1940_v6 = vsel %vm926_vm1, %v1924_v16, %v1889_v59 }
 0x4df   : > { %4286 = vmatprep.mubr.msk.f32.mxu0 %vm955_vm2, %v1940_v6 }
 0x4e0   : > { %4287 = vmatmul.mubr.msk.f32.gmra.mrb[76].mxu0 %vm955_vm2, %v1941_v7  ;;  %v1895_v57 = vpop.permute.xlu0 %1894 }
 0x4e1   : > { %v1893_v44 = vpop.permute.xlu1 %1892  ;;  %v1943_v52 = vsel %vm926_vm1, %v1927_v35, %v1895_v57 }
 0x4e2   : > { %v1942_v20 = vsel %vm926_vm1, %v1926_v33, %v1893_v44 }
 0x4e3   : > { %4289 = vmatprep.mubr.msk.f32.mxu0 %vm955_vm2, %v1942_v20 }
 0x4e4   : > { %4290 = vmatmul.mubr.msk.f32.gmra.mrb[78].mxu0 %vm955_vm2, %v1943_v52 }
 0x53d   : > { %v5846_v7 = vpop.permute.xlu1 %2286 }
 0x59b   : > { %v4270_v34 = vpop.f32.mrb[64].mxu0 }
 0x59c   : > { %v2151_v12 = vmul.f32 %v4270_v34, %v5152_v55  ;;  %v2071_v1 = vpop.f32.mrb[65].mxu0 }
 0x59d   : > { %v2150_v63 = vmul.f32 %v2071_v1, %v5150_v22 }
 0x59e   : > { %2184 = vrot.lane.b32.xlu0 %v2151_v12, %s4801_s24 }
 0x59f   : > { %v4273_v51 = vpop.f32.mrb[66].mxu0  ;;  %2182 = vrot.lane.b32.xlu1 %v2150_v63, %s4801_s24  ;;  %v6589_v63 = vld [vmem:[#allocation3_spill] sm:$0xff] }
 0x5a0   : > { %v2153_v53 = vmul.f32 %v4273_v51, %v5154_v28  ;;  %v2081_v30 = vpop.f32.mrb[67].mxu0 }
 0x5a1   : > { %v2152_v32 = vmul.f32 %v2081_v30, %v5156_v56 }
 0x5a2   : > { %2188 = vrot.lane.b32.xlu0 %v2153_v53, %s4801_s24 }
 0x5a3   : > { %v4276_v0 = vpop.f32.mrb[68].mxu0  ;;  %2186 = vrot.lane.b32.xlu1 %v2152_v32, %s4801_s24 }
 0x5a4   : > { %v2155_v17 = vmul.f32 %v4276_v0, %v5160_v58  ;;  %v2091_v50 = vpop.f32.mrb[69].mxu0 }
 0x5a5   : > { %v2154_v25 = vmul.f32 %v2091_v50, %v5166_v60 }
 0x5a7   : > { %v5794_v11 = vpop.f32.mrb[70].mxu0  ;;  %2190 = vrot.lane.b32.xlu0 %v2154_v25, %s4801_s24  ;;  %2192 = vrot.lane.b32.xlu1 %v2155_v17, %s4801_s24 }
 0x5a8   : > { %v2157_v3 = vmul.f32 %v5794_v11, %v5171_v62  ;;  %v5800_v15 = vpop.f32.mrb[71].mxu0 }
 0x5a9   : > { %v2156_v8 = vmul.f32 %v5800_v15, %v5176_v2 }
 0x5ab   : > { %v5804_v13 = vpop.f32.mrb[72].mxu0  ;;  %2194 = vrot.lane.b32.xlu0 %v2156_v8, %s4801_s24  ;;  %2196 = vrot.lane.b32.xlu1 %v2157_v3, %s4801_s24 }
 0x5ac   : > { %v2159_v19 = vmul.f32 %v5804_v13, %v5192_v9  ;;  %v5810_v43 = vpop.f32.mrb[73].mxu0 }
 0x5ad   : > { %v2158_v42 = vmul.f32 %v5810_v43, %v5196_v24 }
 0x5af   : > { %v5814_v61 = vpop.f32.mrb[74].mxu0  ;;  %2198 = vrot.lane.b32.xlu0 %v2158_v42, %s4801_s24  ;;  %2200 = vrot.lane.b32.xlu1 %v2159_v19, %s4801_s24 }
 0x5b0   : > { %v2161_v54 = vmul.f32 %v5814_v61, %v5208_v29  ;;  %v5820_v26 = vpop.f32.mrb[75].mxu0 }
 0x5b1   : > { %v2160_v10 = vmul.f32 %v5820_v26, %v5214_v31 }
 0x5b3   : > { %v5824_v4 = vpop.f32.mrb[76].mxu0  ;;  %2202 = vrot.lane.b32.xlu0 %v2160_v10, %s4801_s24  ;;  %2204 = vrot.lane.b32.xlu1 %v2161_v54, %s4801_s24 }
 0x5b4   : > { %v2163_v38 = vmul.f32 %v5824_v4, %v5230_v36  ;;  %v5830_v18 = vpop.f32.mrb[77].mxu0 }
 0x5b5   : > { %v2162_v23 = vmul.f32 %v5830_v18, %v5234_v14 }
 0x5b7   : > { %2206 = vrot.lane.b32.xlu0 %v2162_v23, %s4801_s24  ;;  %2208 = vrot.lane.b32.xlu1 %v2163_v38, %s4801_s24  ;;  %v5836_v48 = vpop.f32.mrb[78].mxu0 }
 0x5b8   : > { %v2165_v16 = vmul.f32 %v5836_v48, %v5246_v41  ;;  %v5840_v59 = vpop.f32.mrb[79].mxu0 }
 0x5b9   : > { %v2164_v6 = vmul.f32 %v5840_v59, %v6588_v27 }
 0x5bb   : > { %2212 = vrot.lane.b32.xlu1 %v2165_v16, %s4801_s24  ;;  %2210 = vrot.lane.b32.xlu0 %v2164_v6, %s4801_s24 }
 0x610   : > { %v2185_v57 = vpop.permute.xlu0 %2184 }
 0x611   : > { %v2231_v33 = vadd.f32 %v4270_v34, %v2185_v57  ;;  %v2183_v44 = vpop.permute.xlu1 %2182 }
 0x612   : > { %v2230_v35 = vadd.f32 %v2183_v44, %v2071_v1 }
 0x613   : > { %v2255_v20 = vadd.f32 %v5780_v37, %v2231_v33 }
 0x614   : > { %v2254_v52 = vadd.f32 %v5780_v37, %v2230_v35  ;;  %v2189_v12 = vpop.permute.xlu0 %2188 }
 0x615   : > { %v2271_v53 = vmul.f32 %v2255_v20, %v6589_v63  ;;  %v2233_v32 = vadd.f32 %v4273_v51, %v2189_v12  ;;  %v2187_v17 = vpop.permute.xlu1 %2186 }
 0x616   : > { %v2270_v25 = vmul.f32 %v2254_v52, %v5262_v45  ;;  %v2232_v3 = vadd.f32 %v2187_v17, %v2081_v30 }
 0x617   : > { %v2290_v8 = vadd.f32 %v5846_v7, %v2271_v53  ;;  %v2257_v19 = vadd.f32 %v5780_v37, %v2233_v32 }
 0x618   : > { %v2289_v34 = vadd.f32 %v5846_v7, %v2270_v25  ;;  %v2256_v1 = vadd.f32 %v5780_v37, %v2232_v3 }
 0x619   : > { %v2306_v42 = vmax.f32 %v2290_v8, 0.0  ;;  %v2273_v54 = vmul.f32 %v2257_v19, %v5266_v46  ;;  %v2191_v10 = vpop.permute.xlu0 %2190  ;;  %v2193_v38 = vpop.permute.xlu1 %2192 }
 0x61a   : > { %v2305_v23 = vmax.f32 %v2289_v34, 0.0  ;;  %v2272_v51 = vmul.f32 %v2256_v1, %v5268_v21  ;;  %v2234_v16 = vadd.f32 %v2191_v10, %v2091_v50  ;;  %v2235_v6 = vadd.f32 %v4276_v0, %v2193_v38  ;;  %v6591_v34 = vld [vmem:[#allocation15_spill] sm:$0xff]  ;;  %v6593_v38 = vld [vmem:[#allocation5_spill] sm:$0xff] }
 0x61b   : > { %v2292_v30 = vadd.f32 %v5846_v7, %v2273_v54  ;;  %v5860_v57 = vadd.f32 %v2306_v42, %v5320_v5 }
 0x61c   : > { %v2291_v33 = vadd.f32 %v5846_v7, %v2272_v51  ;;  %v2258_v44 = vadd.f32 %v5780_v37, %v2234_v16  ;;  %v2259_v35 = vadd.f32 %v5780_v37, %v2235_v6  ;;  %v5866_v20 = vadd.f32 %v2305_v23, %v5317_v40  ;;  %v6594_v51 = vld [vmem:[#allocation7_spill] sm:$0xff] }
 0x61d   : > { %v2308_v52 = vmax.f32 %v2292_v30, 0.0  ;;  %v2195_v12 = vpop.permute.xlu0 %2194  ;;  %v2197_v53 = vpop.permute.xlu1 %2196 }
 0x61e   : > { %v2307_v32 = vmax.f32 %v2291_v33, 0.0  ;;  %v2274_v0 = vmul.f32 %v2258_v44, %v5272_v49  ;;  %v2275_v50 = vmul.f32 %v2259_v35, %v5270_v47  ;;  %v2236_v5 = vadd.f32 %v2195_v12, %v5800_v15  ;;  %v6595_v35 = vld [vmem:[#allocation16_spill] sm:$0xff]  ;;  %v6597_v12 = vld [vmem:[#allocation17_spill] sm:$0xff] }
 0x61f   : > { %v2237_v17 = vadd.f32 %v5794_v11, %v2197_v53  ;;  %v4614_v25 = vpack.c.bf16 %v5860_v57, %v5866_v20  ;;  %v5875_v3 = vadd.f32 %v2308_v52, %v5336_v39 }
 0x620   : > { %v2293_v40 = vadd.f32 %v5846_v7, %v2274_v0  ;;  %v2294_v8 = vadd.f32 %v5846_v7, %v2275_v50  ;;  %v2260_v19 = vadd.f32 %v5780_v37, %v2236_v5  ;;  %v5881_v1 = vadd.f32 %v2307_v32, %v6591_v34  ;;  %v6599_v5 = vld [vmem:[#allocation6_spill] sm:$0xff] }
 0x621   : > { %6590 = vst [vmem:[#allocation2_spill] sm:$0xff] %v5875_v3  ;;  %v2261_v42 = vadd.f32 %v5780_v37, %v2237_v17  ;;  %4615 = vmatprep.subr.bf16.mxu1 %v4614_v25  ;;  %v2199_v15 = vpop.permute.xlu0 %2198  ;;  %v2201_v11 = vpop.permute.xlu1 %2200 }
 0x622   : > { %6592 = vst [vmem:[#allocation3_spill] sm:$0xff] %v5881_v1  ;;  %v2309_v54 = vmax.f32 %v2293_v40, 0.0  ;;  %v2310_v10 = vmax.f32 %v2294_v8, 0.0  ;;  %v2276_v23 = vmul.f32 %v2260_v19, %v6593_v38  ;;  %v2238_v39 = vadd.f32 %v2199_v15, %v5810_v43  ;;  %4617 = vmatpush3.bf16.msra.mxu1 %v4614_v25  ;;  %v6600_v19 = vld [vmem:[#allocation9_spill] sm:$0xff] }
 0x623   : > { %v2277_v16 = vmul.f32 %v2261_v42, %v6594_v51  ;;  %v2239_v6 = vadd.f32 %v5804_v13, %v2201_v11  ;;  %v4618_v30 = vpack.c.bf16 %v5875_v3, %v5881_v1 }
 0x624   : > { %v2295_v33 = vadd.f32 %v5846_v7, %v2276_v23  ;;  %v2262_v44 = vadd.f32 %v5780_v37, %v2238_v39  ;;  %v5893_v52 = vadd.f32 %v2309_v54, %v6595_v35  ;;  %v5896_v53 = vadd.f32 %v2310_v10, %v6597_v12  ;;  %v6601_v10 = vld [vmem:[#allocation18_spill] sm:$0xff]  ;;  %v6606_v35 = vld [vmem:[#allocation11_spill] sm:$0xff] }
 0x625   : > { %v2296_v43 = vadd.f32 %v5846_v7, %v2277_v16  ;;  %v2263_v32 = vadd.f32 %v5780_v37, %v2239_v6  ;;  %4619 = vmatprep.subr.bf16.mxu1 %v4618_v30  ;;  %v2203_v0 = vpop.permute.xlu0 %2202  ;;  %v2205_v13 = vpop.permute.xlu1 %2204  ;;  %v6603_v16 = vld [vmem:[#allocation19_spill] sm:$0xff] }
 0x626   : > { %6596 = vst [vmem:[#allocation15_spill] sm:$0xff] %v5893_v52  ;;  %6598 = vst [vmem:[#allocation16_spill] sm:$0xff] %v5896_v53  ;;  %v2311_v50 = vmax.f32 %v2295_v33, 0.0  ;;  %v2278_v17 = vmul.f32 %v2262_v44, %v6599_v5  ;;  %v2240_v25 = vadd.f32 %v2203_v0, %v5820_v26  ;;  %4621 = vmatpush3.bf16.msra.mxu1 %v4618_v30  ;;  %v6605_v33 = vld [vmem:[#allocation8_spill] sm:$0xff] }
 0x627   : > { %v2241_v40 = vadd.f32 %v5814_v61, %v2205_v13  ;;  %v2312_v8 = vmax.f32 %v2296_v43, 0.0  ;;  %v2279_v34 = vmul.f32 %v2263_v32, %v6600_v19  ;;  %v4622_v42 = vpack.c.bf16 %v5896_v53, %v5893_v52 }
 0x628   : > { %v2297_v15 = vadd.f32 %v5846_v7, %v2278_v17  ;;  %v2264_v11 = vadd.f32 %v5780_v37, %v2240_v25  ;;  %v5910_v23 = vadd.f32 %v2311_v50, %v6601_v10  ;;  %v6611_v10 = vld [vmem:[#allocation10_spill] sm:$0xff] }
 0x629   : > { %v2265_v54 = vadd.f32 %v5780_v37, %v2241_v40  ;;  %v2298_v26 = vadd.f32 %v5846_v7, %v2279_v34  ;;  %4623 = vmatprep.subr.bf16.mxu1 %v4622_v42  ;;  %v2207_v39 = vpop.permute.xlu0 %2206  ;;  %v2209_v61 = vpop.permute.xlu1 %2208  ;;  %v5914_v6 = vadd.f32 %v2312_v8, %v6603_v16  ;;  %v6607_v40 = vld [vmem:[#allocation20_spill] sm:$0xff] }
 0x62a   : > { %6602 = vst [vmem:[#allocation17_spill] sm:$0xff] %v5910_v23  ;;  %v2313_v30 = vmax.f32 %v2297_v15, 0.0  ;;  %v2280_v44 = vmul.f32 %v2264_v11, %v6605_v33  ;;  %v2242_v43 = vadd.f32 %v2207_v39, %v5830_v18  ;;  %4625 = vmatpush3.bf16.msra.mxu1 %v4622_v42  ;;  %v2243_v0 = vadd.f32 %v5824_v4, %v2209_v61  ;;  %v6609_v15 = vld [vmem:[#allocation21_spill] sm:$0xff] }
 0x62b   : > { %6604 = vst [vmem:[#allocation18_spill] sm:$0xff] %v5914_v6  ;;  %v2281_v12 = vmul.f32 %v2265_v54, %v6606_v35  ;;  %v2314_v32 = vmax.f32 %v2298_v26, 0.0  ;;  %v4626_v13 = vpack.c.bf16 %v5914_v6, %v5910_v23  ;;  %v6612_v61 = vld [vmem:[#allocation13_spill] sm:$0xff] }
 0x62c   : > { %v2299_v50 = vadd.f32 %v5846_v7, %v2280_v44  ;;  %v2266_v25 = vadd.f32 %v5780_v37, %v2242_v43  ;;  %v5926_v8 = vadd.f32 %v2313_v30, %v6607_v40  ;;  %v2267_v34 = vadd.f32 %v5780_v37, %v2243_v0 }
 0x62d   : > { %v2300_v17 = vadd.f32 %v5846_v7, %v2281_v12  ;;  %4627 = vmatprep.subr.bf16.mxu1 %v4626_v13  ;;  %v2211_v18 = vpop.permute.xlu0 %2210  ;;  %v2213_v42 = vpop.permute.xlu1 %2212  ;;  %v5930_v11 = vadd.f32 %v2314_v32, %v6609_v15  ;;  %v6613_v32 = vld [vmem:[#allocation22_spill] sm:$0xff] }
 0x62e   : > { %6608 = vst [vmem:[#allocation19_spill] sm:$0xff] %v5926_v8  ;;  %v2315_v4 = vmax.f32 %v2299_v50, 0.0  ;;  %v2282_v26 = vmul.f32 %v2266_v25, %v6611_v10  ;;  %v2244_v39 = vadd.f32 %v2211_v18, %v5840_v59  ;;  %4629 = vmatpush3.bf16.msra.mxu1 %v4626_v13  ;;  %v2283_v16 = vmul.f32 %v2267_v34, %v6612_v61  ;;  %v6615_v50 = vld [vmem:[#allocation23_spill] sm:$0xff] }
 0x62f   : > { %6610 = vst [vmem:[#allocation20_spill] sm:$0xff] %v5930_v11  ;;  %v2316_v54 = vmax.f32 %v2300_v17, 0.0  ;;  %v2245_v30 = vadd.f32 %v5836_v48, %v2213_v42  ;;  %v4630_v44 = vpack.c.bf16 %v5930_v11, %v5926_v8  ;;  %v6617_v48 = vld [vmem:[#allocation12_spill] sm:$0xff]  ;;  %v6618_v42 = vld [vmem:[#allocation14_spill] sm:$0xff] }
 0x630   : > { %v2301_v12 = vadd.f32 %v5846_v7, %v2282_v26  ;;  %v2268_v43 = vadd.f32 %v5780_v37, %v2244_v39  ;;  %v5941_v0 = vadd.f32 %v2315_v4, %v6613_v32  ;;  %v2302_v59 = vadd.f32 %v5846_v7, %v2283_v16 }
 0x631   : > { %v5944_v17 = vadd.f32 %v2316_v54, %v6615_v50  ;;  %v2269_v13 = vadd.f32 %v5780_v37, %v2245_v30  ;;  %4631 = vmatprep.subr.bf16.mxu1 %v4630_v44  ;;  %v6619_v54 = vld [vmem:[#allocation24_spill] sm:$0xff]  ;;  %v6621_v37 = vld [vmem:[#allocation25_spill] sm:$0xff]  ;;  %v6625_v50 = vld [vmem:[#allocation27_spill] sm:$0xff] }
 0x632   : > { %6614 = vst [vmem:[#allocation21_spill] sm:$0xff] %v5941_v0  ;;  %v2317_v25 = vmax.f32 %v2301_v12, 0.0  ;;  %v2284_v40 = vmul.f32 %v2268_v43, %v6617_v48  ;;  %4633 = vmatpush3.bf16.msra.mxu1 %v4630_v44  ;;  %v2318_v18 = vmax.f32 %v2302_v59, 0.0  ;;  %v6623_v43 = vld [vmem:[#allocation26_spill] sm:$0xff]  ;;  %v3650_v48 = vld [vmem:[%s6409_s4 + $0xd8] sm:$0xff] }
 0x633   : > { %6616 = vst [vmem:[#allocation22_spill] sm:$0xff] %v5944_v17  ;;  %v4634_v34 = vpack.c.bf16 %v5944_v17, %v5941_v0  ;;  %v2285_v15 = vmul.f32 %v2269_v13, %v6618_v42  ;;  %v6627_v13 = vld [vmem:[#allocation28_spill] sm:$0xff] }
 0x634   : > { %v2303_v4 = vadd.f32 %v5846_v7, %v2284_v40  ;;  %v5954_v26 = vadd.f32 %v2317_v25, %v6619_v54  ;;  %v5958_v16 = vadd.f32 %v2318_v18, %v6621_v37  ;;  %v6628_v25 = vld [vmem:[#allocation29_spill] sm:$0xff]  ;;  %v6629_v40 = vld [vmem:[#allocation30_spill] sm:$0xff]  ;;  %v6631_v18 = vld [vmem:[#allocation32_spill] sm:$0xff] }
 0x635   : > { %4635 = vmatprep.subr.bf16.mxu1 %v4634_v34  ;;  %v2304_v39 = vadd.f32 %v5846_v7, %v2285_v15  ;;  %v6632_v15 = vld [vmem:[#allocation33_spill] sm:$0xff]  ;;  %v6634_v54 = vld [vmem:[#allocation35_spill] sm:$0xff]  ;;  %v3649_v42 = vld [vmem:[%s6409_s4 + $0xd0] sm:$0xff] }
 0x636   : > { %6620 = vst [vmem:[#allocation23_spill] sm:$0xff] %v5954_v26  ;;  %6622 = vst [vmem:[#allocation24_spill] sm:$0xff] %v5958_v16  ;;  %v2319_v30 = vmax.f32 %v2303_v4, 0.0  ;;  %4637 = vmatpush3.bf16.msra.mxu1 %v4634_v34  ;;  %v4638_v12 = vpack.c.bf16 %v5958_v16, %v5954_v26  ;;  %v6630_v34 = vld [vmem:[#allocation31_spill] sm:$0xff]  ;;  %v6633_v4 = vld [vmem:[#allocation34_spill] sm:$0xff]  ;;  %v4650_v0 = vpack.c.bf16 %v3650_v48, %v3649_v42 }
 0x637   : > { %v2320_v44 = vmax.f32 %v2304_v39, 0.0  ;;  %v6635_v39 = vld [vmem:[#allocation36_spill] sm:$0xff]  ;;  %v6636_v37 = vld [vmem:[#allocation37_spill] sm:$0xff] }
 0x638   : > { %v5963_v32 = vadd.f32 %v2319_v30, %v6623_v43  ;;  %4639 = vmatprep.subr.bf16.mxu1 %v4638_v12  ;;  %v6637_v30 = vld [vmem:[#allocation38_spill] sm:$0xff]  ;;  %v6640_v43 = vld [vmem:[#allocation41_spill] sm:$0xff] }
 0x639   : > { %v5966_v59 = vadd.f32 %v2320_v44, %v6625_v50  ;;  %v6638_v44 = vld [vmem:[#allocation39_spill] sm:$0xff]  ;;  %v6641_v50 = vld [vmem:[#allocation42_spill] sm:$0xff] }
 0x63a   : > { %6624 = vst [vmem:[#allocation25_spill] sm:$0xff] %v5963_v32  ;;  %4641 = vmatpush3.bf16.msra.mxu1 %v4638_v12  ;;  %v6639_v12 = vld [vmem:[#allocation40_spill] sm:$0xff] }
 0x63b   : > { %6626 = vst [vmem:[#allocation26_spill] sm:$0xff] %v5966_v59  ;;  %v4642_v7 = vpack.c.bf16 %v5966_v59, %v5963_v32  ;;  %v3648_v59 = vld [vmem:[%s6409_s4 + $0xc8] sm:$0xff] }
 0x63d   : > { %4643 = vmatprep.subr.bf16.mxu1 %v4642_v7 }
 0x63e   : > { %4645 = vmatpush3.bf16.msra.mxu1 %v4642_v7  ;;  %v6642_v7 = vld [vmem:[#allocation43_spill] sm:$0xff] }
 0x641   : > { %4325 = vmatmul.mubr.f32.vlgmr.msra.gmra.mrb[48].mxu1 %v6627_v13  ;;  %v6643_v13 = vld [vmem:[#allocation44_spill] sm:$0xff] }
 0x642   : > { %4327 = vmatprep.mubr.f32.mxu1 %v6628_v25  ;;  %v6644_v25 = vld [vmem:[#allocation45_spill] sm:$0xff] }
 0x645   : > { %4328 = vmatmul.mubr.f32.gmra.mrb[50].mxu1 %v6629_v40  ;;  %v6645_v40 = vld [vmem:[#allocation46_spill] sm:$0xff] }
 0x646   : > { %4330 = vmatprep.mubr.f32.mxu1 %v6630_v34  ;;  %v6646_v34 = vld [vmem:[#allocation47_spill] sm:$0xff] }
 0x649   : > { %4331 = vmatmul.mubr.f32.gmra.mrb[52].mxu1 %v6631_v18  ;;  %v6647_v18 = vld [vmem:[#allocation48_spill] sm:$0xff] }
 0x64a   : > { %4333 = vmatprep.mubr.f32.mxu1 %v6632_v15  ;;  %v6648_v15 = vld [vmem:[#allocation49_spill] sm:$0xff] }
 0x64d   : > { %4334 = vmatmul.mubr.f32.gmra.mrb[54].mxu1 %v6633_v4  ;;  %v6649_v4 = vld [vmem:[#allocation50_spill] sm:$0xff] }
 0x64e   : > { %4336 = vmatprep.mubr.f32.mxu1 %v6634_v54  ;;  %v6650_v54 = vld [vmem:[#allocation51_spill] sm:$0xff] }
 0x651   : > { %4337 = vmatmul.mubr.f32.gmra.mrb[56].mxu1 %v6635_v39  ;;  %v6651_v39 = vld [vmem:[#allocation52_spill] sm:$0xff] }
 0x652   : > { %4339 = vmatprep.mubr.f32.mxu1 %v6636_v37  ;;  %v6652_v37 = vld [vmem:[#allocation53_spill] sm:$0xff] }
 0x655   : > { %4340 = vmatmul.mubr.f32.gmra.mrb[58].mxu1 %v6637_v30  ;;  %v6653_v30 = vld [vmem:[#allocation54_spill] sm:$0xff] }
 0x656   : > { %4342 = vmatprep.mubr.f32.mxu1 %v6638_v44  ;;  %v6654_v44 = vld [vmem:[#allocation55_spill] sm:$0xff] }
 0x659   : > { %4343 = vmatmul.mubr.f32.gmra.mrb[60].mxu1 %v6639_v12  ;;  %v6655_v12 = vld [vmem:[#allocation56_spill] sm:$0xff] }
 0x65a   : > { %4345 = vmatprep.mubr.f32.mxu1 %v6640_v43  ;;  %v6656_v43 = vld [vmem:[#allocation57_spill] sm:$0xff] }
 0x65d   : > { %4346 = vmatmul.mubr.f32.gmra.mrb[62].mxu1 %v6641_v50  ;;  %v6657_v50 = vld [vmem:[#allocation58_spill] sm:$0xff] }
 0x65e   : > { %4348 = vmatprep.mubr.f32.mxu1 %v6642_v7  ;;  %v6658_v7 = vld [vmem:[#allocation59_spill] sm:$0xff] }
 0x661   : > { %4349 = vmatmul.mubr.f32.gmra.mrb[64].mxu1 %v6643_v13  ;;  %v6659_v13 = vld [vmem:[#allocation60_spill] sm:$0xff] }
 0x662   : > { %4351 = vmatprep.mubr.f32.mxu1 %v6644_v25  ;;  %v6660_v25 = vld [vmem:[#allocation61_spill] sm:$0xff] }
 0x665   : > { %4352 = vmatmul.mubr.f32.gmra.mrb[66].mxu1 %v6645_v40  ;;  %v6661_v40 = vld [vmem:[#allocation62_spill] sm:$0xff] }
 0x666   : > { %4354 = vmatprep.mubr.f32.mxu1 %v6646_v34  ;;  %v6662_v34 = vld [vmem:[#allocation63_spill] sm:$0xff] }
 0x669   : > { %4355 = vmatmul.mubr.f32.gmra.mrb[68].mxu1 %v6647_v18  ;;  %v6663_v18 = vld [vmem:[#allocation64_spill] sm:$0xff] }
 0x66a   : > { %4357 = vmatprep.mubr.f32.mxu1 %v6648_v15  ;;  %v6664_v15 = vld [vmem:[#allocation65_spill] sm:$0xff] }
 0x66d   : > { %4358 = vmatmul.mubr.f32.gmra.mrb[70].mxu1 %v6649_v4  ;;  %v6665_v4 = vld [vmem:[#allocation66_spill] sm:$0xff] }
 0x66e   : > { %4360 = vmatprep.mubr.f32.mxu1 %v6650_v54  ;;  %v6666_v54 = vld [vmem:[#allocation67_spill] sm:$0xff] }
 0x671   : > { %4361 = vmatmul.mubr.f32.gmra.mrb[72].mxu1 %v6651_v39  ;;  %v6667_v39 = vld [vmem:[#allocation68_spill] sm:$0xff] }
 0x672   : > { %4363 = vmatprep.mubr.f32.mxu1 %v6652_v37  ;;  %v6668_v37 = vld [vmem:[#allocation69_spill] sm:$0xff] }
 0x675   : > { %4364 = vmatmul.mubr.f32.gmra.mrb[74].mxu1 %v6653_v30  ;;  %v6669_v30 = vld [vmem:[#allocation70_spill] sm:$0xff] }
 0x676   : > { %4366 = vmatprep.mubr.f32.mxu1 %v6654_v44  ;;  %v6670_v44 = vld [vmem:[#allocation71_spill] sm:$0xff] }
 0x679   : > { %4367 = vmatmul.mubr.f32.gmra.mrb[76].mxu1 %v6655_v12  ;;  %v6671_v12 = vld [vmem:[#allocation72_spill] sm:$0xff] }
 0x67a   : > { %4369 = vmatprep.mubr.f32.mxu1 %v6656_v43  ;;  %v6672_v43 = vld [vmem:[#allocation73_spill] sm:$0xff] }
 0x67d   : > { %4370 = vmatmul.mubr.f32.gmra.mrb[78].mxu1 %v6657_v50  ;;  %v6673_v50 = vld [vmem:[#allocation74_spill] sm:$0xff] }
 0x67e   : > { %4372 = vmatprep.mubr.f32.mxu1 %v6658_v7 }
 0x681   : > { %4373 = vmatmul.mubr.f32.gmra.mrb[80].mxu1 %v6659_v13 }
 0x682   : > { %4375 = vmatprep.mubr.f32.mxu1 %v6660_v25 }
 0x685   : > { %4376 = vmatmul.mubr.f32.gmra.mrb[82].mxu1 %v6661_v40 }
 0x686   : > { %4378 = vmatprep.mubr.f32.mxu1 %v6662_v34 }
 0x689   : > { %4379 = vmatmul.mubr.f32.gmra.mrb[84].mxu1 %v6663_v18 }
 0x68a   : > { %4381 = vmatprep.mubr.f32.mxu1 %v6664_v15 }
 0x68d   : > { %4382 = vmatmul.mubr.f32.gmra.mrb[86].mxu1 %v6665_v4 }
 0x68e   : > { %4384 = vmatprep.mubr.f32.mxu1 %v6666_v54 }
 0x691   : > { %4385 = vmatmul.mubr.f32.gmra.mrb[88].mxu1 %v6667_v39 }
 0x692   : > { %4387 = vmatprep.mubr.f32.mxu1 %v6668_v37 }
 0x695   : > { %4388 = vmatmul.mubr.f32.gmra.mrb[90].mxu1 %v6669_v30 }
 0x696   : > { %4390 = vmatprep.mubr.f32.mxu1 %v6670_v44 }
 0x699   : > { %4391 = vmatmul.mubr.f32.gmra.mrb[92].mxu1 %v6671_v12 }
 0x69a   : > { %4393 = vmatprep.mubr.f32.mxu1 %v6672_v43 }
 0x69d   : > { %4394 = vmatmul.mubr.f32.gmra.mrb[94].mxu1 %v6673_v50  ;;  %v3647_v50 = vld [vmem:[%s6409_s4 + $0xc0] sm:$0xff] }
 0x69e   : > { %v4646_v16 = vpack.c.bf16 %v3648_v59, %v3647_v50  ;;  %v3652_v59 = vld [vmem:[%s6409_s4 + $0xe8] sm:$0xff] }
 0x6a0   : > { %4647 = vmatprep.subr.bf16.mxu0 %v4646_v16 }
 0x6a1   : > { %4649 = vmatpush3.bf16.msra.mxu0 %v4646_v16  ;;  %v3651_v16 = vld [vmem:[%s6409_s4 + $0xe0] sm:$0xff] }
 0x6a2   : > { %4651 = vmatprep.subr.bf16.mxu0 %v4650_v0  ;;  %v4654_v10 = vpack.c.bf16 %v3652_v59, %v3651_v16  ;;  %v3656_v16 = vld [vmem:[%s6409_s4 + $0x108] sm:$0xff] }
 0x6a5   : > { %4653 = vmatpush3.bf16.msra.mxu0 %v4650_v0  ;;  %v3653_v0 = vld [vmem:[%s6409_s4 + $0xf0] sm:$0xff] }
 0x6a6   : > { %4655 = vmatprep.subr.bf16.mxu0 %v4654_v10 }
 0x6a9   : > { %4657 = vmatpush3.bf16.msra.mxu0 %v4654_v10  ;;  %v3655_v10 = vld [vmem:[%s6409_s4 + $0x100] sm:$0xff] }
 0x714   : > { %v6017_v7 = vpop.f32.mrb[48].mxu1 }
 0x715   : > { %v6019_v13 = vpop.f32.mrb[49].mxu1 }
 0x718   : > { %v6021_v25 = vpop.f32.mrb[50].mxu1 }
 0x719   : > { %v6023_v40 = vpop.f32.mrb[51].mxu1 }
 0x71c   : > { %v6025_v34 = vpop.f32.mrb[52].mxu1 }
 0x71d   : > { %v6027_v18 = vpop.f32.mrb[53].mxu1 }
 0x720   : > { %v6029_v15 = vpop.f32.mrb[54].mxu1 }
 0x721   : > { %v6031_v4 = vpop.f32.mrb[55].mxu1 }
 0x724   : > { %v6033_v54 = vpop.f32.mrb[56].mxu1 }
 0x725   : > { %v6035_v39 = vpop.f32.mrb[57].mxu1 }
 0x728   : > { %v6037_v37 = vpop.f32.mrb[58].mxu1 }
 0x729   : > { %v6039_v30 = vpop.f32.mrb[59].mxu1 }
 0x72c   : > { %v6041_v44 = vpop.f32.mrb[60].mxu1 }
 0x72d   : > { %v6043_v12 = vpop.f32.mrb[61].mxu1 }
 0x730   : > { %v6045_v43 = vpop.f32.mrb[62].mxu1 }
 0x731   : > { %v6053_v32 = vpop.f32.mrb[63].mxu1 }
 0x734   : > { %v4350_v26 = vpop.f32.mrb[64].mxu1 }
 0x735   : > { %2660 = vrot.lane.b32.xlu1 %v4350_v26, %s4797_s27  ;;  %v2483_v17 = vpop.f32.mrb[65].mxu1 }
 0x736   : > { %2658 = vrot.lane.b32.xlu0 %v2483_v17, %s4797_s27  ;;  %v3654_v17 = vld [vmem:[%s6409_s4 + $0xf8] sm:$0xff] }
 0x737   : > { %v4658_v26 = vpack.c.bf16 %v3654_v17, %v3653_v0  ;;  %v3657_v0 = vld [vmem:[%s6409_s4 + $0x110] sm:$0xff]  ;;  %v3658_v17 = vld [vmem:[%s6409_s4 + $0x118] sm:$0xff] }
 0x738   : > { %v4353_v61 = vpop.f32.mrb[66].mxu1 }
 0x739   : > { %2664 = vrot.lane.b32.xlu1 %v4353_v61, %s4797_s27  ;;  %v2493_v50 = vpop.f32.mrb[67].mxu1  ;;  %4659 = vmatprep.subr.bf16.mxu0 %v4658_v26 }
 0x73a   : > { %2662 = vrot.lane.b32.xlu0 %v2493_v50, %s4797_s27  ;;  %4661 = vmatpush3.bf16.msra.mxu0 %v4658_v26  ;;  %v4662_v50 = vpack.c.bf16 %v3656_v16, %v3655_v10  ;;  %v4666_v26 = vpack.c.bf16 %v3658_v17, %v3657_v0 }
 0x73c   : > { %v4356_v48 = vpop.f32.mrb[68].mxu1  ;;  %4663 = vmatprep.subr.bf16.mxu0 %v4662_v50 }
 0x73d   : > { %2668 = vrot.lane.b32.xlu1 %v4356_v48, %s4797_s27  ;;  %v2503_v42 = vpop.f32.mrb[69].mxu1 }
 0x73e   : > { %2666 = vrot.lane.b32.xlu0 %v2503_v42, %s4797_s27  ;;  %4665 = vmatpush3.bf16.msra.mxu0 %v4662_v50 }
 0x73f   : > { %4667 = vmatprep.subr.bf16.mxu0 %v4666_v26 }
 0x740   : > { %v4359_v61 = vpop.f32.mrb[70].mxu1 }
 0x741   : > { %2672 = vrot.lane.b32.xlu1 %v4359_v61, %s4797_s27  ;;  %v2513_v59 = vpop.f32.mrb[71].mxu1 }
 0x742   : > { %2670 = vrot.lane.b32.xlu0 %v2513_v59, %s4797_s27  ;;  %4669 = vmatpush3.bf16.msra.mxu0 %v4666_v26 }
 0x744   : > { %v4362_v48 = vpop.f32.mrb[72].mxu1 }
 0x745   : > { %2676 = vrot.lane.b32.xlu1 %v4362_v48, %s4797_s27  ;;  %v2523_v42 = vpop.f32.mrb[73].mxu1 }
 0x746   : > { %2674 = vrot.lane.b32.xlu0 %v2523_v42, %s4797_s27 }
 0x748   : > { %v4365_v61 = vpop.f32.mrb[74].mxu1 }
 0x749   : > { %2680 = vrot.lane.b32.xlu1 %v4365_v61, %s4797_s27  ;;  %v2533_v10 = vpop.f32.mrb[75].mxu1 }
 0x74a   : > { %2678 = vrot.lane.b32.xlu0 %v2533_v10, %s4797_s27 }
 0x74c   : > { %v4368_v16 = vpop.f32.mrb[76].mxu1 }
 0x74d   : > { %2684 = vrot.lane.b32.xlu1 %v4368_v16, %s4797_s27  ;;  %v2543_v59 = vpop.f32.mrb[77].mxu1 }
 0x74e   : > { %2682 = vrot.lane.b32.xlu0 %v2543_v59, %s4797_s27 }
 0x750   : > { %v4371_v50 = vpop.f32.mrb[78].mxu1 }
 0x751   : > { %2688 = vrot.lane.b32.xlu1 %v4371_v50, %s4797_s27  ;;  %v2553_v48 = vpop.f32.mrb[79].mxu1 }
 0x752   : > { %2686 = vrot.lane.b32.xlu0 %v2553_v48, %s4797_s27  ;;  %s4805_s27 = smov 112  }
 0x754   : > { %v4374_v0 = vpop.f32.mrb[80].mxu1 }
 0x755   : > { %2724 = vrot.lane.b32.xlu1 %v4374_v0, %s4798_s17  ;;  %v2563_v17 = vpop.f32.mrb[81].mxu1 }
 0x756   : > { %2722 = vrot.lane.b32.xlu0 %v2563_v17, %s4798_s17 }
 0x758   : > { %v4377_v42 = vpop.f32.mrb[82].mxu1 }
 0x759   : > { %2728 = vrot.lane.b32.xlu1 %v4377_v42, %s4798_s17  ;;  %v2573_v26 = vpop.f32.mrb[83].mxu1 }
 0x75a   : > { %2726 = vrot.lane.b32.xlu0 %v2573_v26, %s4798_s17 }
 0x75c   : > { %v4380_v61 = vpop.f32.mrb[84].mxu1 }
 0x75d   : > { %2732 = vrot.lane.b32.xlu1 %v4380_v61, %s4798_s17  ;;  %v2583_v10 = vpop.f32.mrb[85].mxu1 }
 0x75e   : > { %2730 = vrot.lane.b32.xlu0 %v2583_v10, %s4798_s17 }
 0x760   : > { %v4383_v16 = vpop.f32.mrb[86].mxu1 }
 0x761   : > { %2736 = vrot.lane.b32.xlu1 %v4383_v16, %s4798_s17  ;;  %v2593_v59 = vpop.f32.mrb[87].mxu1 }
 0x762   : > { %2734 = vrot.lane.b32.xlu0 %v2593_v59, %s4798_s17 }
 0x764   : > { %v4386_v50 = vpop.f32.mrb[88].mxu1 }
 0x765   : > { %2740 = vrot.lane.b32.xlu1 %v4386_v50, %s4798_s17  ;;  %v2603_v48 = vpop.f32.mrb[89].mxu1 }
 0x766   : > { %2738 = vrot.lane.b32.xlu0 %v2603_v48, %s4798_s17 }
 0x768   : > { %v4389_v0 = vpop.f32.mrb[90].mxu1 }
 0x769   : > { %2744 = vrot.lane.b32.xlu1 %v4389_v0, %s4798_s17  ;;  %v2613_v17 = vpop.f32.mrb[91].mxu1 }
 0x76a   : > { %2742 = vrot.lane.b32.xlu0 %v2613_v17, %s4798_s17 }
 0x76c   : > { %v4392_v42 = vpop.f32.mrb[92].mxu1 }
 0x76d   : > { %2748 = vrot.lane.b32.xlu1 %v4392_v42, %s4798_s17  ;;  %v2623_v26 = vpop.f32.mrb[93].mxu1 }
 0x76e   : > { %2746 = vrot.lane.b32.xlu0 %v2623_v26, %s4798_s17 }
 0x770   : > { %v4395_v61 = vpop.f32.mrb[94].mxu1 }
 0x771   : > { %2752 = vrot.lane.b32.xlu1 %v4395_v61, %s4798_s17  ;;  %v2633_v10 = vpop.f32.mrb[95].mxu1 }
 0x772   : > { %2750 = vrot.lane.b32.xlu0 %v2633_v10, %s4798_s17 }
 0x7a7   : > { %v2661_v16 = vpop.permute.xlu1 %2660 }
 0x7a8   : > { %v2659_v59 = vpop.permute.xlu0 %2658  ;;  %v2771_v52 = vsel %vm909_vm0, %v6017_v7, %v2661_v16 }
 0x7a9   : > { %v2770_v10 = vsel %vm909_vm0, %v6019_v13, %v2659_v59 }
 0x7ab   : > { %v2665_v50 = vpop.permute.xlu1 %2664 }
 0x7ac   : > { %v2663_v48 = vpop.permute.xlu0 %2662  ;;  %v2773_v13 = vsel %vm909_vm0, %v6021_v25, %v2665_v50 }
 0x7ad   : > { %v2772_v3 = vsel %vm909_vm0, %v6023_v40, %v2663_v48 }
 0x7af   : > { %v2669_v0 = vpop.permute.xlu1 %2668 }
 0x7b0   : > { %v2667_v11 = vpop.permute.xlu0 %2666 }
 0x7b3   : > { %v2673_v8 = vpop.permute.xlu1 %2672 }
 0x7b4   : > { %v2671_v17 = vpop.permute.xlu0 %2670 }
 0x7b7   : > { %v2677_v35 = vpop.permute.xlu1 %2676 }
 0x7b8   : > { %v2675_v33 = vpop.permute.xlu0 %2674 }
 0x7b9   : > { %v2778_v50 = vsel %vm909_vm0, %v6035_v39, %v2675_v33 }
 0x7bb   : > { %v2681_v42 = vpop.permute.xlu1 %2680 }
 0x7bc   : > { %v2679_v6 = vpop.permute.xlu0 %2678  ;;  %v2781_v33 = vsel %vm909_vm0, %v6037_v37, %v2681_v42 }
 0x7bf   : > { %v2685_v23 = vpop.permute.xlu1 %2684 }
 0x7c0   : > { %v2683_v26 = vpop.permute.xlu0 %2682 }
 0x7c3   : > { %v2689_v19 = vpop.permute.xlu1 %2688 }
 0x7c4   : > { %v2687_v5 = vpop.permute.xlu0 %2686 }
 0x7c7   : > { %v2725_v61 = vpop.permute.xlu1 %2724 }
 0x7c8   : > { %v2723_v53 = vpop.permute.xlu0 %2722  ;;  %v2787_v38 = vsel %vm926_vm1, %v2771_v52, %v2725_v61 }
 0x7c9   : > { %v2786_v51 = vsel %vm926_vm1, %v2770_v10, %v2723_v53  ;;  %v2775_v53 = vsel %vm909_vm0, %v6025_v34, %v2669_v0  ;;  %v2782_v10 = vsel %vm909_vm0, %v6043_v12, %v2683_v26  ;;  %v2785_v12 = vsel %vm909_vm0, %v6045_v43, %v2689_v19 }
 0x7ca   : > { %4420 = vmatprep.mubr.msk.f32.mxu0 %vm955_vm2, %v2786_v51 }
 0x7cb   : > { %4421 = vmatmul.mubr.msk.f32.vlgmr.msra.gmra.mrb[80].mxu0 %vm955_vm2, %v2787_v38  ;;  %v2729_v1 = vpop.permute.xlu1 %2728  ;;  %v2774_v38 = vsel %vm909_vm0, %v6027_v18, %v2667_v11  ;;  %v2777_v11 = vsel %vm909_vm0, %v6029_v15, %v2673_v8 }
 0x7cc   : > { %v2727_v47 = vpop.permute.xlu0 %2726  ;;  %v2789_v7 = vsel %vm926_vm1, %v2773_v13, %v2729_v1 }
 0x7cd   : > { %v2788_v59 = vsel %vm926_vm1, %v2772_v3, %v2727_v47  ;;  %v2776_v3 = vsel %vm909_vm0, %v6031_v4, %v2671_v17  ;;  %v2779_v4 = vsel %vm909_vm0, %v6033_v54, %v2677_v35  ;;  %v2780_v17 = vsel %vm909_vm0, %v6039_v30, %v2679_v6 }
 0x7ce   : > { %4423 = vmatprep.mubr.msk.f32.mxu0 %vm955_vm2, %v2788_v59  ;;  %v2783_v6 = vsel %vm909_vm0, %v6041_v44, %v2685_v23  ;;  %v2784_v59 = vsel %vm909_vm0, %v6053_v32, %v2687_v5  ;;  %v6184_v44 = vld [vmem:[%s6410_s5 + $0x2] ss:$0 sm:$0xff] }
 0x7cf   : > { %4424 = vmatmul.mubr.msk.f32.gmra.mrb[82].mxu0 %vm955_vm2, %v2789_v7  ;;  %v2733_v52 = vpop.permute.xlu1 %2732  ;;  %3144 = vrot.lane.b32.xlu0 %v6184_v44, %s4801_s24 }
 0x7d0   : > { %v2731_v51 = vpop.permute.xlu0 %2730  ;;  %v2791_v25 = vsel %vm926_vm1, %v2775_v53, %v2733_v52  ;;  %v4802_v53 = vmov 0.0|0.0  }
 0x7d1   : > { %v2790_v40 = vsel %vm926_vm1, %v2774_v38, %v2731_v51  ;;  %4670 = vmatprep.subr.bf16.mxu1 %v4802_v53  ;;  %4694 = vmatprep.subr.bf16.mxu0 %v4802_v53 }
 0x7d2   : > { %4426 = vmatprep.mubr.msk.f32.mxu0 %vm955_vm2, %v2790_v40 }
 0x7d3   : > { %4427 = vmatmul.mubr.msk.f32.gmra.mrb[84].mxu0 %vm955_vm2, %v2791_v25  ;;  %v2737_v47 = vpop.permute.xlu1 %2736 }
 0x7d4   : > { %v2735_v1 = vpop.permute.xlu0 %2734  ;;  %v2793_v34 = vsel %vm926_vm1, %v2777_v11, %v2737_v47 }
 0x7d5   : > { %v2792_v18 = vsel %vm926_vm1, %v2776_v3, %v2735_v1 }
 0x7d6   : > { %4429 = vmatprep.mubr.msk.f32.mxu0 %vm955_vm2, %v2792_v18 }
 0x7d7   : > { %4430 = vmatmul.mubr.msk.f32.gmra.mrb[86].mxu0 %vm955_vm2, %v2793_v34  ;;  %v2741_v16 = vpop.permute.xlu1 %2740 }
 0x7d8   : > { %v2739_v48 = vpop.permute.xlu0 %2738  ;;  %v2795_v8 = vsel %vm926_vm1, %v2779_v4, %v2741_v16 }
 0x7d9   : > { %v2794_v0 = vsel %vm926_vm1, %v2778_v50, %v2739_v48 }
 0x7da   : > { %4432 = vmatprep.mubr.msk.f32.mxu0 %vm955_vm2, %v2794_v0 }
 0x7db   : > { %4433 = vmatmul.mubr.msk.f32.gmra.mrb[88].mxu0 %vm955_vm2, %v2795_v8  ;;  %v2745_v15 = vpop.permute.xlu1 %2744 }
 0x7dc   : > { %v2743_v61 = vpop.permute.xlu0 %2742  ;;  %v2797_v35 = vsel %vm926_vm1, %v2781_v33, %v2745_v15  ;;  %v3270_v15 = vld [vmem:[%s6411_s6 + $0x18] sm:$0xff] }
 0x7dd   : > { %v2796_v39 = vsel %vm926_vm1, %v2780_v17, %v2743_v61 }
 0x7de   : > { %4435 = vmatprep.mubr.msk.f32.mxu0 %vm955_vm2, %v2796_v39 }
 0x7df   : > { %4436 = vmatmul.mubr.msk.f32.gmra.mrb[90].mxu0 %vm955_vm2, %v2797_v35  ;;  %v2749_v54 = vpop.permute.xlu1 %2748 }
 0x7e0   : > { %v2747_v13 = vpop.permute.xlu0 %2746  ;;  %v2799_v37 = vsel %vm926_vm1, %v2783_v6, %v2749_v54 }
 0x7e1   : > { %v2798_v30 = vsel %vm926_vm1, %v2782_v10, %v2747_v13 }
 0x7e2   : > { %4438 = vmatprep.mubr.msk.f32.mxu0 %vm955_vm2, %v2798_v30 }
 0x7e3   : > { %4439 = vmatmul.mubr.msk.f32.gmra.mrb[92].mxu0 %vm955_vm2, %v2799_v37  ;;  %v2753_v42 = vpop.permute.xlu1 %2752 }
 0x7e4   : > { %v2751_v7 = vpop.permute.xlu0 %2750  ;;  %v2801_v23 = vsel %vm926_vm1, %v2785_v12, %v2753_v42 }
 0x7e5   : > { %v2800_v26 = vsel %vm926_vm1, %v2784_v59, %v2751_v7 }
 0x7e6   : > { %4441 = vmatprep.mubr.msk.f32.mxu0 %vm955_vm2, %v2800_v26 }
 0x7e7   : > { %4442 = vmatmul.mubr.msk.f32.gmra.mrb[94].mxu0 %vm955_vm2, %v2801_v23 }
 0x841   : > { %v6288_v61 = vpop.permute.xlu0 %3144 }
 0x89e   : > { %v6188_v5 = vpop.f32.mrb[80].mxu0 }
 0x89f   : > { %v3009_v19 = vmul.f32 %v6188_v5, %v5152_v55  ;;  %v6192_v32 = vpop.f32.mrb[81].mxu0 }
 0x8a0   : > { %v3008_v43 = vmul.f32 %v6192_v32, %v5150_v22 }
 0x8a1   : > { %3042 = vrot.lane.b32.xlu1 %v3009_v19, %s4801_s24 }
 0x8a2   : > { %v6197_v52 = vpop.f32.mrb[82].mxu0  ;;  %3040 = vrot.lane.b32.xlu0 %v3008_v43, %s4801_s24 }
 0x8a3   : > { %v3011_v38 = vmul.f32 %v6197_v52, %v5154_v28  ;;  %v6202_v51 = vpop.f32.mrb[83].mxu0 }
 0x8a4   : > { %v3010_v55 = vmul.f32 %v6202_v51, %v5156_v56 }
 0x8a5   : > { %3046 = vrot.lane.b32.xlu1 %v3011_v38, %s4801_s24 }
 0x8a6   : > { %v6209_v22 = vpop.f32.mrb[84].mxu0  ;;  %3044 = vrot.lane.b32.xlu0 %v3010_v55, %s4801_s24 }
 0x8a7   : > { %v3013_v40 = vmul.f32 %v6209_v22, %v5160_v58  ;;  %v6214_v28 = vpop.f32.mrb[85].mxu0 }
 0x8a8   : > { %v3012_v25 = vmul.f32 %v6214_v28, %v5166_v60 }
 0x8aa   : > { %v6218_v47 = vpop.f32.mrb[86].mxu0  ;;  %3048 = vrot.lane.b32.xlu1 %v3012_v25, %s4801_s24  ;;  %3050 = vrot.lane.b32.xlu0 %v3013_v40, %s4801_s24 }
 0x8ab   : > { %v3015_v56 = vmul.f32 %v6218_v47, %v5171_v62  ;;  %v6224_v3 = vpop.f32.mrb[87].mxu0 }
 0x8ac   : > { %v3014_v1 = vmul.f32 %v6224_v3, %v5176_v2 }
 0x8ae   : > { %v6228_v58 = vpop.f32.mrb[88].mxu0  ;;  %3052 = vrot.lane.b32.xlu1 %v3014_v1, %s4801_s24  ;;  %3054 = vrot.lane.b32.xlu0 %v3015_v56, %s4801_s24 }
 0x8af   : > { %v3017_v60 = vmul.f32 %v6228_v58, %v5192_v9  ;;  %v6234_v11 = vpop.f32.mrb[89].mxu0 }
 0x8b0   : > { %v3016_v18 = vmul.f32 %v6234_v11, %v5196_v24 }
 0x8b2   : > { %v6238_v62 = vpop.f32.mrb[90].mxu0  ;;  %3056 = vrot.lane.b32.xlu1 %v3016_v18, %s4801_s24  ;;  %3058 = vrot.lane.b32.xlu0 %v3017_v60, %s4801_s24 }
 0x8b3   : > { %v3019_v2 = vmul.f32 %v6238_v62, %v5208_v29  ;;  %v6244_v34 = vpop.f32.mrb[91].mxu0 }
 0x8b4   : > { %v3018_v16 = vmul.f32 %v6244_v34, %v5214_v31 }
 0x8b6   : > { %v6248_v9 = vpop.f32.mrb[92].mxu0  ;;  %3060 = vrot.lane.b32.xlu1 %v3018_v16, %s4801_s24  ;;  %3062 = vrot.lane.b32.xlu0 %v3019_v2, %s4801_s24  ;;  %v6674_v16 = vld [vmem:[#allocation4_spill] sm:$0xff] }
 0x8b7   : > { %v3021_v24 = vmul.f32 %v6248_v9, %v5230_v36  ;;  %v6254_v50 = vpop.f32.mrb[93].mxu0  ;;  %v4804_v36 = vmov 0.0  }
 0x8b8   : > { %v3020_v48 = vmul.f32 %v6254_v50, %v5234_v14  ;;  %4476 = vmatprep.mubr.msk.f32.mxu1 %vm4803_vm3, %v4804_v36  ;;  %4487 = vmatprep.mubr.msk.f32.mxu0 %vm4803_vm3, %v4804_v36  ;;  %v3267_v14 = vld [vmem:[%s6411_s6] sm:$0xff] }
 0x8ba   : > { %3064 = vrot.lane.b32.xlu1 %v3020_v48, %s4801_s24  ;;  %3066 = vrot.lane.b32.xlu0 %v3021_v24, %s4801_s24  ;;  %v6260_v29 = vpop.f32.mrb[94].mxu0  ;;  %v6675_v24 = vld [vmem:[#allocation2_spill] sm:$0xff] }
 0x8bb   : > { %v3023_v31 = vmul.f32 %v6260_v29, %v5246_v41  ;;  %v6264_v4 = vpop.f32.mrb[95].mxu0  ;;  %v3268_v41 = vld [vmem:[%s6411_s6 + $0x8] sm:$0xff] }
 0x8bc   : > { %v3022_v0 = vmul.f32 %v6264_v4, %v6588_v27  ;;  %v3269_v27 = vld [vmem:[%s6411_s6 + $0x10] sm:$0xff]  ;;  %v4695_v8 = vpack.c.bf16 %v3268_v41, %v3267_v14 }
 0x8bd   : > { %v4698_v17 = vpack.c.bf16 %v3270_v15, %v3269_v27 }
 0x8be   : > { %3070 = vrot.lane.b32.xlu0 %v3023_v31, %s4801_s24  ;;  %3068 = vrot.lane.b32.xlu1 %v3022_v0, %s4801_s24  ;;  %v6676_v0 = vld [vmem:[#allocation3_spill] sm:$0xff] }
 0x8bf   : > { %4696 = vmatpush3.bf16.msra.mxu0 %v4695_v8 }
 0x8c0   : > { %4697 = vmatprep.subr.bf16.mxu0 %v4802_v53 }
 0x8c3   : > { %4699 = vmatpush3.bf16.msra.mxu0 %v4698_v17 }
 0x8c4   : > { %4497 = vmatprep.subr.mxu0 %v4804_v36 }
 0x913   : > { %v3043_v33 = vpop.permute.xlu1 %3042 }
 0x914   : > { %v3089_v39 = vadd.f32 %v6188_v5, %v3043_v33  ;;  %v3041_v35 = vpop.permute.xlu0 %3040 }
 0x915   : > { %v3088_v54 = vadd.f32 %v3041_v35, %v6192_v32 }
 0x916   : > { %v3113_v10 = vadd.f32 %v6184_v44, %v3089_v39  ;;  %v6677_v39 = vld [vmem:[#allocation5_spill] sm:$0xff] }
 0x917   : > { %v3112_v13 = vadd.f32 %v6184_v44, %v3088_v54  ;;  %v3047_v6 = vpop.permute.xlu1 %3046  ;;  %v6678_v54 = vld [vmem:[#allocation7_spill] sm:$0xff] }
 0x918   : > { %v3129_v30 = vmul.f32 %v3113_v10, %v6589_v63  ;;  %v3091_v37 = vadd.f32 %v6197_v52, %v3047_v6  ;;  %v3045_v42 = vpop.permute.xlu0 %3044 }
 0x919   : > { %v3128_v59 = vmul.f32 %v3112_v13, %v5262_v45  ;;  %v3090_v7 = vadd.f32 %v3045_v42, %v6202_v51  ;;  %v6680_v42 = vld [vmem:[#allocation16_spill] sm:$0xff] }
 0x91a   : > { %v3148_v12 = vadd.f32 %v6288_v61, %v3129_v30  ;;  %v3115_v26 = vadd.f32 %v6184_v44, %v3091_v37  ;;  %v6679_v30 = vld [vmem:[#allocation15_spill] sm:$0xff] }
 0x91b   : > { %v3147_v23 = vadd.f32 %v6288_v61, %v3128_v59  ;;  %v3114_v5 = vadd.f32 %v6184_v44, %v3090_v7 }
 0x91c   : > { %v3164_v19 = vmax.f32 %v3148_v12, 0.0  ;;  %v3131_v32 = vmul.f32 %v3115_v26, %v5266_v46  ;;  %v3049_v43 = vpop.permute.xlu1 %3048  ;;  %v3051_v63 = vpop.permute.xlu0 %3050 }
 0x91d   : > { %v3163_v38 = vmax.f32 %v3147_v23, 0.0  ;;  %v3130_v52 = vmul.f32 %v3114_v5, %v5268_v21  ;;  %v3092_v45 = vadd.f32 %v3049_v43, %v6214_v28  ;;  %v3093_v51 = vadd.f32 %v6209_v22, %v3051_v63 }
 0x91e   : > { %v3180_v55 = vadd.f32 %v3164_v19, %v5860_v57  ;;  %v3150_v40 = vadd.f32 %v6288_v61, %v3131_v32  ;;  %v6681_v32 = vld [vmem:[#allocation6_spill] sm:$0xff] }
 0x91f   : > { %v3179_v25 = vadd.f32 %v3163_v38, %v5866_v20  ;;  %v3149_v56 = vadd.f32 %v6288_v61, %v3130_v52  ;;  %v3116_v1 = vadd.f32 %v6184_v44, %v3092_v45  ;;  %v3117_v46 = vadd.f32 %v6184_v44, %v3093_v51  ;;  %v6682_v52 = vld [vmem:[#allocation9_spill] sm:$0xff] }
 0x920   : > { %v3166_v60 = vmax.f32 %v3150_v40, 0.0  ;;  %v3053_v18 = vpop.permute.xlu1 %3052  ;;  %v3055_v2 = vpop.permute.xlu0 %3054 }
 0x921   : > { %v3165_v21 = vmax.f32 %v3149_v56, 0.0  ;;  %v3132_v28 = vmul.f32 %v3116_v1, %v5272_v49  ;;  %v3133_v22 = vmul.f32 %v3117_v46, %v6674_v16  ;;  %v3094_v57 = vadd.f32 %v3053_v18, %v6224_v3  ;;  %v6684_v46 = vld [vmem:[#allocation18_spill] sm:$0xff]  ;;  %v6686_v16 = vld [vmem:[#allocation11_spill] sm:$0xff] }
 0x922   : > { %v3182_v48 = vadd.f32 %v3166_v60, %v6675_v24  ;;  %v3095_v20 = vadd.f32 %v6218_v47, %v3055_v2  ;;  %v4671_v31 = vpack.c.bf16 %v3180_v55, %v3179_v25  ;;  %v6683_v55 = vld [vmem:[#allocation17_spill] sm:$0xff] }
 0x923   : > { %v3181_v14 = vadd.f32 %v3165_v21, %v6676_v0  ;;  %v3151_v41 = vadd.f32 %v6288_v61, %v3132_v28  ;;  %v3152_v27 = vadd.f32 %v6288_v61, %v3133_v22  ;;  %v3118_v8 = vadd.f32 %v6184_v44, %v3094_v57  ;;  %v6685_v21 = vld [vmem:[#allocation8_spill] sm:$0xff] }
 0x924   : > { %v3119_v15 = vadd.f32 %v6184_v44, %v3095_v20  ;;  %4672 = vmatpush3.bf16.msra.mxu1 %v4671_v31  ;;  %v3057_v49 = vpop.permute.xlu1 %3056  ;;  %v3059_v17 = vpop.permute.xlu0 %3058  ;;  %v6687_v31 = vld [vmem:[#allocation19_spill] sm:$0xff] }
 0x925   : > { %v3167_v33 = vmax.f32 %v3151_v41, 0.0  ;;  %v3168_v3 = vmax.f32 %v3152_v27, 0.0  ;;  %v3134_v35 = vmul.f32 %v3118_v8, %v6677_v39  ;;  %v3096_v47 = vadd.f32 %v3057_v49, %v6234_v11  ;;  %4673 = vmatprep.subr.bf16.mxu1 %v4802_v53  ;;  %v6688_v8 = vld [vmem:[#allocation20_spill] sm:$0xff]  ;;  %v6689_v39 = vld [vmem:[#allocation10_spill] sm:$0xff] }
 0x926   : > { %v3135_v10 = vmul.f32 %v3119_v15, %v6678_v54  ;;  %v3097_v13 = vadd.f32 %v6228_v58, %v3059_v17  ;;  %v4674_v6 = vpack.c.bf16 %v3182_v48, %v3181_v14 }
 0x927   : > { %v3183_v37 = vadd.f32 %v3167_v33, %v6679_v30  ;;  %v3184_v59 = vadd.f32 %v3168_v3, %v6680_v42  ;;  %v3153_v7 = vadd.f32 %v6288_v61, %v3134_v35  ;;  %v3120_v12 = vadd.f32 %v6184_v44, %v3096_v47  ;;  %v6690_v47 = vld [vmem:[#allocation13_spill] sm:$0xff] }
 0x928   : > { %v3154_v26 = vadd.f32 %v6288_v61, %v3135_v10  ;;  %v3121_v23 = vadd.f32 %v6184_v44, %v3097_v13  ;;  %4675 = vmatpush3.bf16.msra.mxu1 %v4674_v6  ;;  %v3061_v11 = vpop.permute.xlu1 %3060  ;;  %v3063_v5 = vpop.permute.xlu0 %3062  ;;  %v6691_v6 = vld [vmem:[#allocation21_spill] sm:$0xff] }
 0x929   : > { %v3169_v19 = vmax.f32 %v3153_v7, 0.0  ;;  %v3136_v43 = vmul.f32 %v3120_v12, %v6681_v32  ;;  %v3098_v58 = vadd.f32 %v3061_v11, %v6244_v34  ;;  %v3099_v63 = vadd.f32 %v6238_v62, %v3063_v5  ;;  %4676 = vmatprep.subr.bf16.mxu1 %v4802_v53 }
 0x92a   : > { %v3170_v38 = vmax.f32 %v3154_v26, 0.0  ;;  %v3137_v45 = vmul.f32 %v3121_v23, %v6682_v52  ;;  %v4677_v51 = vpack.c.bf16 %v3184_v59, %v3183_v37  ;;  %v6692_v37 = vld [vmem:[#allocation22_spill] sm:$0xff]  ;;  %v6693_v23 = vld [vmem:[#allocation12_spill] sm:$0xff] }
 0x92b   : > { %v3185_v40 = vadd.f32 %v3169_v19, %v6683_v55  ;;  %v3155_v25 = vadd.f32 %v6288_v61, %v3136_v43  ;;  %v3122_v56 = vadd.f32 %v6184_v44, %v3098_v58  ;;  %v3123_v1 = vadd.f32 %v6184_v44, %v3099_v63  ;;  %v6694_v19 = vld [vmem:[#allocation14_spill] sm:$0xff]  ;;  %v6695_v43 = vld [vmem:[#allocation23_spill] sm:$0xff] }
 0x92c   : > { %v3186_v60 = vadd.f32 %v3170_v38, %v6684_v46  ;;  %v3156_v34 = vadd.f32 %v6288_v61, %v3137_v45  ;;  %4678 = vmatpush3.bf16.msra.mxu1 %v4677_v51  ;;  %v3065_v62 = vpop.permute.xlu1 %3064  ;;  %v3067_v18 = vpop.permute.xlu0 %3066  ;;  %v6696_v38 = vld [vmem:[#allocation24_spill] sm:$0xff] }
 0x92d   : > { %v3171_v2 = vmax.f32 %v3155_v25, 0.0  ;;  %v3138_v28 = vmul.f32 %v3122_v56, %v6685_v21  ;;  %v3139_v22 = vmul.f32 %v3123_v1, %v6686_v16  ;;  %v3100_v57 = vadd.f32 %v3065_v62, %v6254_v50  ;;  %4679 = vmatprep.subr.bf16.mxu1 %v4802_v53  ;;  %v6698_v56 = vld [vmem:[#allocation26_spill] sm:$0xff] }
 0x92e   : > { %v3172_v24 = vmax.f32 %v3156_v34, 0.0  ;;  %v3101_v48 = vadd.f32 %v6248_v9, %v3067_v18  ;;  %v4680_v20 = vpack.c.bf16 %v3186_v60, %v3185_v40  ;;  %v6697_v40 = vld [vmem:[#allocation25_spill] sm:$0xff]  ;;  %v3195_v60 = vld [vmem:[%s6408_s3] sm:$0xff]  ;;  %v3272_v62 = vlaneseq }
 0x92f   : > { %v3187_v0 = vadd.f32 %v3171_v2, %v6687_v31  ;;  %v3157_v14 = vadd.f32 %v6288_v61, %v3138_v28  ;;  %v3158_v41 = vadd.f32 %v6288_v61, %v3139_v22  ;;  %v3124_v27 = vadd.f32 %v6184_v44, %v3100_v57  ;;  %v3351_v2 = vld [vmem:[%s6412_s7] sm:$0xff] }
 0x930   : > { %v3188_v15 = vadd.f32 %v3172_v24, %v6688_v8  ;;  %v3125_v49 = vadd.f32 %v6184_v44, %v3101_v48  ;;  %4681 = vmatpush3.bf16.msra.mxu1 %v4680_v20  ;;  %v3069_v50 = vpop.permute.xlu1 %3068  ;;  %v3071_v17 = vpop.permute.xlu0 %3070  ;;  %v3273_v18 = vshrl.u32 %v3272_v62, 7  ;;  %v3266_v16 = vld [vmem:[%s6414_s9] sm:$0x1]  ;;  %v4806_v20 = vmov 24  }
 0x931   : > { %v3173_v33 = vmax.f32 %v3157_v14, 0.0  ;;  %v3174_v3 = vmax.f32 %v3158_v41, 0.0  ;;  %v3140_v9 = vmul.f32 %v3124_v27, %v6689_v39  ;;  %v3102_v35 = vadd.f32 %v3069_v50, %v6264_v4  ;;  %4682 = vmatprep.subr.bf16.mxu1 %v4802_v53  ;;  %4726 = vset.pattern.permute.xlu0 %v4806_v20  ;;  %v3431_v8 = vld [vmem:[%s6413_s8] sm:$0x1] }
 0x932   : > { %v3141_v54 = vmul.f32 %v3125_v49, %v6690_v47  ;;  %v3103_v10 = vadd.f32 %v6260_v29, %v3071_v17  ;;  %v4683_v13 = vpack.c.bf16 %v3188_v15, %v3187_v0  ;;  %v3274_v21 = vsub.s32 0, %v3273_v18  ;;  %3433 = vperm.xlu0 %4726, %v3266_v16  }
 0x933   : > { %v3189_v30 = vadd.f32 %v3173_v33, %v6691_v6  ;;  %v3190_v42 = vadd.f32 %v3174_v3, %v6692_v37  ;;  %v3159_v59 = vadd.f32 %v6288_v61, %v3140_v9  ;;  %v3126_v7 = vadd.f32 %v6184_v44, %v3102_v35 }
 0x934   : > { %v3160_v12 = vadd.f32 %v6288_v61, %v3141_v54  ;;  %v3127_v26 = vadd.f32 %v6184_v44, %v3103_v10  ;;  %4684 = vmatpush3.bf16.msra.mxu1 %v4683_v13  ;;  %v3275_v22 = vrot.slane %v3266_v16, %v3274_v21 }
 0x935   : > { %v3175_v4 = vmax.f32 %v3159_v59, 0.0  ;;  %v3142_v11 = vmul.f32 %v3126_v7, %v6693_v23  ;;  %4685 = vmatprep.subr.bf16.mxu1 %v4802_v53  ;;  %v4686_v29 = vpack.c.bf16 %v3190_v42, %v3189_v30 }
 0x936   : > { %v3176_v5 = vmax.f32 %v3160_v12, 0.0  ;;  %v3143_v32 = vmul.f32 %v3127_v26, %v6694_v19  ;;  %3353 = vrot.lane.b32.xlu1 %v3275_v22, %s4805_s27 }
 0x937   : > { %v3191_v58 = vadd.f32 %v3175_v4, %v6695_v43  ;;  %v3161_v63 = vadd.f32 %v6288_v61, %v3142_v11 }
 0x938   : > { %v3192_v52 = vadd.f32 %v3176_v5, %v6696_v38  ;;  %v3162_v45 = vadd.f32 %v6288_v61, %v3143_v32  ;;  %4687 = vmatpush3.bf16.msra.mxu1 %v4686_v29 }
 0x939   : > { %v3177_v44 = vmax.f32 %v3161_v63, 0.0  ;;  %4688 = vmatprep.subr.bf16.mxu1 %v4802_v53 }
 0x93a   : > { %v3178_v51 = vmax.f32 %v3162_v45, 0.0  ;;  %v4689_v55 = vpack.c.bf16 %v3192_v52, %v3191_v58 }
 0x93b   : > { %v3193_v25 = vadd.f32 %v3177_v44, %v6697_v40 }
 0x93c   : > { %v3194_v1 = vadd.f32 %v3178_v51, %v6698_v56  ;;  %4690 = vmatpush3.bf16.msra.mxu1 %v4689_v55 }
 0x93d   : > { %4691 = vmatprep.subr.bf16.mxu1 %v4802_v53 }
 0x93e   : > { %v4692_v46 = vpack.c.bf16 %v3194_v1, %v3193_v25 }
 0x940   : > { %4693 = vmatpush3.bf16.msra.mxu1 %v4692_v46 }
 0x941   : > { %4700 = vmatprep.subr.bf16.mxu1 %v4802_v53  ;;  %v3352_v53 = vld [vmem:[%s6412_s7 + $0x8] sm:$0xff] }
 0x942   : > { %v4701_v28 = vpack.c.bf16 %v3352_v53, %v3351_v2 }
 0x943   : > { %4477 = vmatmul.mubr.f32.vlgmr.msra.gmra.mrb[96].mxu1 %v3195_v60 }
 0x944   : > { %4494 = vmatprep.mubr.msk.f32.mxu1 %vm4803_vm3, %v4804_v36  ;;  %4702 = vmatpush3.bf16.msra.mxu1 %v4701_v28 }
 0x9a8   : > { %v3354_v31 = vpop.permute.xlu1 %3353 }
 0x9b1   : > { %v3434_v15 = vpop.permute.xlu0 %3433 }
 0x9b2   : > { %v3439_v49 = vrot.slane %v3434_v15, %v3274_v21 }
 0xa16   : > { %v3262_v61 = vpop.f32.mrb[96].mxu1 }
 0xa17   : > { %v4478_v34 = vpop.f32.mrb[97].mxu1  ;;  %4488 = vmatmul.mubr.msk.f32.vlgmr.msra.gmra.mrb[96].mxu0 %vm909_vm0, %v3262_v61 }
 0xa18   : > { %4499 = vmatprep.mubr.msk.f32.mxu0 %vm4803_vm3, %v4804_v36 }
 0xaea   : > { %v3346_v36 = vpop.f32.mrb[96].mxu0 }
 0xaeb   : > { %v3347_v57 = vadd.f32 %v3346_v36, %v3275_v22  ;;  %v4489_v24 = vpop.f32.mrb[97].mxu0 }
 0xaed   : > { %v3350_v48 = vmax.f32 %v3347_v57, 0.0 }
 0xaef   : > { %4495 = vmatmul.mubr.msk.f32.vlgmr.msra.gmra.mrb[98].mxu1 %vm3356_vm4, %v3350_v48 }
 0xbc2   : > { %v3426_v0 = vpop.f32.mrb[98].mxu1 }
 0xbc3   : > { %v3427_v14 = vadd.f32 %v3426_v0, %v3354_v31  ;;  %v4496_v41 = vpop.f32.mrb[99].mxu1 }
 0xbc5   : > { %v3430_v27 = vmax.f32 %v3427_v14, 0.0 }
 0xbc7   : > { %4498 = vmatpush3.xpose.msk.msra.mxu0 %vm3440_vm5, %v3430_v27 }
 0xbca   : > { %4500 = vmatmul.mubr.msk.f32.vlgmr.msra.gmra.mrb[98].mxu0 %vm3440_vm5, %v3431_v8 }
 0xc9d   : > { %v3513_v50 = vpop.f32.mrb[98].mxu0 }
 0xc9e   : > { %v3514_v17 = vadd.f32 %v3513_v50, %v3439_v49  ;;  %v4501_v33 = vpop.f32.mrb[99].mxu0 }
 0xca0   : > { %3518 = vst.msk [vmem:[%s395_s12] sm:$0x1] %vm3517_vm6, %v3514_v17 }
 0xca1 PF: > { %s20_s13 = sadd.s32 1, %s4795_s13  }
 0xca2   : > { %p17_p4 = scmp.ge.s32.totalorder %s20_s13, 4  }
 0xca4   :  { %19 = sbr.rel (!%p17_p4) target bundleno = 1 (0x1), region = 100 }

</bundles_post_ra>
